<compile_context>
chip_gen: v5e
topology: v5e:2x2
jax: 0.10.0
libtpu: 0.0.40
codegen_flags: <defaults>
</compile_context>

<pallas_src>
import jax
import jax.numpy as jnp
from jax import lax
from jax.experimental import pallas as pl
from jax.experimental.pallas import tpu as pltpu

# ----- small, kernel-friendly sizes -----
OBS_LEN = 8
PRED_LEN = 8
BATCH = 8          # number of pedestrians
EMB = 32           # embedding_dim
ENC_H = 32         # encoder_h_dim
DEC_H = 64         # decoder_h_dim
MLP_DIM = 64       # mlp_dim

_VMEM = pl.BlockSpec(memory_space=pltpu.MemorySpace.VMEM)


def _lstm_gates(c_prev, gates, H):
    """Standard LSTM cell update from packed pre-activations [i|f|g|o]."""
    i_t = jax.nn.sigmoid(gates[:, 0 * H:1 * H])
    f_t = jax.nn.sigmoid(gates[:, 1 * H:2 * H])
    g_t = jnp.tanh(gates[:, 2 * H:3 * H])
    o_t = jax.nn.sigmoid(gates[:, 3 * H:4 * H])
    c_new = f_t * c_prev + i_t * g_t
    h_new = o_t * jnp.tanh(c_new)
    return h_new, c_new


# ---------------------------------------------------------------------------
# Single fused kernel: encoder LSTM -> mlp_decoder_context -> decoder LSTM.
# ---------------------------------------------------------------------------
def _trajgen_kernel(obs_ref,
                    enc_wemb_ref, enc_bemb_ref, enc_U_ref, enc_V_ref, enc_b_ref,
                    mlp_w1_ref, mlp_b1_ref, mlp_w2_ref, mlp_b2_ref,
                    dec_wemb_ref, dec_bemb_ref, dec_wih_ref, dec_whh_ref, dec_b_ref,
                    dec_wpos_ref, dec_bpos_ref,
                    out_ref,
                    h_all_sc):
    f32 = jnp.float32

    # ------------------------- Encoder -------------------------
    obs = obs_ref[...]                                                # (T*B, 2)
    # Hoisted input path: two batched matmuls cover all OBS_LEN steps.
    e_all = jnp.dot(obs, enc_wemb_ref[...],
                    preferred_element_type=f32) + enc_bemb_ref[...]   # (T*B, EMB)
    eu_all = jnp.dot(e_all, enc_U_ref[...],
                     preferred_element_type=f32) + enc_b_ref[...]     # (T*B, 4*ENC_H)
    enc_V = enc_V_ref[...]

    h = jnp.zeros((BATCH, ENC_H), f32)
    c = jnp.zeros((BATCH, ENC_H), f32)
    for t in range(OBS_LEN):                                          # fully unrolled
        gates = (eu_all[t * BATCH:(t + 1) * BATCH, :]
                 + jnp.dot(h, enc_V, preferred_element_type=f32))     # 1 MXU op / step
        h, c = _lstm_gates(c, gates, ENC_H)
    final_h = h                                                       # (B, ENC_H)

    # -------------------- mlp_decoder_context ------------------
    def bn_relu(x):
        mu = jnp.mean(x, axis=0, keepdims=True)
        var = jnp.mean((x - mu) ** 2, axis=0, keepdims=True)
        return jnp.maximum((x - mu) * lax.rsqrt(var + 1e-5), 0.0)

    h1 = bn_relu(jnp.dot(final_h, mlp_w1_ref[...],
                         preferred_element_type=f32) + mlp_b1_ref[...])
    dec_h = bn_relu(jnp.dot(h1, mlp_w2_ref[...],
                            preferred_element_type=f32) + mlp_b2_ref[...])  # (B, DEC_H)

    # ------------------------- Decoder -------------------------
    wemb = dec_wemb_ref[...]
    bemb = dec_bemb_ref[...]
    wih = dec_wih_ref[...]
    whh = dec_whh_ref[...]
    b = dec_b_ref[...]
    wpos = dec_wpos_ref[...]
    bpos = dec_bpos_ref[...]

    # Fold the re-embedding path into the recurrence (done once, off the serial path):
    #   ((h@wpos + bpos)@wemb + bemb)@wih + h@whh + b
    #     = h @ (whh + wpos@wemb@wih) + (b + (bpos@wemb + bemb)@wih)
    wpe = jnp.dot(wpos, wemb, preferred_element_type=f32)             # (DEC_H, EMB)
    whh_eff = whh + jnp.dot(wpe, wih, preferred_element_type=f32)     # (DEC_H, 4*DEC_H)
    b_eff = b + jnp.dot(jnp.dot(bpos, wemb, preferred_element_type=f32) + bemb,
                        wih, preferred_element_type=f32)              # (1, 4*DEC_H)

    # Step 0 uses the original (unfolded) input path from last_pos_rel.
    last_pos_rel = obs[(OBS_LEN - 1) * BATCH:OBS_LEN * BATCH, :]      # (B, 2)
    x0 = jnp.dot(last_pos_rel, wemb, preferred_element_type=f32) + bemb
    gates0 = (jnp.dot(x0, wih, preferred_element_type=f32) + b
              + jnp.dot(dec_h, whh, preferred_element_type=f32))
    c_d = jnp.zeros((BATCH, DEC_H), f32)                              # decoder_c = zeros
    h_d, c_d = _lstm_gates(c_d, gates0, DEC_H)
    h_all_sc[0:BATCH, :] = h_d

    for t in range(1, PRED_LEN):                                      # fully unrolled
        gates = jnp.dot(h_d, whh_eff, preferred_element_type=f32) + b_eff  # 1 MXU op / step
        h_d, c_d = _lstm_gates(c_d, gates, DEC_H)
        h_all_sc[t * BATCH:(t + 1) * BATCH, :] = h_d

    # One batched hidden2pos projection + a single output store.
    rel_all = jnp.dot(h_all_sc[...], wpos, preferred_element_type=f32) + bpos
    out_ref[...] = rel_all                                            # (PRED_LEN*B, 2)


# ---------------------------------------------------------------------------
# TrajectoryGenerator.forward wrapper (single fused pallas_call).
# ---------------------------------------------------------------------------
def trajectory_generator_forward(obs_traj, obs_traj_rel, seq_start_end, params):
    del obs_traj, seq_start_end  # only used by the (disabled) pooling / noise paths
    obs_flat = obs_traj_rel.reshape(OBS_LEN * BATCH, 2)               # lane-dense, free reshape
    out = pl.pallas_call(
        _trajgen_kernel,
        out_shape=jax.ShapeDtypeStruct((PRED_LEN * BATCH, 2), jnp.float32),
        in_specs=[_VMEM] * 17,
        out_specs=_VMEM,
        scratch_shapes=[pltpu.VMEM((PRED_LEN * BATCH, DEC_H), jnp.float32)],
    )(obs_flat,
      params["enc_wemb"], params["enc_bemb"], params["enc_U"], params["enc_V"],
      params["enc_b"],
      params["mlp_w1"], params["mlp_b1"], params["mlp_w2"], params["mlp_b2"],
      params["dec_wemb"], params["dec_bemb"], params["dec_wih"], params["dec_whh"],
      params["dec_b"], params["dec_wpos"], params["dec_bpos"])
    return out.reshape(PRED_LEN, BATCH, 2)


# ---------------------------------------------------------------------------
# Pure-JAX reference (original, UNFOLDED math) for validation.
# ---------------------------------------------------------------------------
def reference_forward(obs_traj_rel, p):
    h = jnp.zeros((BATCH, ENC_H), jnp.float32)
    c = jnp.zeros((BATCH, ENC_H), jnp.float32)
    for t in range(OBS_LEN):
        e = obs_traj_rel[t] @ p["enc_wemb"] + p["enc_bemb"][0]
        g = e @ p["enc_U"] + h @ p["enc_V"] + p["enc_b"][0]
        i = jax.nn.sigmoid(g[:, :ENC_H])
        f = jax.nn.sigmoid(g[:, ENC_H:2 * ENC_H])
        gg = jnp.tanh(g[:, 2 * ENC_H:3 * ENC_H])
        o = jax.nn.sigmoid(g[:, 3 * ENC_H:])
        c = f * c + i * gg
        h = o * jnp.tanh(c)

    def bn_relu(x):
        mu = x.mean(0, keepdims=True)
        var = ((x - mu) ** 2).mean(0, keepdims=True)
        return jnp.maximum((x - mu) * lax.rsqrt(var + 1e-5), 0.0)

    h1 = bn_relu(h @ p["mlp_w1"] + p["mlp_b1"][0])
    dh = bn_relu(h1 @ p["mlp_w2"] + p["mlp_b2"][0])

    hd = dh
    cd = jnp.zeros((BATCH, DEC_H), jnp.float32)
    x = obs_traj_rel[-1] @ p["dec_wemb"] + p["dec_bemb"][0]
    outs = []
    for _ in range(PRED_LEN):
        g = x @ p["dec_wih"] + hd @ p["dec_whh"] + p["dec_b"][0]
        i = jax.nn.sigmoid(g[:, :DEC_H])
        f = jax.nn.sigmoid(g[:, DEC_H:2 * DEC_H])
        gg = jnp.tanh(g[:, 2 * DEC_H:3 * DEC_H])
        o = jax.nn.sigmoid(g[:, 3 * DEC_H:])
        cd = f * cd + i * gg
        hd = o * jnp.tanh(cd)
        rel = hd @ p["dec_wpos"] + p["dec_bpos"][0]
        outs.append(rel)
        x = rel @ p["dec_wemb"] + p["dec_bemb"][0]
    return jnp.stack(outs, 0)


def make_params(key):
    ks = jax.random.split(key, 16)
    s = 0.1
    f32 = jnp.float32

    def rnd(k, shape):
        return (jax.random.normal(k, shape) * s).astype(f32)

    return {
        # Encoder
        "enc_wemb": rnd(ks[0], (2, EMB)),
        "enc_bemb": rnd(ks[1], (1, EMB)),
        "enc_U": rnd(ks[2], (EMB, 4 * ENC_H)),
        "enc_V": rnd(ks[3], (ENC_H, 4 * ENC_H)),
        "enc_b": rnd(ks[4], (1, 4 * ENC_H)),
        # mlp_decoder_context
        "mlp_w1": rnd(ks[5], (ENC_H, MLP_DIM)),
        "mlp_b1": rnd(ks[6], (1, MLP_DIM)),
        "mlp_w2": rnd(ks[7], (MLP_DIM, DEC_H)),
        "mlp_b2": rnd(ks[8], (1, DEC_H)),
        # Decoder
        "dec_wemb": rnd(ks[9], (2, EMB)),
        "dec_bemb": rnd(ks[10], (1, EMB)),
        "dec_wih": rnd(ks[11], (EMB, 4 * DEC_H)),
        "dec_whh": rnd(ks[12], (DEC_H, 4 * DEC_H)),
        "dec_b": rnd(ks[13], (1, 4 * DEC_H)),
        "dec_wpos": rnd(ks[14], (DEC_H, 2)),
        "dec_bpos": rnd(ks[15], (1, 2)),
    }


if __name__ == "__main__":
    root = jax.random.PRNGKey(0)
    k_par, k_obs, k_rel = jax.random.split(root, 3)

    params = make_params(k_par)
    obs_traj = jax.random.normal(k_obs, (OBS_LEN, BATCH, 2), dtype=jnp.float32)
    obs_traj_rel = jax.random.normal(k_rel, (OBS_LEN, BATCH, 2), dtype=jnp.float32)
    seq_start_end = jnp.array([[0, BATCH]], dtype=jnp.int32)

    pred = jax.jit(trajectory_generator_forward)(obs_traj, obs_traj_rel,
                                                 seq_start_end, params)
    pred = jax.block_until_ready(pred)

    ref = reference_forward(obs_traj_rel, params)
    assert pred.shape == (PRED_LEN, BATCH, 2)
    # Tolerance accounts for the algebraic decoder-weight fold (whh_eff/b_eff) evaluated
    # under default TPU matmul precision; the math is identical in exact arithmetic.
    assert jnp.allclose(pred, ref, atol=1e-2, rtol=1e-2), \
        f"max abs err {jnp.max(jnp.abs(pred - ref))}"

    print("KERNEL_OK")
</pallas_src>

<mosaic_0001>
module attributes {stable_mosaic.version = 11 : i64} {
  func.func @_trajgen_kernel(%arg0: memref<64x2xf32, #tpu.memory_space<vmem>>, %arg1: memref<2x32xf32, #tpu.memory_space<vmem>>, %arg2: memref<1x32xf32, #tpu.memory_space<vmem>>, %arg3: memref<32x128xf32, #tpu.memory_space<vmem>>, %arg4: memref<32x128xf32, #tpu.memory_space<vmem>>, %arg5: memref<1x128xf32, #tpu.memory_space<vmem>>, %arg6: memref<32x64xf32, #tpu.memory_space<vmem>>, %arg7: memref<1x64xf32, #tpu.memory_space<vmem>>, %arg8: memref<64x64xf32, #tpu.memory_space<vmem>>, %arg9: memref<1x64xf32, #tpu.memory_space<vmem>>, %arg10: memref<2x32xf32, #tpu.memory_space<vmem>>, %arg11: memref<1x32xf32, #tpu.memory_space<vmem>>, %arg12: memref<32x256xf32, #tpu.memory_space<vmem>>, %arg13: memref<64x256xf32, #tpu.memory_space<vmem>>, %arg14: memref<1x256xf32, #tpu.memory_space<vmem>>, %arg15: memref<64x2xf32, #tpu.memory_space<vmem>>, %arg16: memref<1x2xf32, #tpu.memory_space<vmem>>, %arg17: memref<64x2xf32, #tpu.memory_space<vmem>>, %arg18: memref<64x64xf32, #tpu.memory_space<vmem>>) attributes {dimension_semantics = [], scalar_prefetch = 0 : i64, scratch_operands = 1 : i64, tpu.core_type = #tpu.core_type<tc>} {
    %c0 = arith.constant 0 : index
    %c0_0 = arith.constant 0 : index
    %0 = vector.load %arg0[%c0, %c0_0] : memref<64x2xf32, #tpu.memory_space<vmem>>, vector<64x2xf32>
    %c0_1 = arith.constant 0 : index
    %c0_2 = arith.constant 0 : index
    %1 = vector.load %arg1[%c0_1, %c0_2] : memref<2x32xf32, #tpu.memory_space<vmem>>, vector<2x32xf32>
    %cst = arith.constant dense<0.000000e+00> : vector<64x32xf32>
    %2 = tpu.matmul %0, %1, %cst {dimension_numbers = #tpu.dot_dimension_numbers<[1], [0], [0], [1], [0, 0, 1, 1], [], []>} : vector<64x2xf32>, vector<2x32xf32>, vector<64x32xf32> -> vector<64x32xf32>
    %c0_3 = arith.constant 0 : index
    %c0_4 = arith.constant 0 : index
    %3 = vector.load %arg2[%c0_3, %c0_4] : memref<1x32xf32, #tpu.memory_space<vmem>>, vector<1x32xf32>
    %4 = vector.broadcast %3 : vector<1x32xf32> to vector<64x32xf32>
    %5 = arith.addf %2, %4 : vector<64x32xf32>
    %c0_5 = arith.constant 0 : index
    %c0_6 = arith.constant 0 : index
    %6 = vector.load %arg3[%c0_5, %c0_6] : memref<32x128xf32, #tpu.memory_space<vmem>>, vector<32x128xf32>
    %cst_7 = arith.constant dense<0.000000e+00> : vector<64x128xf32>
    %7 = tpu.matmul %5, %6, %cst_7 {dimension_numbers = #tpu.dot_dimension_numbers<[1], [0], [0], [1], [0, 0, 1, 1], [], []>} : vector<64x32xf32>, vector<32x128xf32>, vector<64x128xf32> -> vector<64x128xf32>
    %c0_8 = arith.constant 0 : index
    %c0_9 = arith.constant 0 : index
    %8 = vector.load %arg5[%c0_8, %c0_9] : memref<1x128xf32, #tpu.memory_space<vmem>>, vector<1x128xf32>
    %9 = vector.broadcast %8 : vector<1x128xf32> to vector<64x128xf32>
    %10 = arith.addf %7, %9 : vector<64x128xf32>
    %c0_10 = arith.constant 0 : index
    %c0_11 = arith.constant 0 : index
    %11 = vector.load %arg4[%c0_10, %c0_11] : memref<32x128xf32, #tpu.memory_space<vmem>>, vector<32x128xf32>
    %cst_12 = arith.constant 0.000000e+00 : f32
    %12 = vector.broadcast %cst_12 : f32 to vector<8x32xf32>
    %cst_13 = arith.constant 0.000000e+00 : f32
    %13 = vector.broadcast %cst_13 : f32 to vector<8x32xf32>
    %14 = vector.extract_strided_slice %10 {offsets = [0, 0], sizes = [8, 128], strides = [1, 1]} : vector<64x128xf32> to vector<8x128xf32>
    %cst_14 = arith.constant dense<0.000000e+00> : vector<8x128xf32>
    %15 = tpu.matmul %12, %11, %cst_14 {dimension_numbers = #tpu.dot_dimension_numbers<[1], [0], [0], [1], [0, 0, 1, 1], [], []>} : vector<8x32xf32>, vector<32x128xf32>, vector<8x128xf32> -> vector<8x128xf32>
    %16 = arith.addf %14, %15 : vector<8x128xf32>
    %17 = vector.extract_strided_slice %16 {offsets = [0, 0], sizes = [8, 32], strides = [1, 1]} : vector<8x128xf32> to vector<8x32xf32>
    %18 = arith.negf %17 : vector<8x32xf32>
    %19 = math.exp %18 : vector<8x32xf32>
    %cst_15 = arith.constant 1.000000e+00 : f32
    %20 = vector.broadcast %cst_15 : f32 to vector<8x32xf32>
    %21 = arith.addf %20, %19 : vector<8x32xf32>
    %22 = arith.divf %20, %21 : vector<8x32xf32>
    %23 = vector.extract_strided_slice %16 {offsets = [0, 32], sizes = [8, 32], strides = [1, 1]} : vector<8x128xf32> to vector<8x32xf32>
    %24 = arith.negf %23 : vector<8x32xf32>
    %25 = math.exp %24 : vector<8x32xf32>
    %cst_16 = arith.constant 1.000000e+00 : f32
    %26 = vector.broadcast %cst_16 : f32 to vector<8x32xf32>
    %27 = arith.addf %26, %25 : vector<8x32xf32>
    %28 = arith.divf %26, %27 : vector<8x32xf32>
    %29 = vector.extract_strided_slice %16 {offsets = [0, 64], sizes = [8, 32], strides = [1, 1]} : vector<8x128xf32> to vector<8x32xf32>
    %30 = math.tanh %29 : vector<8x32xf32>
    %31 = vector.extract_strided_slice %16 {offsets = [0, 96], sizes = [8, 32], strides = [1, 1]} : vector<8x128xf32> to vector<8x32xf32>
    %32 = arith.negf %31 : vector<8x32xf32>
    %33 = math.exp %32 : vector<8x32xf32>
    %cst_17 = arith.constant 1.000000e+00 : f32
    %34 = vector.broadcast %cst_17 : f32 to vector<8x32xf32>
    %35 = arith.addf %34, %33 : vector<8x32xf32>
    %36 = arith.divf %34, %35 : vector<8x32xf32>
    %37 = arith.mulf %28, %13 : vector<8x32xf32>
    %38 = arith.mulf %22, %30 : vector<8x32xf32>
    %39 = arith.addf %37, %38 : vector<8x32xf32>
    %40 = math.tanh %39 : vector<8x32xf32>
    %41 = arith.mulf %36, %40 : vector<8x32xf32>
    %42 = vector.extract_strided_slice %10 {offsets = [8, 0], sizes = [8, 128], strides = [1, 1]} : vector<64x128xf32> to vector<8x128xf32>
    %cst_18 = arith.constant dense<0.000000e+00> : vector<8x128xf32>
    %43 = tpu.matmul %41, %11, %cst_18 {dimension_numbers = #tpu.dot_dimension_numbers<[1], [0], [0], [1], [0, 0, 1, 1], [], []>} : vector<8x32xf32>, vector<32x128xf32>, vector<8x128xf32> -> vector<8x128xf32>
    %44 = arith.addf %42, %43 : vector<8x128xf32>
    %45 = vector.extract_strided_slice %44 {offsets = [0, 0], sizes = [8, 32], strides = [1, 1]} : vector<8x128xf32> to vector<8x32xf32>
    %46 = arith.negf %45 : vector<8x32xf32>
    %47 = math.exp %46 : vector<8x32xf32>
    %cst_19 = arith.constant 1.000000e+00 : f32
    %48 = vector.broadcast %cst_19 : f32 to vector<8x32xf32>
    %49 = arith.addf %48, %47 : vector<8x32xf32>
    %50 = arith.divf %48, %49 : vector<8x32xf32>
    %51 = vector.extract_strided_slice %44 {offsets = [0, 32], sizes = [8, 32], strides = [1, 1]} : vector<8x128xf32> to vector<8x32xf32>
    %52 = arith.negf %51 : vector<8x32xf32>
    %53 = math.exp %52 : vector<8x32xf32>
    %cst_20 = arith.constant 1.000000e+00 : f32
    %54 = vector.broadcast %cst_20 : f32 to vector<8x32xf32>
    %55 = arith.addf %54, %53 : vector<8x32xf32>
    %56 = arith.divf %54, %55 : vector<8x32xf32>
    %57 = vector.extract_strided_slice %44 {offsets = [0, 64], sizes = [8, 32], strides = [1, 1]} : vector<8x128xf32> to vector<8x32xf32>
    %58 = math.tanh %57 : vector<8x32xf32>
    %59 = vector.extract_strided_slice %44 {offsets = [0, 96], sizes = [8, 32], strides = [1, 1]} : vector<8x128xf32> to vector<8x32xf32>
    %60 = arith.negf %59 : vector<8x32xf32>
    %61 = math.exp %60 : vector<8x32xf32>
    %cst_21 = arith.constant 1.000000e+00 : f32
    %62 = vector.broadcast %cst_21 : f32 to vector<8x32xf32>
    %63 = arith.addf %62, %61 : vector<8x32xf32>
    %64 = arith.divf %62, %63 : vector<8x32xf32>
    %65 = arith.mulf %56, %39 : vector<8x32xf32>
    %66 = arith.mulf %50, %58 : vector<8x32xf32>
    %67 = arith.addf %65, %66 : vector<8x32xf32>
    %68 = math.tanh %67 : vector<8x32xf32>
    %69 = arith.mulf %64, %68 : vector<8x32xf32>
    %70 = vector.extract_strided_slice %10 {offsets = [16, 0], sizes = [8, 128], strides = [1, 1]} : vector<64x128xf32> to vector<8x128xf32>
    %cst_22 = arith.constant dense<0.000000e+00> : vector<8x128xf32>
    %71 = tpu.matmul %69, %11, %cst_22 {dimension_numbers = #tpu.dot_dimension_numbers<[1], [0], [0], [1], [0, 0, 1, 1], [], []>} : vector<8x32xf32>, vector<32x128xf32>, vector<8x128xf32> -> vector<8x128xf32>
    %72 = arith.addf %70, %71 : vector<8x128xf32>
    %73 = vector.extract_strided_slice %72 {offsets = [0, 0], sizes = [8, 32], strides = [1, 1]} : vector<8x128xf32> to vector<8x32xf32>
    %74 = arith.negf %73 : vector<8x32xf32>
    %75 = math.exp %74 : vector<8x32xf32>
    %cst_23 = arith.constant 1.000000e+00 : f32
    %76 = vector.broadcast %cst_23 : f32 to vector<8x32xf32>
    %77 = arith.addf %76, %75 : vector<8x32xf32>
    %78 = arith.divf %76, %77 : vector<8x32xf32>
    %79 = vector.extract_strided_slice %72 {offsets = [0, 32], sizes = [8, 32], strides = [1, 1]} : vector<8x128xf32> to vector<8x32xf32>
    %80 = arith.negf %79 : vector<8x32xf32>
    %81 = math.exp %80 : vector<8x32xf32>
    %cst_24 = arith.constant 1.000000e+00 : f32
    %82 = vector.broadcast %cst_24 : f32 to vector<8x32xf32>
    %83 = arith.addf %82, %81 : vector<8x32xf32>
    %84 = arith.divf %82, %83 : vector<8x32xf32>
    %85 = vector.extract_strided_slice %72 {offsets = [0, 64], sizes = [8, 32], strides = [1, 1]} : vector<8x128xf32> to vector<8x32xf32>
    %86 = math.tanh %85 : vector<8x32xf32>
    %87 = vector.extract_strided_slice %72 {offsets = [0, 96], sizes = [8, 32], strides = [1, 1]} : vector<8x128xf32> to vector<8x32xf32>
    %88 = arith.negf %87 : vector<8x32xf32>
    %89 = math.exp %88 : vector<8x32xf32>
    %cst_25 = arith.constant 1.000000e+00 : f32
    %90 = vector.broadcast %cst_25 : f32 to vector<8x32xf32>
    %91 = arith.addf %90, %89 : vector<8x32xf32>
    %92 = arith.divf %90, %91 : vector<8x32xf32>
    %93 = arith.mulf %84, %67 : vector<8x32xf32>
    %94 = arith.mulf %78, %86 : vector<8x32xf32>
    %95 = arith.addf %93, %94 : vector<8x32xf32>
    %96 = math.tanh %95 : vector<8x32xf32>
    %97 = arith.mulf %92, %96 : vector<8x32xf32>
    %98 = vector.extract_strided_slice %10 {offsets = [24, 0], sizes = [8, 128], strides = [1, 1]} : vector<64x128xf32> to vector<8x128xf32>
    %cst_26 = arith.constant dense<0.000000e+00> : vector<8x128xf32>
    %99 = tpu.matmul %97, %11, %cst_26 {dimension_numbers = #tpu.dot_dimension_numbers<[1], [0], [0], [1], [0, 0, 1, 1], [], []>} : vector<8x32xf32>, vector<32x128xf32>, vector<8x128xf32> -> vector<8x128xf32>
    %100 = arith.addf %98, %99 : vector<8x128xf32>
    %101 = vector.extract_strided_slice %100 {offsets = [0, 0], sizes = [8, 32], strides = [1, 1]} : vector<8x128xf32> to vector<8x32xf32>
    %102 = arith.negf %101 : vector<8x32xf32>
    %103 = math.exp %102 : vector<8x32xf32>
    %cst_27 = arith.constant 1.000000e+00 : f32
    %104 = vector.broadcast %cst_27 : f32 to vector<8x32xf32>
    %105 = arith.addf %104, %103 : vector<8x32xf32>
    %106 = arith.divf %104, %105 : vector<8x32xf32>
    %107 = vector.extract_strided_slice %100 {offsets = [0, 32], sizes = [8, 32], strides = [1, 1]} : vector<8x128xf32> to vector<8x32xf32>
    %108 = arith.negf %107 : vector<8x32xf32>
    %109 = math.exp %108 : vector<8x32xf32>
    %cst_28 = arith.constant 1.000000e+00 : f32
    %110 = vector.broadcast %cst_28 : f32 to vector<8x32xf32>
    %111 = arith.addf %110, %109 : vector<8x32xf32>
    %112 = arith.divf %110, %111 : vector<8x32xf32>
    %113 = vector.extract_strided_slice %100 {offsets = [0, 64], sizes = [8, 32], strides = [1, 1]} : vector<8x128xf32> to vector<8x32xf32>
    %114 = math.tanh %113 : vector<8x32xf32>
    %115 = vector.extract_strided_slice %100 {offsets = [0, 96], sizes = [8, 32], strides = [1, 1]} : vector<8x128xf32> to vector<8x32xf32>
    %116 = arith.negf %115 : vector<8x32xf32>
    %117 = math.exp %116 : vector<8x32xf32>
    %cst_29 = arith.constant 1.000000e+00 : f32
    %118 = vector.broadcast %cst_29 : f32 to vector<8x32xf32>
    %119 = arith.addf %118, %117 : vector<8x32xf32>
    %120 = arith.divf %118, %119 : vector<8x32xf32>
    %121 = arith.mulf %112, %95 : vector<8x32xf32>
    %122 = arith.mulf %106, %114 : vector<8x32xf32>
    %123 = arith.addf %121, %122 : vector<8x32xf32>
    %124 = math.tanh %123 : vector<8x32xf32>
    %125 = arith.mulf %120, %124 : vector<8x32xf32>
    %126 = vector.extract_strided_slice %10 {offsets = [32, 0], sizes = [8, 128], strides = [1, 1]} : vector<64x128xf32> to vector<8x128xf32>
    %cst_30 = arith.constant dense<0.000000e+00> : vector<8x128xf32>
    %127 = tpu.matmul %125, %11, %cst_30 {dimension_numbers = #tpu.dot_dimension_numbers<[1], [0], [0], [1], [0, 0, 1, 1], [], []>} : vector<8x32xf32>, vector<32x128xf32>, vector<8x128xf32> -> vector<8x128xf32>
    %128 = arith.addf %126, %127 : vector<8x128xf32>
    %129 = vector.extract_strided_slice %128 {offsets = [0, 0], sizes = [8, 32], strides = [1, 1]} : vector<8x128xf32> to vector<8x32xf32>
    %130 = arith.negf %129 : vector<8x32xf32>
    %131 = math.exp %130 : vector<8x32xf32>
    %cst_31 = arith.constant 1.000000e+00 : f32
    %132 = vector.broadcast %cst_31 : f32 to vector<8x32xf32>
    %133 = arith.addf %132, %131 : vector<8x32xf32>
    %134 = arith.divf %132, %133 : vector<8x32xf32>
    %135 = vector.extract_strided_slice %128 {offsets = [0, 32], sizes = [8, 32], strides = [1, 1]} : vector<8x128xf32> to vector<8x32xf32>
    %136 = arith.negf %135 : vector<8x32xf32>
    %137 = math.exp %136 : vector<8x32xf32>
    %cst_32 = arith.constant 1.000000e+00 : f32
    %138 = vector.broadcast %cst_32 : f32 to vector<8x32xf32>
    %139 = arith.addf %138, %137 : vector<8x32xf32>
    %140 = arith.divf %138, %139 : vector<8x32xf32>
    %141 = vector.extract_strided_slice %128 {offsets = [0, 64], sizes = [8, 32], strides = [1, 1]} : vector<8x128xf32> to vector<8x32xf32>
    %142 = math.tanh %141 : vector<8x32xf32>
    %143 = vector.extract_strided_slice %128 {offsets = [0, 96], sizes = [8, 32], strides = [1, 1]} : vector<8x128xf32> to vector<8x32xf32>
    %144 = arith.negf %143 : vector<8x32xf32>
    %145 = math.exp %144 : vector<8x32xf32>
    %cst_33 = arith.constant 1.000000e+00 : f32
    %146 = vector.broadcast %cst_33 : f32 to vector<8x32xf32>
    %147 = arith.addf %146, %145 : vector<8x32xf32>
    %148 = arith.divf %146, %147 : vector<8x32xf32>
    %149 = arith.mulf %140, %123 : vector<8x32xf32>
    %150 = arith.mulf %134, %142 : vector<8x32xf32>
    %151 = arith.addf %149, %150 : vector<8x32xf32>
    %152 = math.tanh %151 : vector<8x32xf32>
    %153 = arith.mulf %148, %152 : vector<8x32xf32>
    %154 = vector.extract_strided_slice %10 {offsets = [40, 0], sizes = [8, 128], strides = [1, 1]} : vector<64x128xf32> to vector<8x128xf32>
    %cst_34 = arith.constant dense<0.000000e+00> : vector<8x128xf32>
    %155 = tpu.matmul %153, %11, %cst_34 {dimension_numbers = #tpu.dot_dimension_numbers<[1], [0], [0], [1], [0, 0, 1, 1], [], []>} : vector<8x32xf32>, vector<32x128xf32>, vector<8x128xf32> -> vector<8x128xf32>
    %156 = arith.addf %154, %155 : vector<8x128xf32>
    %157 = vector.extract_strided_slice %156 {offsets = [0, 0], sizes = [8, 32], strides = [1, 1]} : vector<8x128xf32> to vector<8x32xf32>
    %158 = arith.negf %157 : vector<8x32xf32>
    %159 = math.exp %158 : vector<8x32xf32>
    %cst_35 = arith.constant 1.000000e+00 : f32
    %160 = vector.broadcast %cst_35 : f32 to vector<8x32xf32>
    %161 = arith.addf %160, %159 : vector<8x32xf32>
    %162 = arith.divf %160, %161 : vector<8x32xf32>
    %163 = vector.extract_strided_slice %156 {offsets = [0, 32], sizes = [8, 32], strides = [1, 1]} : vector<8x128xf32> to vector<8x32xf32>
    %164 = arith.negf %163 : vector<8x32xf32>
    %165 = math.exp %164 : vector<8x32xf32>
    %cst_36 = arith.constant 1.000000e+00 : f32
    %166 = vector.broadcast %cst_36 : f32 to vector<8x32xf32>
    %167 = arith.addf %166, %165 : vector<8x32xf32>
    %168 = arith.divf %166, %167 : vector<8x32xf32>
    %169 = vector.extract_strided_slice %156 {offsets = [0, 64], sizes = [8, 32], strides = [1, 1]} : vector<8x128xf32> to vector<8x32xf32>
    %170 = math.tanh %169 : vector<8x32xf32>
    %171 = vector.extract_strided_slice %156 {offsets = [0, 96], sizes = [8, 32], strides = [1, 1]} : vector<8x128xf32> to vector<8x32xf32>
    %172 = arith.negf %171 : vector<8x32xf32>
    %173 = math.exp %172 : vector<8x32xf32>
    %cst_37 = arith.constant 1.000000e+00 : f32
    %174 = vector.broadcast %cst_37 : f32 to vector<8x32xf32>
    %175 = arith.addf %174, %173 : vector<8x32xf32>
    %176 = arith.divf %174, %175 : vector<8x32xf32>
    %177 = arith.mulf %168, %151 : vector<8x32xf32>
    %178 = arith.mulf %162, %170 : vector<8x32xf32>
    %179 = arith.addf %177, %178 : vector<8x32xf32>
    %180 = math.tanh %179 : vector<8x32xf32>
    %181 = arith.mulf %176, %180 : vector<8x32xf32>
    %182 = vector.extract_strided_slice %10 {offsets = [48, 0], sizes = [8, 128], strides = [1, 1]} : vector<64x128xf32> to vector<8x128xf32>
    %cst_38 = arith.constant dense<0.000000e+00> : vector<8x128xf32>
    %183 = tpu.matmul %181, %11, %cst_38 {dimension_numbers = #tpu.dot_dimension_numbers<[1], [0], [0], [1], [0, 0, 1, 1], [], []>} : vector<8x32xf32>, vector<32x128xf32>, vector<8x128xf32> -> vector<8x128xf32>
    %184 = arith.addf %182, %183 : vector<8x128xf32>
    %185 = vector.extract_strided_slice %184 {offsets = [0, 0], sizes = [8, 32], strides = [1, 1]} : vector<8x128xf32> to vector<8x32xf32>
    %186 = arith.negf %185 : vector<8x32xf32>
    %187 = math.exp %186 : vector<8x32xf32>
    %cst_39 = arith.constant 1.000000e+00 : f32
    %188 = vector.broadcast %cst_39 : f32 to vector<8x32xf32>
    %189 = arith.addf %188, %187 : vector<8x32xf32>
    %190 = arith.divf %188, %189 : vector<8x32xf32>
    %191 = vector.extract_strided_slice %184 {offsets = [0, 32], sizes = [8, 32], strides = [1, 1]} : vector<8x128xf32> to vector<8x32xf32>
    %192 = arith.negf %191 : vector<8x32xf32>
    %193 = math.exp %192 : vector<8x32xf32>
    %cst_40 = arith.constant 1.000000e+00 : f32
    %194 = vector.broadcast %cst_40 : f32 to vector<8x32xf32>
    %195 = arith.addf %194, %193 : vector<8x32xf32>
    %196 = arith.divf %194, %195 : vector<8x32xf32>
    %197 = vector.extract_strided_slice %184 {offsets = [0, 64], sizes = [8, 32], strides = [1, 1]} : vector<8x128xf32> to vector<8x32xf32>
    %198 = math.tanh %197 : vector<8x32xf32>
    %199 = vector.extract_strided_slice %184 {offsets = [0, 96], sizes = [8, 32], strides = [1, 1]} : vector<8x128xf32> to vector<8x32xf32>
    %200 = arith.negf %199 : vector<8x32xf32>
    %201 = math.exp %200 : vector<8x32xf32>
    %cst_41 = arith.constant 1.000000e+00 : f32
    %202 = vector.broadcast %cst_41 : f32 to vector<8x32xf32>
    %203 = arith.addf %202, %201 : vector<8x32xf32>
    %204 = arith.divf %202, %203 : vector<8x32xf32>
    %205 = arith.mulf %196, %179 : vector<8x32xf32>
    %206 = arith.mulf %190, %198 : vector<8x32xf32>
    %207 = arith.addf %205, %206 : vector<8x32xf32>
    %208 = math.tanh %207 : vector<8x32xf32>
    %209 = arith.mulf %204, %208 : vector<8x32xf32>
    %210 = vector.extract_strided_slice %10 {offsets = [56, 0], sizes = [8, 128], strides = [1, 1]} : vector<64x128xf32> to vector<8x128xf32>
    %cst_42 = arith.constant dense<0.000000e+00> : vector<8x128xf32>
    %211 = tpu.matmul %209, %11, %cst_42 {dimension_numbers = #tpu.dot_dimension_numbers<[1], [0], [0], [1], [0, 0, 1, 1], [], []>} : vector<8x32xf32>, vector<32x128xf32>, vector<8x128xf32> -> vector<8x128xf32>
    %212 = arith.addf %210, %211 : vector<8x128xf32>
    %213 = vector.extract_strided_slice %212 {offsets = [0, 0], sizes = [8, 32], strides = [1, 1]} : vector<8x128xf32> to vector<8x32xf32>
    %214 = arith.negf %213 : vector<8x32xf32>
    %215 = math.exp %214 : vector<8x32xf32>
    %cst_43 = arith.constant 1.000000e+00 : f32
    %216 = vector.broadcast %cst_43 : f32 to vector<8x32xf32>
    %217 = arith.addf %216, %215 : vector<8x32xf32>
    %218 = arith.divf %216, %217 : vector<8x32xf32>
    %219 = vector.extract_strided_slice %212 {offsets = [0, 32], sizes = [8, 32], strides = [1, 1]} : vector<8x128xf32> to vector<8x32xf32>
    %220 = arith.negf %219 : vector<8x32xf32>
    %221 = math.exp %220 : vector<8x32xf32>
    %cst_44 = arith.constant 1.000000e+00 : f32
    %222 = vector.broadcast %cst_44 : f32 to vector<8x32xf32>
    %223 = arith.addf %222, %221 : vector<8x32xf32>
    %224 = arith.divf %222, %223 : vector<8x32xf32>
    %225 = vector.extract_strided_slice %212 {offsets = [0, 64], sizes = [8, 32], strides = [1, 1]} : vector<8x128xf32> to vector<8x32xf32>
    %226 = math.tanh %225 : vector<8x32xf32>
    %227 = vector.extract_strided_slice %212 {offsets = [0, 96], sizes = [8, 32], strides = [1, 1]} : vector<8x128xf32> to vector<8x32xf32>
    %228 = arith.negf %227 : vector<8x32xf32>
    %229 = math.exp %228 : vector<8x32xf32>
    %cst_45 = arith.constant 1.000000e+00 : f32
    %230 = vector.broadcast %cst_45 : f32 to vector<8x32xf32>
    %231 = arith.addf %230, %229 : vector<8x32xf32>
    %232 = arith.divf %230, %231 : vector<8x32xf32>
    %233 = arith.mulf %224, %207 : vector<8x32xf32>
    %234 = arith.mulf %218, %226 : vector<8x32xf32>
    %235 = arith.addf %233, %234 : vector<8x32xf32>
    %236 = math.tanh %235 : vector<8x32xf32>
    %237 = arith.mulf %232, %236 : vector<8x32xf32>
    %c0_46 = arith.constant 0 : index
    %c0_47 = arith.constant 0 : index
    %238 = vector.load %arg6[%c0_46, %c0_47] : memref<32x64xf32, #tpu.memory_space<vmem>>, vector<32x64xf32>
    %cst_48 = arith.constant dense<0.000000e+00> : vector<8x64xf32>
    %239 = tpu.matmul %237, %238, %cst_48 {dimension_numbers = #tpu.dot_dimension_numbers<[1], [0], [0], [1], [0, 0, 1, 1], [], []>} : vector<8x32xf32>, vector<32x64xf32>, vector<8x64xf32> -> vector<8x64xf32>
    %c0_49 = arith.constant 0 : index
    %c0_50 = arith.constant 0 : index
    %240 = vector.load %arg7[%c0_49, %c0_50] : memref<1x64xf32, #tpu.memory_space<vmem>>, vector<1x64xf32>
    %241 = vector.broadcast %240 : vector<1x64xf32> to vector<8x64xf32>
    %242 = arith.addf %239, %241 : vector<8x64xf32>
    %cst_51 = arith.constant dense<0.000000e+00> : vector<64xf32>
    %243 = vector.multi_reduction <add>, %242, %cst_51 [0] : vector<8x64xf32> to vector<64xf32>
    %244 = vector.shape_cast %243 : vector<64xf32> to vector<1x64xf32>
    %cst_52 = arith.constant 8.000000e+00 : f32
    %245 = vector.broadcast %cst_52 : f32 to vector<1x64xf32>
    %246 = arith.divf %244, %245 : vector<1x64xf32>
    %247 = vector.broadcast %246 : vector<1x64xf32> to vector<8x64xf32>
    %248 = arith.subf %242, %247 : vector<8x64xf32>
    %249 = arith.mulf %248, %248 : vector<8x64xf32>
    %cst_53 = arith.constant dense<0.000000e+00> : vector<64xf32>
    %250 = vector.multi_reduction <add>, %249, %cst_53 [0] : vector<8x64xf32> to vector<64xf32>
    %251 = vector.shape_cast %250 : vector<64xf32> to vector<1x64xf32>
    %cst_54 = arith.constant 8.000000e+00 : f32
    %252 = vector.broadcast %cst_54 : f32 to vector<1x64xf32>
    %253 = arith.divf %251, %252 : vector<1x64xf32>
    %254 = vector.broadcast %246 : vector<1x64xf32> to vector<8x64xf32>
    %255 = arith.subf %242, %254 : vector<8x64xf32>
    %cst_55 = arith.constant 9.99999974E-6 : f32
    %256 = vector.broadcast %cst_55 : f32 to vector<1x64xf32>
    %257 = arith.addf %253, %256 : vector<1x64xf32>
    %258 = math.rsqrt %257 : vector<1x64xf32>
    %259 = vector.broadcast %258 : vector<1x64xf32> to vector<8x64xf32>
    %260 = arith.mulf %255, %259 : vector<8x64xf32>
    %cst_56 = arith.constant 0.000000e+00 : f32
    %261 = vector.broadcast %cst_56 : f32 to vector<8x64xf32>
    %262 = arith.maximumf %260, %261 : vector<8x64xf32>
    %c0_57 = arith.constant 0 : index
    %c0_58 = arith.constant 0 : index
    %263 = vector.load %arg8[%c0_57, %c0_58] : memref<64x64xf32, #tpu.memory_space<vmem>>, vector<64x64xf32>
    %cst_59 = arith.constant dense<0.000000e+00> : vector<8x64xf32>
    %264 = tpu.matmul %262, %263, %cst_59 {dimension_numbers = #tpu.dot_dimension_numbers<[1], [0], [0], [1], [0, 0, 1, 1], [], []>} : vector<8x64xf32>, vector<64x64xf32>, vector<8x64xf32> -> vector<8x64xf32>
    %c0_60 = arith.constant 0 : index
    %c0_61 = arith.constant 0 : index
    %265 = vector.load %arg9[%c0_60, %c0_61] : memref<1x64xf32, #tpu.memory_space<vmem>>, vector<1x64xf32>
    %266 = vector.broadcast %265 : vector<1x64xf32> to vector<8x64xf32>
    %267 = arith.addf %264, %266 : vector<8x64xf32>
    %cst_62 = arith.constant dense<0.000000e+00> : vector<64xf32>
    %268 = vector.multi_reduction <add>, %267, %cst_62 [0] : vector<8x64xf32> to vector<64xf32>
    %269 = vector.shape_cast %268 : vector<64xf32> to vector<1x64xf32>
    %cst_63 = arith.constant 8.000000e+00 : f32
    %270 = vector.broadcast %cst_63 : f32 to vector<1x64xf32>
    %271 = arith.divf %269, %270 : vector<1x64xf32>
    %272 = vector.broadcast %271 : vector<1x64xf32> to vector<8x64xf32>
    %273 = arith.subf %267, %272 : vector<8x64xf32>
    %274 = arith.mulf %273, %273 : vector<8x64xf32>
    %cst_64 = arith.constant dense<0.000000e+00> : vector<64xf32>
    %275 = vector.multi_reduction <add>, %274, %cst_64 [0] : vector<8x64xf32> to vector<64xf32>
    %276 = vector.shape_cast %275 : vector<64xf32> to vector<1x64xf32>
    %cst_65 = arith.constant 8.000000e+00 : f32
    %277 = vector.broadcast %cst_65 : f32 to vector<1x64xf32>
    %278 = arith.divf %276, %277 : vector<1x64xf32>
    %279 = vector.broadcast %271 : vector<1x64xf32> to vector<8x64xf32>
    %280 = arith.subf %267, %279 : vector<8x64xf32>
    %cst_66 = arith.constant 9.99999974E-6 : f32
    %281 = vector.broadcast %cst_66 : f32 to vector<1x64xf32>
    %282 = arith.addf %278, %281 : vector<1x64xf32>
    %283 = math.rsqrt %282 : vector<1x64xf32>
    %284 = vector.broadcast %283 : vector<1x64xf32> to vector<8x64xf32>
    %285 = arith.mulf %280, %284 : vector<8x64xf32>
    %cst_67 = arith.constant 0.000000e+00 : f32
    %286 = vector.broadcast %cst_67 : f32 to vector<8x64xf32>
    %287 = arith.maximumf %285, %286 : vector<8x64xf32>
    %c0_68 = arith.constant 0 : index
    %c0_69 = arith.constant 0 : index
    %288 = vector.load %arg10[%c0_68, %c0_69] : memref<2x32xf32, #tpu.memory_space<vmem>>, vector<2x32xf32>
    %c0_70 = arith.constant 0 : index
    %c0_71 = arith.constant 0 : index
    %289 = vector.load %arg11[%c0_70, %c0_71] : memref<1x32xf32, #tpu.memory_space<vmem>>, vector<1x32xf32>
    %c0_72 = arith.constant 0 : index
    %c0_73 = arith.constant 0 : index
    %290 = vector.load %arg12[%c0_72, %c0_73] : memref<32x256xf32, #tpu.memory_space<vmem>>, vector<32x256xf32>
    %c0_74 = arith.constant 0 : index
    %c0_75 = arith.constant 0 : index
    %291 = vector.load %arg13[%c0_74, %c0_75] : memref<64x256xf32, #tpu.memory_space<vmem>>, vector<64x256xf32>
    %c0_76 = arith.constant 0 : index
    %c0_77 = arith.constant 0 : index
    %292 = vector.load %arg14[%c0_76, %c0_77] : memref<1x256xf32, #tpu.memory_space<vmem>>, vector<1x256xf32>
    %c0_78 = arith.constant 0 : index
    %c0_79 = arith.constant 0 : index
    %293 = vector.load %arg15[%c0_78, %c0_79] : memref<64x2xf32, #tpu.memory_space<vmem>>, vector<64x2xf32>
    %c0_80 = arith.constant 0 : index
    %c0_81 = arith.constant 0 : index
    %294 = vector.load %arg16[%c0_80, %c0_81] : memref<1x2xf32, #tpu.memory_space<vmem>>, vector<1x2xf32>
    %cst_82 = arith.constant dense<0.000000e+00> : vector<64x32xf32>
    %295 = tpu.matmul %293, %288, %cst_82 {dimension_numbers = #tpu.dot_dimension_numbers<[1], [0], [0], [1], [0, 0, 1, 1], [], []>} : vector<64x2xf32>, vector<2x32xf32>, vector<64x32xf32> -> vector<64x32xf32>
    %cst_83 = arith.constant dense<0.000000e+00> : vector<64x256xf32>
    %296 = tpu.matmul %295, %290, %cst_83 {dimension_numbers = #tpu.dot_dimension_numbers<[1], [0], [0], [1], [0, 0, 1, 1], [], []>} : vector<64x32xf32>, vector<32x256xf32>, vector<64x256xf32> -> vector<64x256xf32>
    %297 = arith.addf %291, %296 : vector<64x256xf32>
    %cst_84 = arith.constant dense<0.000000e+00> : vector<1x32xf32>
    %298 = tpu.matmul %294, %288, %cst_84 {dimension_numbers = #tpu.dot_dimension_numbers<[1], [0], [0], [1], [0, 0, 1, 1], [], []>} : vector<1x2xf32>, vector<2x32xf32>, vector<1x32xf32> -> vector<1x32xf32>
    %299 = arith.addf %298, %289 : vector<1x32xf32>
    %cst_85 = arith.constant dense<0.000000e+00> : vector<1x256xf32>
    %300 = tpu.matmul %299, %290, %cst_85 {dimension_numbers = #tpu.dot_dimension_numbers<[1], [0], [0], [1], [0, 0, 1, 1], [], []>} : vector<1x32xf32>, vector<32x256xf32>, vector<1x256xf32> -> vector<1x256xf32>
    %301 = arith.addf %292, %300 : vector<1x256xf32>
    %302 = vector.extract_strided_slice %0 {offsets = [56, 0], sizes = [8, 2], strides = [1, 1]} : vector<64x2xf32> to vector<8x2xf32>
    %cst_86 = arith.constant dense<0.000000e+00> : vector<8x32xf32>
    %303 = tpu.matmul %302, %288, %cst_86 {dimension_numbers = #tpu.dot_dimension_numbers<[1], [0], [0], [1], [0, 0, 1, 1], [], []>} : vector<8x2xf32>, vector<2x32xf32>, vector<8x32xf32> -> vector<8x32xf32>
    %304 = vector.broadcast %289 : vector<1x32xf32> to vector<8x32xf32>
    %305 = arith.addf %303, %304 : vector<8x32xf32>
    %cst_87 = arith.constant dense<0.000000e+00> : vector<8x256xf32>
    %306 = tpu.matmul %305, %290, %cst_87 {dimension_numbers = #tpu.dot_dimension_numbers<[1], [0], [0], [1], [0, 0, 1, 1], [], []>} : vector<8x32xf32>, vector<32x256xf32>, vector<8x256xf32> -> vector<8x256xf32>
    %307 = vector.broadcast %292 : vector<1x256xf32> to vector<8x256xf32>
    %308 = arith.addf %306, %307 : vector<8x256xf32>
    %cst_88 = arith.constant dense<0.000000e+00> : vector<8x256xf32>
    %309 = tpu.matmul %287, %291, %cst_88 {dimension_numbers = #tpu.dot_dimension_numbers<[1], [0], [0], [1], [0, 0, 1, 1], [], []>} : vector<8x64xf32>, vector<64x256xf32>, vector<8x256xf32> -> vector<8x256xf32>
    %310 = arith.addf %308, %309 : vector<8x256xf32>
    %cst_89 = arith.constant 0.000000e+00 : f32
    %311 = vector.broadcast %cst_89 : f32 to vector<8x64xf32>
    %312 = vector.extract_strided_slice %310 {offsets = [0, 0], sizes = [8, 64], strides = [1, 1]} : vector<8x256xf32> to vector<8x64xf32>
    %313 = arith.negf %312 : vector<8x64xf32>
    %314 = math.exp %313 : vector<8x64xf32>
    %cst_90 = arith.constant 1.000000e+00 : f32
    %315 = vector.broadcast %cst_90 : f32 to vector<8x64xf32>
    %316 = arith.addf %315, %314 : vector<8x64xf32>
    %317 = arith.divf %315, %316 : vector<8x64xf32>
    %318 = vector.extract_strided_slice %310 {offsets = [0, 64], sizes = [8, 64], strides = [1, 1]} : vector<8x256xf32> to vector<8x64xf32>
    %319 = arith.negf %318 : vector<8x64xf32>
    %320 = math.exp %319 : vector<8x64xf32>
    %cst_91 = arith.constant 1.000000e+00 : f32
    %321 = vector.broadcast %cst_91 : f32 to vector<8x64xf32>
    %322 = arith.addf %321, %320 : vector<8x64xf32>
    %323 = arith.divf %321, %322 : vector<8x64xf32>
    %324 = vector.extract_strided_slice %310 {offsets = [0, 128], sizes = [8, 64], strides = [1, 1]} : vector<8x256xf32> to vector<8x64xf32>
    %325 = math.tanh %324 : vector<8x64xf32>
    %326 = vector.extract_strided_slice %310 {offsets = [0, 192], sizes = [8, 64], strides = [1, 1]} : vector<8x256xf32> to vector<8x64xf32>
    %327 = arith.negf %326 : vector<8x64xf32>
    %328 = math.exp %327 : vector<8x64xf32>
    %cst_92 = arith.constant 1.000000e+00 : f32
    %329 = vector.broadcast %cst_92 : f32 to vector<8x64xf32>
    %330 = arith.addf %329, %328 : vector<8x64xf32>
    %331 = arith.divf %329, %330 : vector<8x64xf32>
    %332 = arith.mulf %323, %311 : vector<8x64xf32>
    %333 = arith.mulf %317, %325 : vector<8x64xf32>
    %334 = arith.addf %332, %333 : vector<8x64xf32>
    %335 = math.tanh %334 : vector<8x64xf32>
    %336 = arith.mulf %331, %335 : vector<8x64xf32>
    %c0_93 = arith.constant 0 : index
    %c0_94 = arith.constant 0 : index
    %337 = vector.load %arg18[%c0_93, %c0_94] : memref<64x64xf32, #tpu.memory_space<vmem>>, vector<8x64xf32>
    tpu.vector_store %arg18[%c0_93, %c0_94], %336 {strides = array<i32>} : memref<64x64xf32, #tpu.memory_space<vmem>>, vector<8x64xf32>,
    %cst_95 = arith.constant dense<0.000000e+00> : vector<8x256xf32>
    %338 = tpu.matmul %336, %297, %cst_95 {dimension_numbers = #tpu.dot_dimension_numbers<[1], [0], [0], [1], [0, 0, 1, 1], [], []>} : vector<8x64xf32>, vector<64x256xf32>, vector<8x256xf32> -> vector<8x256xf32>
    %339 = vector.broadcast %301 : vector<1x256xf32> to vector<8x256xf32>
    %340 = arith.addf %338, %339 : vector<8x256xf32>
    %341 = vector.extract_strided_slice %340 {offsets = [0, 0], sizes = [8, 64], strides = [1, 1]} : vector<8x256xf32> to vector<8x64xf32>
    %342 = arith.negf %341 : vector<8x64xf32>
    %343 = math.exp %342 : vector<8x64xf32>
    %cst_96 = arith.constant 1.000000e+00 : f32
    %344 = vector.broadcast %cst_96 : f32 to vector<8x64xf32>
    %345 = arith.addf %344, %343 : vector<8x64xf32>
    %346 = arith.divf %344, %345 : vector<8x64xf32>
    %347 = vector.extract_strided_slice %340 {offsets = [0, 64], sizes = [8, 64], strides = [1, 1]} : vector<8x256xf32> to vector<8x64xf32>
    %348 = arith.negf %347 : vector<8x64xf32>
    %349 = math.exp %348 : vector<8x64xf32>
    %cst_97 = arith.constant 1.000000e+00 : f32
    %350 = vector.broadcast %cst_97 : f32 to vector<8x64xf32>
    %351 = arith.addf %350, %349 : vector<8x64xf32>
    %352 = arith.divf %350, %351 : vector<8x64xf32>
    %353 = vector.extract_strided_slice %340 {offsets = [0, 128], sizes = [8, 64], strides = [1, 1]} : vector<8x256xf32> to vector<8x64xf32>
    %354 = math.tanh %353 : vector<8x64xf32>
    %355 = vector.extract_strided_slice %340 {offsets = [0, 192], sizes = [8, 64], strides = [1, 1]} : vector<8x256xf32> to vector<8x64xf32>
    %356 = arith.negf %355 : vector<8x64xf32>
    %357 = math.exp %356 : vector<8x64xf32>
    %cst_98 = arith.constant 1.000000e+00 : f32
    %358 = vector.broadcast %cst_98 : f32 to vector<8x64xf32>
    %359 = arith.addf %358, %357 : vector<8x64xf32>
    %360 = arith.divf %358, %359 : vector<8x64xf32>
    %361 = arith.mulf %352, %334 : vector<8x64xf32>
    %362 = arith.mulf %346, %354 : vector<8x64xf32>
    %363 = arith.addf %361, %362 : vector<8x64xf32>
    %364 = math.tanh %363 : vector<8x64xf32>
    %365 = arith.mulf %360, %364 : vector<8x64xf32>
    %c8 = arith.constant 8 : index
    %c0_99 = arith.constant 0 : index
    %366 = vector.load %arg18[%c8, %c0_99] : memref<64x64xf32, #tpu.memory_space<vmem>>, vector<8x64xf32>
    tpu.vector_store %arg18[%c8, %c0_99], %365 {strides = array<i32>} : memref<64x64xf32, #tpu.memory_space<vmem>>, vector<8x64xf32>,
    %cst_100 = arith.constant dense<0.000000e+00> : vector<8x256xf32>
    %367 = tpu.matmul %365, %297, %cst_100 {dimension_numbers = #tpu.dot_dimension_numbers<[1], [0], [0], [1], [0, 0, 1, 1], [], []>} : vector<8x64xf32>, vector<64x256xf32>, vector<8x256xf32> -> vector<8x256xf32>
    %368 = vector.broadcast %301 : vector<1x256xf32> to vector<8x256xf32>
    %369 = arith.addf %367, %368 : vector<8x256xf32>
    %370 = vector.extract_strided_slice %369 {offsets = [0, 0], sizes = [8, 64], strides = [1, 1]} : vector<8x256xf32> to vector<8x64xf32>
    %371 = arith.negf %370 : vector<8x64xf32>
    %372 = math.exp %371 : vector<8x64xf32>
    %cst_101 = arith.constant 1.000000e+00 : f32
    %373 = vector.broadcast %cst_101 : f32 to vector<8x64xf32>
    %374 = arith.addf %373, %372 : vector<8x64xf32>
    %375 = arith.divf %373, %374 : vector<8x64xf32>
    %376 = vector.extract_strided_slice %369 {offsets = [0, 64], sizes = [8, 64], strides = [1, 1]} : vector<8x256xf32> to vector<8x64xf32>
    %377 = arith.negf %376 : vector<8x64xf32>
    %378 = math.exp %377 : vector<8x64xf32>
    %cst_102 = arith.constant 1.000000e+00 : f32
    %379 = vector.broadcast %cst_102 : f32 to vector<8x64xf32>
    %380 = arith.addf %379, %378 : vector<8x64xf32>
    %381 = arith.divf %379, %380 : vector<8x64xf32>
    %382 = vector.extract_strided_slice %369 {offsets = [0, 128], sizes = [8, 64], strides = [1, 1]} : vector<8x256xf32> to vector<8x64xf32>
    %383 = math.tanh %382 : vector<8x64xf32>
    %384 = vector.extract_strided_slice %369 {offsets = [0, 192], sizes = [8, 64], strides = [1, 1]} : vector<8x256xf32> to vector<8x64xf32>
    %385 = arith.negf %384 : vector<8x64xf32>
    %386 = math.exp %385 : vector<8x64xf32>
    %cst_103 = arith.constant 1.000000e+00 : f32
    %387 = vector.broadcast %cst_103 : f32 to vector<8x64xf32>
    %388 = arith.addf %387, %386 : vector<8x64xf32>
    %389 = arith.divf %387, %388 : vector<8x64xf32>
    %390 = arith.mulf %381, %363 : vector<8x64xf32>
    %391 = arith.mulf %375, %383 : vector<8x64xf32>
    %392 = arith.addf %390, %391 : vector<8x64xf32>
    %393 = math.tanh %392 : vector<8x64xf32>
    %394 = arith.mulf %389, %393 : vector<8x64xf32>
    %c16 = arith.constant 16 : index
    %c0_104 = arith.constant 0 : index
    %395 = vector.load %arg18[%c16, %c0_104] : memref<64x64xf32, #tpu.memory_space<vmem>>, vector<8x64xf32>
    tpu.vector_store %arg18[%c16, %c0_104], %394 {strides = array<i32>} : memref<64x64xf32, #tpu.memory_space<vmem>>, vector<8x64xf32>,
    %cst_105 = arith.constant dense<0.000000e+00> : vector<8x256xf32>
    %396 = tpu.matmul %394, %297, %cst_105 {dimension_numbers = #tpu.dot_dimension_numbers<[1], [0], [0], [1], [0, 0, 1, 1], [], []>} : vector<8x64xf32>, vector<64x256xf32>, vector<8x256xf32> -> vector<8x256xf32>
    %397 = vector.broadcast %301 : vector<1x256xf32> to vector<8x256xf32>
    %398 = arith.addf %396, %397 : vector<8x256xf32>
    %399 = vector.extract_strided_slice %398 {offsets = [0, 0], sizes = [8, 64], strides = [1, 1]} : vector<8x256xf32> to vector<8x64xf32>
    %400 = arith.negf %399 : vector<8x64xf32>
    %401 = math.exp %400 : vector<8x64xf32>
    %cst_106 = arith.constant 1.000000e+00 : f32
    %402 = vector.broadcast %cst_106 : f32 to vector<8x64xf32>
    %403 = arith.addf %402, %401 : vector<8x64xf32>
    %404 = arith.divf %402, %403 : vector<8x64xf32>
    %405 = vector.extract_strided_slice %398 {offsets = [0, 64], sizes = [8, 64], strides = [1, 1]} : vector<8x256xf32> to vector<8x64xf32>
    %406 = arith.negf %405 : vector<8x64xf32>
    %407 = math.exp %406 : vector<8x64xf32>
    %cst_107 = arith.constant 1.000000e+00 : f32
    %408 = vector.broadcast %cst_107 : f32 to vector<8x64xf32>
    %409 = arith.addf %408, %407 : vector<8x64xf32>
    %410 = arith.divf %408, %409 : vector<8x64xf32>
    %411 = vector.extract_strided_slice %398 {offsets = [0, 128], sizes = [8, 64], strides = [1, 1]} : vector<8x256xf32> to vector<8x64xf32>
    %412 = math.tanh %411 : vector<8x64xf32>
    %413 = vector.extract_strided_slice %398 {offsets = [0, 192], sizes = [8, 64], strides = [1, 1]} : vector<8x256xf32> to vector<8x64xf32>
    %414 = arith.negf %413 : vector<8x64xf32>
    %415 = math.exp %414 : vector<8x64xf32>
    %cst_108 = arith.constant 1.000000e+00 : f32
    %416 = vector.broadcast %cst_108 : f32 to vector<8x64xf32>
    %417 = arith.addf %416, %415 : vector<8x64xf32>
    %418 = arith.divf %416, %417 : vector<8x64xf32>
    %419 = arith.mulf %410, %392 : vector<8x64xf32>
    %420 = arith.mulf %404, %412 : vector<8x64xf32>
    %421 = arith.addf %419, %420 : vector<8x64xf32>
    %422 = math.tanh %421 : vector<8x64xf32>
    %423 = arith.mulf %418, %422 : vector<8x64xf32>
    %c24 = arith.constant 24 : index
    %c0_109 = arith.constant 0 : index
    %424 = vector.load %arg18[%c24, %c0_109] : memref<64x64xf32, #tpu.memory_space<vmem>>, vector<8x64xf32>
    tpu.vector_store %arg18[%c24, %c0_109], %423 {strides = array<i32>} : memref<64x64xf32, #tpu.memory_space<vmem>>, vector<8x64xf32>,
    %cst_110 = arith.constant dense<0.000000e+00> : vector<8x256xf32>
    %425 = tpu.matmul %423, %297, %cst_110 {dimension_numbers = #tpu.dot_dimension_numbers<[1], [0], [0], [1], [0, 0, 1, 1], [], []>} : vector<8x64xf32>, vector<64x256xf32>, vector<8x256xf32> -> vector<8x256xf32>
    %426 = vector.broadcast %301 : vector<1x256xf32> to vector<8x256xf32>
    %427 = arith.addf %425, %426 : vector<8x256xf32>
    %428 = vector.extract_strided_slice %427 {offsets = [0, 0], sizes = [8, 64], strides = [1, 1]} : vector<8x256xf32> to vector<8x64xf32>
    %429 = arith.negf %428 : vector<8x64xf32>
    %430 = math.exp %429 : vector<8x64xf32>
    %cst_111 = arith.constant 1.000000e+00 : f32
    %431 = vector.broadcast %cst_111 : f32 to vector<8x64xf32>
    %432 = arith.addf %431, %430 : vector<8x64xf32>
    %433 = arith.divf %431, %432 : vector<8x64xf32>
    %434 = vector.extract_strided_slice %427 {offsets = [0, 64], sizes = [8, 64], strides = [1, 1]} : vector<8x256xf32> to vector<8x64xf32>
    %435 = arith.negf %434 : vector<8x64xf32>
    %436 = math.exp %435 : vector<8x64xf32>
    %cst_112 = arith.constant 1.000000e+00 : f32
    %437 = vector.broadcast %cst_112 : f32 to vector<8x64xf32>
    %438 = arith.addf %437, %436 : vector<8x64xf32>
    %439 = arith.divf %437, %438 : vector<8x64xf32>
    %440 = vector.extract_strided_slice %427 {offsets = [0, 128], sizes = [8, 64], strides = [1, 1]} : vector<8x256xf32> to vector<8x64xf32>
    %441 = math.tanh %440 : vector<8x64xf32>
    %442 = vector.extract_strided_slice %427 {offsets = [0, 192], sizes = [8, 64], strides = [1, 1]} : vector<8x256xf32> to vector<8x64xf32>
    %443 = arith.negf %442 : vector<8x64xf32>
    %444 = math.exp %443 : vector<8x64xf32>
    %cst_113 = arith.constant 1.000000e+00 : f32
    %445 = vector.broadcast %cst_113 : f32 to vector<8x64xf32>
    %446 = arith.addf %445, %444 : vector<8x64xf32>
    %447 = arith.divf %445, %446 : vector<8x64xf32>
    %448 = arith.mulf %439, %421 : vector<8x64xf32>
    %449 = arith.mulf %433, %441 : vector<8x64xf32>
    %450 = arith.addf %448, %449 : vector<8x64xf32>
    %451 = math.tanh %450 : vector<8x64xf32>
    %452 = arith.mulf %447, %451 : vector<8x64xf32>
    %c32 = arith.constant 32 : index
    %c0_114 = arith.constant 0 : index
    %453 = vector.load %arg18[%c32, %c0_114] : memref<64x64xf32, #tpu.memory_space<vmem>>, vector<8x64xf32>
    tpu.vector_store %arg18[%c32, %c0_114], %452 {strides = array<i32>} : memref<64x64xf32, #tpu.memory_space<vmem>>, vector<8x64xf32>,
    %cst_115 = arith.constant dense<0.000000e+00> : vector<8x256xf32>
    %454 = tpu.matmul %452, %297, %cst_115 {dimension_numbers = #tpu.dot_dimension_numbers<[1], [0], [0], [1], [0, 0, 1, 1], [], []>} : vector<8x64xf32>, vector<64x256xf32>, vector<8x256xf32> -> vector<8x256xf32>
    %455 = vector.broadcast %301 : vector<1x256xf32> to vector<8x256xf32>
    %456 = arith.addf %454, %455 : vector<8x256xf32>
    %457 = vector.extract_strided_slice %456 {offsets = [0, 0], sizes = [8, 64], strides = [1, 1]} : vector<8x256xf32> to vector<8x64xf32>
    %458 = arith.negf %457 : vector<8x64xf32>
    %459 = math.exp %458 : vector<8x64xf32>
    %cst_116 = arith.constant 1.000000e+00 : f32
    %460 = vector.broadcast %cst_116 : f32 to vector<8x64xf32>
    %461 = arith.addf %460, %459 : vector<8x64xf32>
    %462 = arith.divf %460, %461 : vector<8x64xf32>
    %463 = vector.extract_strided_slice %456 {offsets = [0, 64], sizes = [8, 64], strides = [1, 1]} : vector<8x256xf32> to vector<8x64xf32>
    %464 = arith.negf %463 : vector<8x64xf32>
    %465 = math.exp %464 : vector<8x64xf32>
    %cst_117 = arith.constant 1.000000e+00 : f32
    %466 = vector.broadcast %cst_117 : f32 to vector<8x64xf32>
    %467 = arith.addf %466, %465 : vector<8x64xf32>
    %468 = arith.divf %466, %467 : vector<8x64xf32>
    %469 = vector.extract_strided_slice %456 {offsets = [0, 128], sizes = [8, 64], strides = [1, 1]} : vector<8x256xf32> to vector<8x64xf32>
    %470 = math.tanh %469 : vector<8x64xf32>
    %471 = vector.extract_strided_slice %456 {offsets = [0, 192], sizes = [8, 64], strides = [1, 1]} : vector<8x256xf32> to vector<8x64xf32>
    %472 = arith.negf %471 : vector<8x64xf32>
    %473 = math.exp %472 : vector<8x64xf32>
    %cst_118 = arith.constant 1.000000e+00 : f32
    %474 = vector.broadcast %cst_118 : f32 to vector<8x64xf32>
    %475 = arith.addf %474, %473 : vector<8x64xf32>
    %476 = arith.divf %474, %475 : vector<8x64xf32>
    %477 = arith.mulf %468, %450 : vector<8x64xf32>
    %478 = arith.mulf %462, %470 : vector<8x64xf32>
    %479 = arith.addf %477, %478 : vector<8x64xf32>
    %480 = math.tanh %479 : vector<8x64xf32>
    %481 = arith.mulf %476, %480 : vector<8x64xf32>
    %c40 = arith.constant 40 : index
    %c0_119 = arith.constant 0 : index
    %482 = vector.load %arg18[%c40, %c0_119] : memref<64x64xf32, #tpu.memory_space<vmem>>, vector<8x64xf32>
    tpu.vector_store %arg18[%c40, %c0_119], %481 {strides = array<i32>} : memref<64x64xf32, #tpu.memory_space<vmem>>, vector<8x64xf32>,
    %cst_120 = arith.constant dense<0.000000e+00> : vector<8x256xf32>
    %483 = tpu.matmul %481, %297, %cst_120 {dimension_numbers = #tpu.dot_dimension_numbers<[1], [0], [0], [1], [0, 0, 1, 1], [], []>} : vector<8x64xf32>, vector<64x256xf32>, vector<8x256xf32> -> vector<8x256xf32>
    %484 = vector.broadcast %301 : vector<1x256xf32> to vector<8x256xf32>
    %485 = arith.addf %483, %484 : vector<8x256xf32>
    %486 = vector.extract_strided_slice %485 {offsets = [0, 0], sizes = [8, 64], strides = [1, 1]} : vector<8x256xf32> to vector<8x64xf32>
    %487 = arith.negf %486 : vector<8x64xf32>
    %488 = math.exp %487 : vector<8x64xf32>
    %cst_121 = arith.constant 1.000000e+00 : f32
    %489 = vector.broadcast %cst_121 : f32 to vector<8x64xf32>
    %490 = arith.addf %489, %488 : vector<8x64xf32>
    %491 = arith.divf %489, %490 : vector<8x64xf32>
    %492 = vector.extract_strided_slice %485 {offsets = [0, 64], sizes = [8, 64], strides = [1, 1]} : vector<8x256xf32> to vector<8x64xf32>
    %493 = arith.negf %492 : vector<8x64xf32>
    %494 = math.exp %493 : vector<8x64xf32>
    %cst_122 = arith.constant 1.000000e+00 : f32
    %495 = vector.broadcast %cst_122 : f32 to vector<8x64xf32>
    %496 = arith.addf %495, %494 : vector<8x64xf32>
    %497 = arith.divf %495, %496 : vector<8x64xf32>
    %498 = vector.extract_strided_slice %485 {offsets = [0, 128], sizes = [8, 64], strides = [1, 1]} : vector<8x256xf32> to vector<8x64xf32>
    %499 = math.tanh %498 : vector<8x64xf32>
    %500 = vector.extract_strided_slice %485 {offsets = [0, 192], sizes = [8, 64], strides = [1, 1]} : vector<8x256xf32> to vector<8x64xf32>
    %501 = arith.negf %500 : vector<8x64xf32>
    %502 = math.exp %501 : vector<8x64xf32>
    %cst_123 = arith.constant 1.000000e+00 : f32
    %503 = vector.broadcast %cst_123 : f32 to vector<8x64xf32>
    %504 = arith.addf %503, %502 : vector<8x64xf32>
    %505 = arith.divf %503, %504 : vector<8x64xf32>
    %506 = arith.mulf %497, %479 : vector<8x64xf32>
    %507 = arith.mulf %491, %499 : vector<8x64xf32>
    %508 = arith.addf %506, %507 : vector<8x64xf32>
    %509 = math.tanh %508 : vector<8x64xf32>
    %510 = arith.mulf %505, %509 : vector<8x64xf32>
    %c48 = arith.constant 48 : index
    %c0_124 = arith.constant 0 : index
    %511 = vector.load %arg18[%c48, %c0_124] : memref<64x64xf32, #tpu.memory_space<vmem>>, vector<8x64xf32>
    tpu.vector_store %arg18[%c48, %c0_124], %510 {strides = array<i32>} : memref<64x64xf32, #tpu.memory_space<vmem>>, vector<8x64xf32>,
    %cst_125 = arith.constant dense<0.000000e+00> : vector<8x256xf32>
    %512 = tpu.matmul %510, %297, %cst_125 {dimension_numbers = #tpu.dot_dimension_numbers<[1], [0], [0], [1], [0, 0, 1, 1], [], []>} : vector<8x64xf32>, vector<64x256xf32>, vector<8x256xf32> -> vector<8x256xf32>
    %513 = vector.broadcast %301 : vector<1x256xf32> to vector<8x256xf32>
    %514 = arith.addf %512, %513 : vector<8x256xf32>
    %515 = vector.extract_strided_slice %514 {offsets = [0, 0], sizes = [8, 64], strides = [1, 1]} : vector<8x256xf32> to vector<8x64xf32>
    %516 = arith.negf %515 : vector<8x64xf32>
    %517 = math.exp %516 : vector<8x64xf32>
    %cst_126 = arith.constant 1.000000e+00 : f32
    %518 = vector.broadcast %cst_126 : f32 to vector<8x64xf32>
    %519 = arith.addf %518, %517 : vector<8x64xf32>
    %520 = arith.divf %518, %519 : vector<8x64xf32>
    %521 = vector.extract_strided_slice %514 {offsets = [0, 64], sizes = [8, 64], strides = [1, 1]} : vector<8x256xf32> to vector<8x64xf32>
    %522 = arith.negf %521 : vector<8x64xf32>
    %523 = math.exp %522 : vector<8x64xf32>
    %cst_127 = arith.constant 1.000000e+00 : f32
    %524 = vector.broadcast %cst_127 : f32 to vector<8x64xf32>
    %525 = arith.addf %524, %523 : vector<8x64xf32>
    %526 = arith.divf %524, %525 : vector<8x64xf32>
    %527 = vector.extract_strided_slice %514 {offsets = [0, 128], sizes = [8, 64], strides = [1, 1]} : vector<8x256xf32> to vector<8x64xf32>
    %528 = math.tanh %527 : vector<8x64xf32>
    %529 = vector.extract_strided_slice %514 {offsets = [0, 192], sizes = [8, 64], strides = [1, 1]} : vector<8x256xf32> to vector<8x64xf32>
    %530 = arith.negf %529 : vector<8x64xf32>
    %531 = math.exp %530 : vector<8x64xf32>
    %cst_128 = arith.constant 1.000000e+00 : f32
    %532 = vector.broadcast %cst_128 : f32 to vector<8x64xf32>
    %533 = arith.addf %532, %531 : vector<8x64xf32>
    %534 = arith.divf %532, %533 : vector<8x64xf32>
    %535 = arith.mulf %526, %508 : vector<8x64xf32>
    %536 = arith.mulf %520, %528 : vector<8x64xf32>
    %537 = arith.addf %535, %536 : vector<8x64xf32>
    %538 = math.tanh %537 : vector<8x64xf32>
    %539 = arith.mulf %534, %538 : vector<8x64xf32>
    %c56 = arith.constant 56 : index
    %c0_129 = arith.constant 0 : index
    %540 = vector.load %arg18[%c56, %c0_129] : memref<64x64xf32, #tpu.memory_space<vmem>>, vector<8x64xf32>
    tpu.vector_store %arg18[%c56, %c0_129], %539 {strides = array<i32>} : memref<64x64xf32, #tpu.memory_space<vmem>>, vector<8x64xf32>,
    %c0_130 = arith.constant 0 : index
    %c0_131 = arith.constant 0 : index
    %541 = vector.load %arg18[%c0_130, %c0_131] : memref<64x64xf32, #tpu.memory_space<vmem>>, vector<64x64xf32>
    %cst_132 = arith.constant dense<0.000000e+00> : vector<64x2xf32>
    %542 = tpu.matmul %541, %293, %cst_132 {dimension_numbers = #tpu.dot_dimension_numbers<[1], [0], [0], [1], [0, 0, 1, 1], [], []>} : vector<64x64xf32>, vector<64x2xf32>, vector<64x2xf32> -> vector<64x2xf32>
    %543 = vector.broadcast %294 : vector<1x2xf32> to vector<64x2xf32>
    %544 = arith.addf %542, %543 : vector<64x2xf32>
    %c0_133 = arith.constant 0 : index
    %c0_134 = arith.constant 0 : index
    %545 = vector.load %arg17[%c0_133, %c0_134] : memref<64x2xf32, #tpu.memory_space<vmem>>, vector<64x2xf32>
    tpu.vector_store %arg17[%c0_133, %c0_134], %544 {strides = array<i32>} : memref<64x2xf32, #tpu.memory_space<vmem>>, vector<64x2xf32>,
    return
  }
}

</mosaic_0001>

<bundles_post_ra>
// kernel: trajectory_generator_forward.1
= control target key start
LH: loop header
LB: loop body
LE: loop exit
PB: predicated region body
PF: predicated region fallthrough
CT: control target
= control target key end

     0   :  { %s3380_s0 = inlined_call_operand.vmem [shape: f32[64,2], index: 0, kind: input, shape index: {}]   ;;  %s3381_s1 = inlined_call_operand.vmem [shape: f32[2,32], index: 1, kind: input, shape index: {}]   ;;  %s3382_s2 = inlined_call_operand.vmem [shape: f32[1,32], index: 2, kind: input, shape index: {}]   ;;  %s3383_s3 = inlined_call_operand.hbm [shape: f32[32,128], index: 3, kind: input, shape index: {}]   ;;  %s3384_s4 = inlined_call_operand.hbm [shape: f32[32,128], index: 4, kind: input, shape index: {}]   ;;  %s3385_s5 = inlined_call_operand.vmem [shape: f32[1,128], index: 5, kind: input, shape index: {}]   ;;  %s3386_s6 = inlined_call_operand.hbm [shape: f32[32,64], index: 6, kind: input, shape index: {}]   ;;  %s3387_s7 = inlined_call_operand.vmem [shape: f32[1,64], index: 7, kind: input, shape index: {}]   ;;  %s3388_s8 = inlined_call_operand.hbm [shape: f32[64,64], index: 8, kind: input, shape index: {}]   ;;  %s3389_s9 = inlined_call_operand.vmem [shape: f32[1,64], index: 9, kind: input, shape index: {}]   ;;  %s3390_s10 = inlined_call_operand.vmem [shape: f32[2,32], index: 10, kind: input, shape index: {}]   ;;  %s3391_s11 = inlined_call_operand.vmem [shape: f32[1,32], index: 11, kind: input, shape index: {}]   ;;  %s3392_s12 = inlined_call_operand.hbm [shape: f32[32,256], index: 12, kind: input, shape index: {}]   ;;  %s3393_s13 = inlined_call_operand.vmem [shape: f32[64,256], index: 13, kind: input, shape index: {}]   ;;  %s3394_s14 = inlined_call_operand.vmem [shape: f32[1,256], index: 14, kind: input, shape index: {}]   ;;  %s3395_s15 = inlined_call_operand.vmem [shape: f32[64,2], index: 15, kind: input, shape index: {}]   ;;  %s3396_s16 = inlined_call_operand.vmem [shape: f32[1,2], index: 16, kind: input, shape index: {}]   ;;  %s3397_s17 = inlined_call_operand.vmem [shape: f32[64,2], index: 17, kind: output, shape index: {}]  }
   0x1   :  { %3399 = sst [smem:[#allocation14_spill]] %s3380_s0 }
   0x2   :  { %3400 = sst [smem:[#allocation15_spill]] %s3381_s1 }
   0x3   :  { %22 = vsyncpa [#allocation4], 0 }
   0x4   :  { %23 = vsyncpa [#allocation6], 0 }
   0x5   :  { %24 = vsyncpa [#allocation9], 0  ;;  %s48_s26 = sshll.u32 %s3384_s4, 4  ;;  %s2592_s27 = smov [#allocation5]   ;;  %s49_s26 = int_to_ptr.hbm [resolvable:$true] %s48_s26 }
   0x6   :  { %s50_s28 = sshll.u32 %s2592_s27, 4  ;;  %s78_s30 = sshll.u32 %s3388_s8, 4  ;;  %s51_s28 = int_to_ptr.vmem [resolvable:$true] %s50_s28  ;;  %s79_s30 = int_to_ptr.hbm [resolvable:$true] %s78_s30 }
   0x7   :  { %s2593_s18 = smov 128   ;;  %s2594_s19 = smov 8  }
   0x8   :  { %56 = dma.hbm_to_vmem [thread:$0]  %s49_s26, 512, %s51_s28, [#allocation6], %s2593_s18, %s2593_s18, %s2594_s19  }
   0x9   :  { %s2595_s1 = smov [#allocation8]   ;;  %s35_s23 = sshll.u32 %s3383_s3, 4  ;;  %s36_s23 = int_to_ptr.hbm [resolvable:$true] %s35_s23 }
   0xa   :  { %s80_s20 = sshll.u32 %s2595_s1, 4  ;;  %s63_s25 = sshll.u32 %s3386_s6, 4  ;;  %s81_s20 = int_to_ptr.vmem [resolvable:$true] %s80_s20  ;;  %s64_s25 = int_to_ptr.hbm [resolvable:$true] %s63_s25 }
   0xb   :  { %86 = dma.hbm_to_vmem [thread:$0]  %s79_s30, 1024, %s81_s20, [#allocation9], %s2593_s18, %s2593_s18, %s2594_s19  }
   0xc   :  { %s2596_s27 = smov [#allocation3]   ;;  %s2597_s8 = smov [#allocation7]  }
   0xd   :  { %s37_s29 = sshll.u32 %s2596_s27, 4  ;;  %s65_s26 = sshll.u32 %s2597_s8, 4  ;;  %s38_s29 = int_to_ptr.vmem [resolvable:$true] %s37_s29  ;;  %s66_s26 = int_to_ptr.vmem [resolvable:$true] %s65_s26 }
   0xe   :  { %43 = dma.hbm_to_vmem [thread:$0]  %s36_s23, 512, %s38_s29, [#allocation4], %s2593_s18, %s2593_s18, %s2594_s19  }
   0xf   :  { %s97_s1 = sshll.u32 %s3392_s12, 4  ;;  %s2598_s3 = smov [#allocation10]   ;;  %s98_s1 = int_to_ptr.hbm [resolvable:$true] %s97_s1 }
  0x10   :  { %71 = dma.hbm_to_vmem [thread:$0]  %s64_s25, 512, %s66_s26, [#allocation6], %s2593_s18, %s2593_s18, %s2594_s19  }
  0x11   :  { %s99_s30 = sshll.u32 %s2598_s3, 4  ;;  %s2599_s20 = smov 256   ;;  %s100_s30 = int_to_ptr.vmem [resolvable:$true] %s99_s30 }
  0x12   :  { %s2600_s21 = smov 16  }
  0x13   :  { %105 = dma.hbm_to_vmem [thread:$0]  %s98_s1, 1024, %s100_s30, [#allocation9], %s2599_s20, %s2599_s20, %s2600_s21  }
  0x14   :  { %2586 = dma.done.wait [#allocation4], 512  }
  0x15   :  { %2587 = vsyncadd [#allocation4], 4294966784 }
  0x16   :  { %2588 = dma.done.wait [#allocation6], 1024  }
  0x17   :  { %2589 = vsyncadd [#allocation6], 4294966272 }
  0x18   :  { %2590 = dma.done.wait [#allocation9], 2048  }
  0x19   :  { %2591 = vsyncadd [#allocation9], 4294965248  ;;  %vm172_vm0 = vcmask 1041408   ;;  %vm147_vm1 = vcmask 15360   ;;  %s3401_s12 = sld [smem:[#allocation15_spill]]  ;;  %v2726_v4 = vld [vmem:[#allocation5 + $0x18] sm:$0xff] }
  0x1a   :  { %s3402_s19 = sld [smem:[#allocation14_spill]]  ;;  %v220_v5 = vld [vmem:[#allocation3 + $0x18] sm:$0xff]  ;;  %v219_v6 = vld [vmem:[#allocation3 + $0x10] sm:$0xff]  ;;  %v218_v8 = vld [vmem:[#allocation3 + $0x8] sm:$0xff]  ;;  %v2601_v14 = vmov 0.0   ;;  %vm225_vm2 = vcmask 261120  }
  0x1b   :  { %v2730_v7 = vld [vmem:[#allocation5 + $0x10] sm:$0xff]  ;;  %v2734_v9 = vld [vmem:[#allocation5 + $0x8] sm:$0xff]  ;;  %v217_v10 = vld [vmem:[#allocation3] sm:$0xff]  ;;  %s2602_s30 = smov 64  }
  0x1c   :  { %v2741_v12 = vld [vmem:[#allocation5] sm:$0xff] }
  0x1d   :  { %v2764_v15 = vld [vmem:[%s3382_s2] ss:$0 sm:$0xff] }
  0x1e   :  { %v2779_v26 = vld [vmem:[%s3385_s5] ss:$0 sm:$0xff]  ;;  %s2603_s5 = smov 32  }
  0x1f   :  { %v142_v0 = vld [vmem:[%s3401_s12] sm:$0x3] }
  0x20   :  { %v134_v1 = vld [vmem:[%s3402_s19] sm:$0xff]  ;;  %v135_v2 = vld [vmem:[%s3402_s19 + $0x8] sm:$0xff]  ;;  %2163 = vmatpush.msk.msra.mxu0 %vm172_vm0, %v142_v0  ;;  %2270 = vmatpush.msk.msra.mxu1 %vm172_vm0, %v142_v0  ;;  %v137_v3 = vld [vmem:[%s3402_s19 + $0x18] sm:$0xff] }
  0x21   :  { %2164 = vmatmul.msk.f32.vlgmr.msra.gmra.mxu0 %vm147_vm1, %v134_v1  ;;  %2165 = vmatmul.msk.f32.vlgmr.msra.gmra.mxu1 %vm147_vm1, %v135_v2  ;;  %v136_v11 = vld [vmem:[%s3402_s19 + $0x10] sm:$0xff]  ;;  %v138_v13 = vld [vmem:[%s3402_s19 + $0x20] sm:$0xff]  ;;  %v139_v51 = vld [vmem:[%s3402_s19 + $0x28] sm:$0xff] }
  0x22   :  { %2271 = vmatpush.msk.msra.mxu2 %vm172_vm0, %v142_v0  ;;  %262 = vmatpush.msrb.mxu1 %v220_v5  ;;  %v140_v52 = vld [vmem:[%s3402_s19 + $0x30] sm:$0xff]  ;;  %v2800_v53 = vld [vmem:[%s3402_s19 + $0x38] sm:$0xff] }
  0x23   :  { %2167 = vmatmul.msk.f32.vlgmr.msra.gmra.mxu2 %vm147_vm1, %v137_v3  ;;  %2272 = vmatpush.msk.msra.mxu3 %vm172_vm0, %v142_v0 }
  0x24   :  { %310 = vmatpush.msrb.mxu2 %v2726_v4  ;;  %263 = vmatpush.msrb.mxu1 %v219_v6 }
  0x25   :  { %373 = vmatpush.msrb.mxu3 %v2726_v4 }
  0x26   :  { %311 = vmatpush.msrb.mxu2 %v2730_v7  ;;  %264 = vmatpush.msrb.mxu1 %v218_v8 }
  0x27   :  { %374 = vmatpush.msrb.mxu3 %v2730_v7 }
  0x28   :  { %312 = vmatpush.msrb.mxu2 %v2734_v9  ;;  %265 = vmatpush.msrb.mxu1 %v217_v10 }
  0x29   :  { %2166 = vmatmul.msk.f32.gmra.mxu1 %vm147_vm1, %v136_v11  ;;  %375 = vmatpush.msrb.mxu3 %v2734_v9 }
  0x2a   :  { %313 = vmatpush.msrb.mxu2 %v2741_v12  ;;  %2169 = vmatmul.msk.f32.vlgmr.msra.gmra.mxu3 %vm147_vm1, %v139_v51 }
  0x2b   :  { %2168 = vmatmul.msk.f32.gmra.mxu2 %vm147_vm1, %v138_v13  ;;  %376 = vmatpush.msrb.mxu3 %v2741_v12 }
  0x2c   :  { %436 = vmatpush.msra.mxu2 %v2726_v4 }
  0x2d   :  { %499 = vmatpush.msra.mxu3 %v2726_v4 }
  0x2e   :  { %437 = vmatpush.msra.mxu2 %v2730_v7 }
  0x2f   :  { %500 = vmatpush.msra.mxu3 %v2730_v7 }
  0x30   :  { %438 = vmatpush.msra.mxu2 %v2734_v9 }
  0x31   :  { %501 = vmatpush.msra.mxu3 %v2734_v9 }
  0x32   :  { %439 = vmatpush.msra.mxu2 %v2741_v12  ;;  %2170 = vmatmul.msk.f32.gmra.mxu3 %vm147_vm1, %v140_v52 }
  0x33   :  { %314 = vmatmul.f32.vlgmr.msrb.gmra.mxu2 %v2601_v14  ;;  %502 = vmatpush.msra.mxu3 %v2741_v12 }
  0x34   :  { %562 = vmatpush.msrb.mxu2 %v2726_v4 }
  0x36   :  { %563 = vmatpush.msrb.mxu2 %v2730_v7 }
  0x38   :  { %564 = vmatpush.msrb.mxu2 %v2734_v9 }
  0x3a   :  { %565 = vmatpush.msrb.mxu2 %v2741_v12  ;;  %2171 = vmatmul.msk.f32.gmra.mxu3 %vm147_vm1, %v2800_v53 }
  0x9e   :  { %v193_v16 = vpop.f32.mrf.mxu0  ;;  %v196_v18 = vpop.f32.mrf.mxu1 }
  0x9f   :  { %v194_v17 = vadd.f32 %v2764_v15, %v193_v16  ;;  %v197_v19 = vadd.f32 %v2764_v15, %v196_v18 }
  0xa1   :  { %2172 = vmatmul.msk.f32.vlgmr.msrb.gmra.mxu1 %vm225_vm2, %v194_v17 }
  0xa6   :  { %v199_v20 = vpop.f32.mrf.mxu1  ;;  %v202_v22 = vpop.f32.mrf.mxu2 }
  0xa7   :  { %v200_v21 = vadd.f32 %v2764_v15, %v199_v20  ;;  %v203_v23 = vadd.f32 %v2764_v15, %v202_v22 }
  0xa9   :  { %2173 = vmatmul.msk.f32.gmra.mxu1 %vm225_vm2, %v197_v19 }
  0xad   :  { %v208_v56 = vpop.f32.mrf.mxu3 }
  0xae   :  { %v205_v24 = vpop.f32.mrf.mxu2  ;;  %v209_v57 = vadd.f32 %v2764_v15, %v208_v56 }
  0xaf   :  { %v206_v25 = vadd.f32 %v2764_v15, %v205_v24 }
  0xb1   :  { %2174 = vmatmul.msk.f32.gmra.mxu1 %vm225_vm2, %v200_v21 }
  0xb5   :  { %v211_v58 = vpop.f32.mrf.mxu3 }
  0xb6   :  { %v315_v28 = vpop.f32.mrf.mxu2  ;;  %v212_v59 = vadd.f32 %v2764_v15, %v211_v58 }
  0xb9   :  { %2175 = vmatmul.msk.f32.gmra.mxu1 %vm225_vm2, %v203_v23 }
  0xbd   :  { %v214_v61 = vpop.f32.mrf.mxu3 }
  0xbe   :  { %v215_v62 = vadd.f32 %v2764_v15, %v214_v61 }
  0xc1   :  { %2176 = vmatmul.msk.f32.gmra.mxu1 %vm225_vm2, %v206_v25 }
  0xc9   :  { %2177 = vmatmul.msk.f32.gmra.mxu1 %vm225_vm2, %v209_v57 }
  0xd1   :  { %2178 = vmatmul.msk.f32.gmra.mxu1 %vm225_vm2, %v212_v59 }
  0xd9   :  { %2179 = vmatmul.msk.f32.gmra.mxu1 %vm225_vm2, %v215_v62 }
 0x11e   :  { %v267_v27 = vpop.f32.mrf.mxu1 }
 0x11f   :  { %v268_v29 = vadd.f32 %v2779_v26, %v267_v27 }
 0x121   :  { %v318_v30 = vadd.f32 %v315_v28, %v268_v29 }
 0x123   :  { %2292 = vtanh.f32 %v318_v30  ;;  %v2180_v32 = vmul.f32 -1.442695, %v318_v30 }
 0x125   :  { %2294 = vpow2.f32 %v2180_v32 }
 0x126   :  { %v270_v63 = vpop.f32.mrf.mxu1 }
 0x127   :  { %v271_v0 = vadd.f32 %v2779_v26, %v270_v63 }
 0x129   :  { %v2293_v31 = vpop.eup %2292 }
 0x12a   :  { %341 = vrot.lane.b32.xlu0 %v2293_v31, %s2602_s30 }
 0x12b   :  { %v2295_v33 = vpop.eup %2294 }
 0x12c   :  { %v322_v34 = vadd.f32 1.0, %v2295_v33 }
 0x12e   :  { %2296 = vrcp.f32 %v322_v34  ;;  %v334_v40 = vand.u32 2147483648, %v322_v34  ;;  %vm328_vm4 = vweird.f32 %v322_v34  ;;  %v332_v41 = vand.u32 2147483647, %v322_v34  ;;  %v273_v31 = vpop.f32.mrf.mxu1 }
 0x12f   :  { %v274_v32 = vadd.f32 %v2779_v26, %v273_v31 }
 0x130   :  { %v335_v43 = vor.u32 1.1754944e-38, %v334_v40  ;;  %vm333_vm6 = vcmp.eq.f32.partialorder %v332_v41, 8.507059e+37 }
 0x134   :  { %v2297_v35 = vpop.eup %2296 }
 0x135   :  { %v324_v36 = vmul.f32 %v2297_v35, %v322_v34  ;;  %vm329_vm3 = vweird.f32 %v2297_v35 }
 0x136   :  { %vm330_vm5 = vmor %vm328_vm4, %vm329_vm3  ;;  %v276_v59 = vpop.f32.mrf.mxu1 }
 0x137   :  { %v325_v37 = vsub.f32 1.0, %v324_v36 }
 0x139   :  { %v326_v38 = vmul.f32 %v2297_v35, %v325_v37 }
 0x13b   :  { %v327_v39 = vadd.f32 %v2297_v35, %v326_v38 }
 0x13d   :  { %v331_v42 = vsel %vm330_vm5, %v2297_v35, %v327_v39 }
 0x13e   :  { %v336_v45 = vsel %vm333_vm6, %v335_v43, %v331_v42 }
 0x13f   :  { %v339_v47 = vmul.f32 0.0, %v336_v45 }
 0x19c   :  { %v342_v44 = vpop.permute.xlu0 %341 }
 0x19d   :  { %v344_v46 = vmul.f32 %v342_v44, %v336_v45 }
 0x19f   :  { %346 = vrot.lane.b32.xlu0 %v344_v46, %s2603_s5 }
 0x211   :  { %v347_v48 = vpop.permute.xlu0 %346 }
 0x212   :  { %v349_v49 = vadd.f32 %v347_v48, %v339_v47 }
 0x214   :  { %2298 = vtanh.f32 %v349_v49 }
 0x21a   :  { %v2299_v50 = vpop.eup %2298 }
 0x21b   :  { %352 = vrot.lane.b32.xlu1 %v2299_v50, %s2602_s30 }
 0x28d   :  { %v353_v54 = vpop.permute.xlu1 %352 }
 0x28e   :  { %v355_v55 = vmul.f32 %v353_v54, %v336_v45 }
 0x290   :  { %357 = vrot.lane.b32.xlu1 %v355_v55, %s2603_s5 }
 0x302   :  { %v358_v60 = vpop.permute.xlu1 %357 }
 0x303   :  { %2181 = vmatmul.msk.f32.vlgmr.msrb.gmra.mxu3 %vm225_vm2, %v358_v60  ;;  %v277_v60 = vadd.f32 %v2779_v26, %v276_v59 }
 0x304   :  { %625 = vmatpush.msrb.mxu3 %v2726_v4 }
 0x306   :  { %626 = vmatpush.msrb.mxu3 %v2730_v7 }
 0x308   :  { %627 = vmatpush.msrb.mxu3 %v2734_v9 }
 0x30a   :  { %628 = vmatpush.msrb.mxu3 %v2741_v12 }
 0x386   :  { %v378_v1 = vpop.f32.mrf.mxu3 }
 0x387   :  { %v381_v2 = vadd.f32 %v378_v1, %v271_v0 }
 0x389   :  { %2300 = vtanh.f32 %v381_v2  ;;  %v2182_v5 = vmul.f32 -1.442695, %v381_v2 }
 0x38b   :  { %2302 = vpow2.f32 %v2182_v5 }
 0x38f   :  { %v2301_v3 = vpop.eup %2300 }
 0x390   :  { %404 = vrot.lane.b32.xlu2 %v2301_v3, %s2602_s30 }
 0x391   :  { %v2303_v6 = vpop.eup %2302 }
 0x392   :  { %v385_v8 = vadd.f32 1.0, %v2303_v6 }
 0x394   :  { %2304 = vrcp.f32 %v385_v8  ;;  %v397_v16 = vand.u32 2147483648, %v385_v8  ;;  %vm391_vm8 = vweird.f32 %v385_v8  ;;  %v395_v17 = vand.u32 2147483647, %v385_v8 }
 0x396   :  { %v398_v19 = vor.u32 1.1754944e-38, %v397_v16  ;;  %vm396_vm10 = vcmp.eq.f32.partialorder %v395_v17, 8.507059e+37 }
 0x39a   :  { %v2305_v10 = vpop.eup %2304 }
 0x39b   :  { %v387_v11 = vmul.f32 %v2305_v10, %v385_v8  ;;  %vm392_vm7 = vweird.f32 %v2305_v10 }
 0x39c   :  { %vm393_vm9 = vmor %vm391_vm8, %vm392_vm7 }
 0x39d   :  { %v388_v13 = vsub.f32 1.0, %v387_v11 }
 0x39f   :  { %v389_v14 = vmul.f32 %v2305_v10, %v388_v13 }
 0x3a1   :  { %v390_v15 = vadd.f32 %v2305_v10, %v389_v14 }
 0x3a3   :  { %v394_v18 = vsel %vm393_vm9, %v2305_v10, %v390_v15 }
 0x3a4   :  { %v399_v21 = vsel %vm396_vm10, %v398_v19, %v394_v18 }
 0x3a5   :  { %v402_v23 = vmul.f32 %v399_v21, %v349_v49 }
 0x3ea   :  { %v405_v20 = vpop.permute.xlu2 %404 }
 0x3eb   :  { %v407_v22 = vmul.f32 %v405_v20, %v399_v21 }
 0x3ed   :  { %409 = vrot.lane.b32.xlu2 %v407_v22, %s2603_s5  ;;  %v279_v22 = vpop.f32.mrf.mxu1 }
 0x447   :  { %v410_v24 = vpop.permute.xlu2 %409 }
 0x448   :  { %v412_v25 = vadd.f32 %v410_v24, %v402_v23  ;;  %v280_v23 = vadd.f32 %v2779_v26, %v279_v22 }
 0x44a   :  { %2306 = vtanh.f32 %v412_v25 }
 0x450   :  { %v2307_v27 = vpop.eup %2306 }
 0x451   :  { %415 = vrot.lane.b32.xlu0 %v2307_v27, %s2602_s30 }
 0x4c3   :  { %v416_v28 = vpop.permute.xlu0 %415 }
 0x4c4   :  { %v418_v29 = vmul.f32 %v416_v28, %v399_v21 }
 0x4c6   :  { %420 = vrot.lane.b32.xlu1 %v418_v29, %s2603_s5 }
 0x538   :  { %v421_v30 = vpop.permute.xlu1 %420 }
 0x539   :  { %2183 = vmatmul.msk.f32.vlgmr.msra.gmra.mxu2 %vm225_vm2, %v421_v30 }
 0x53a   :  { %688 = vmatpush.msra.mxu2 %v2726_v4 }
 0x53c   :  { %689 = vmatpush.msra.mxu2 %v2730_v7 }
 0x53e   :  { %690 = vmatpush.msra.mxu2 %v2734_v9 }
 0x540   :  { %691 = vmatpush.msra.mxu2 %v2741_v12 }
 0x5bc   :  { %v441_v33 = vpop.f32.mrf.mxu2 }
 0x5bd   :  { %v444_v34 = vadd.f32 %v441_v33, %v274_v32 }
 0x5bf   :  { %2308 = vtanh.f32 %v444_v34  ;;  %v2184_v36 = vmul.f32 -1.442695, %v444_v34 }
 0x5c1   :  { %2310 = vpow2.f32 %v2184_v36 }
 0x5c5   :  { %v2309_v35 = vpop.eup %2308 }
 0x5c6   :  { %467 = vrot.lane.b32.xlu2 %v2309_v35, %s2602_s30 }
 0x5c7   :  { %v2311_v37 = vpop.eup %2310 }
 0x5c8   :  { %v448_v38 = vadd.f32 1.0, %v2311_v37 }
 0x5ca   :  { %2312 = vrcp.f32 %v448_v38  ;;  %v460_v44 = vand.u32 2147483648, %v448_v38  ;;  %vm454_vm12 = vweird.f32 %v448_v38  ;;  %v458_v45 = vand.u32 2147483647, %v448_v38 }
 0x5cc   :  { %v461_v47 = vor.u32 1.1754944e-38, %v460_v44  ;;  %vm459_vm14 = vcmp.eq.f32.partialorder %v458_v45, 8.507059e+37 }
 0x5d0   :  { %v2313_v39 = vpop.eup %2312 }
 0x5d1   :  { %v450_v40 = vmul.f32 %v2313_v39, %v448_v38  ;;  %vm455_vm11 = vweird.f32 %v2313_v39 }
 0x5d2   :  { %vm456_vm13 = vmor %vm454_vm12, %vm455_vm11 }
 0x5d3   :  { %v451_v41 = vsub.f32 1.0, %v450_v40 }
 0x5d5   :  { %v452_v42 = vmul.f32 %v2313_v39, %v451_v41 }
 0x5d7   :  { %v453_v43 = vadd.f32 %v2313_v39, %v452_v42 }
 0x5d9   :  { %v457_v46 = vsel %vm456_vm13, %v2313_v39, %v453_v43 }
 0x5da   :  { %v462_v49 = vsel %vm459_vm14, %v461_v47, %v457_v46 }
 0x5db   :  { %v465_v51 = vmul.f32 %v462_v49, %v412_v25 }
 0x620   :  { %v468_v48 = vpop.permute.xlu2 %467 }
 0x621   :  { %v470_v50 = vmul.f32 %v468_v48, %v462_v49 }
 0x623   :  { %472 = vrot.lane.b32.xlu0 %v470_v50, %s2603_s5  ;;  %v282_v50 = vpop.f32.mrf.mxu1 }
 0x695   :  { %v473_v52 = vpop.permute.xlu0 %472 }
 0x696   :  { %v475_v54 = vadd.f32 %v473_v52, %v465_v51  ;;  %v283_v51 = vadd.f32 %v2779_v26, %v282_v50 }
 0x698   :  { %2314 = vtanh.f32 %v475_v54 }
 0x69e   :  { %v2315_v55 = vpop.eup %2314 }
 0x69f   :  { %478 = vrot.lane.b32.xlu1 %v2315_v55, %s2602_s30 }
 0x711   :  { %v479_v56 = vpop.permute.xlu1 %478 }
 0x712   :  { %v481_v57 = vmul.f32 %v479_v56, %v462_v49 }
 0x714   :  { %483 = vrot.lane.b32.xlu2 %v481_v57, %s2603_s5 }
 0x76e   :  { %v484_v58 = vpop.permute.xlu2 %483 }
 0x76f   :  { %2185 = vmatmul.msk.f32.vlgmr.msra.gmra.mxu3 %vm225_vm2, %v484_v58 }
 0x770   :  { %751 = vmatpush.msra.mxu3 %v2726_v4 }
 0x772   :  { %752 = vmatpush.msra.mxu3 %v2730_v7 }
 0x774   :  { %753 = vmatpush.msra.mxu3 %v2734_v9 }
 0x776   :  { %754 = vmatpush.msra.mxu3 %v2741_v12 }
 0x7f2   :  { %v504_v61 = vpop.f32.mrf.mxu3 }
 0x7f3   :  { %v507_v62 = vadd.f32 %v504_v61, %v277_v60 }
 0x7f5   :  { %2316 = vtanh.f32 %v507_v62  ;;  %v2186_v0 = vmul.f32 -1.442695, %v507_v62 }
 0x7f7   :  { %2318 = vpow2.f32 %v2186_v0 }
 0x7fb   :  { %v2317_v63 = vpop.eup %2316 }
 0x7fc   :  { %530 = vrot.lane.b32.xlu0 %v2317_v63, %s2602_s30 }
 0x7fd   :  { %v2319_v1 = vpop.eup %2318 }
 0x7fe   :  { %v511_v2 = vadd.f32 1.0, %v2319_v1 }
 0x800   :  { %2320 = vrcp.f32 %v511_v2  ;;  %v523_v12 = vand.u32 2147483648, %v511_v2  ;;  %vm517_vm3 = vweird.f32 %v511_v2  ;;  %v521_v6 = vand.u32 2147483647, %v511_v2 }
 0x802   :  { %v524_v10 = vor.u32 1.1754944e-38, %v523_v12  ;;  %vm522_vm5 = vcmp.eq.f32.partialorder %v521_v6, 8.507059e+37 }
 0x806   :  { %v2321_v4 = vpop.eup %2320 }
 0x807   :  { %v513_v7 = vmul.f32 %v2321_v4, %v511_v2  ;;  %vm518_vm15 = vweird.f32 %v2321_v4 }
 0x808   :  { %vm519_vm4 = vmor %vm517_vm3, %vm518_vm15 }
 0x809   :  { %v514_v3 = vsub.f32 1.0, %v513_v7 }
 0x80b   :  { %v515_v9 = vmul.f32 %v2321_v4, %v514_v3 }
 0x80d   :  { %v516_v5 = vadd.f32 %v2321_v4, %v515_v9 }
 0x80f   :  { %v520_v8 = vsel %vm519_vm4, %v2321_v4, %v516_v5 }
 0x810   :  { %v525_v13 = vsel %vm522_vm5, %v524_v10, %v520_v8 }
 0x811   :  { %v528_v15 = vmul.f32 %v525_v13, %v475_v54 }
 0x86e   :  { %v531_v11 = vpop.permute.xlu0 %530 }
 0x86f   :  { %v533_v14 = vmul.f32 %v531_v11, %v525_v13 }
 0x871   :  { %535 = vrot.lane.b32.xlu1 %v533_v14, %s2603_s5  ;;  %v285_v14 = vpop.f32.mrf.mxu1 }
 0x8e3   :  { %v536_v16 = vpop.permute.xlu1 %535 }
 0x8e4   :  { %v538_v17 = vadd.f32 %v536_v16, %v528_v15  ;;  %v286_v15 = vadd.f32 %v2779_v26, %v285_v14  ;;  %v965_v14 = vld [vmem:[%s3395_s15 + $0x18] sm:$0xff] }
 0x8e6   :  { %2322 = vtanh.f32 %v538_v17 }
 0x8ec   :  { %v2323_v18 = vpop.eup %2322 }
 0x8ed   :  { %541 = vrot.lane.b32.xlu2 %v2323_v18, %s2602_s30 }
 0x947   :  { %v542_v19 = vpop.permute.xlu2 %541 }
 0x948   :  { %v544_v20 = vmul.f32 %v542_v19, %v525_v13 }
 0x94a   :  { %546 = vrot.lane.b32.xlu0 %v544_v20, %s2603_s5 }
 0x9bc   :  { %v547_v21 = vpop.permute.xlu0 %546 }
 0x9bd   :  { %2187 = vmatmul.msk.f32.vlgmr.msrb.gmra.mxu2 %vm225_vm2, %v547_v21 }
 0xa40   :  { %v567_v24 = vpop.f32.mrf.mxu2 }
 0xa41   :  { %v570_v25 = vadd.f32 %v567_v24, %v280_v23 }
 0xa43   :  { %2324 = vtanh.f32 %v570_v25  ;;  %v2188_v28 = vmul.f32 -1.442695, %v570_v25 }
 0xa45   :  { %2326 = vpow2.f32 %v2188_v28 }
 0xa49   :  { %v2325_v27 = vpop.eup %2324 }
 0xa4a   :  { %593 = vrot.lane.b32.xlu1 %v2325_v27, %s2602_s30 }
 0xa4b   :  { %v2327_v29 = vpop.eup %2326 }
 0xa4c   :  { %v574_v30 = vadd.f32 1.0, %v2327_v29 }
 0xa4e   :  { %2328 = vrcp.f32 %v574_v30  ;;  %v586_v36 = vand.u32 2147483648, %v574_v30  ;;  %vm580_vm7 = vweird.f32 %v574_v30  ;;  %v584_v37 = vand.u32 2147483647, %v574_v30 }
 0xa50   :  { %v587_v39 = vor.u32 1.1754944e-38, %v586_v36  ;;  %vm585_vm9 = vcmp.eq.f32.partialorder %v584_v37, 8.507059e+37 }
 0xa54   :  { %v2329_v31 = vpop.eup %2328 }
 0xa55   :  { %v576_v32 = vmul.f32 %v2329_v31, %v574_v30  ;;  %vm581_vm6 = vweird.f32 %v2329_v31 }
 0xa56   :  { %vm582_vm8 = vmor %vm580_vm7, %vm581_vm6 }
 0xa57   :  { %v577_v33 = vsub.f32 1.0, %v576_v32 }
 0xa59   :  { %v578_v34 = vmul.f32 %v2329_v31, %v577_v33 }
 0xa5b   :  { %v579_v35 = vadd.f32 %v2329_v31, %v578_v34 }
 0xa5d   :  { %v583_v38 = vsel %vm582_vm8, %v2329_v31, %v579_v35 }
 0xa5e   :  { %v588_v41 = vsel %vm585_vm9, %v587_v39, %v583_v38  ;;  %vm830_vm9 = vcmask 523264  }
 0xa5f   :  { %v591_v43 = vmul.f32 %v588_v41, %v538_v17 }
 0xabc   :  { %v594_v40 = vpop.permute.xlu1 %593 }
 0xabd   :  { %v596_v42 = vmul.f32 %v594_v40, %v588_v41 }
 0xabf   :  { %598 = vrot.lane.b32.xlu2 %v596_v42, %s2603_s5  ;;  %v288_v42 = vpop.f32.mrf.mxu1 }
 0xb19   :  { %v599_v44 = vpop.permute.xlu2 %598 }
 0xb1a   :  { %v601_v45 = vadd.f32 %v599_v44, %v591_v43  ;;  %v289_v43 = vadd.f32 %v2779_v26, %v288_v42  ;;  %v873_v42 = vld [vmem:[#allocation8 + $0x20] sm:$0xff] }
 0xb1c   :  { %2330 = vtanh.f32 %v601_v45 }
 0xb22   :  { %v2331_v46 = vpop.eup %2330 }
 0xb23   :  { %604 = vrot.lane.b32.xlu0 %v2331_v46, %s2602_s30 }
 0xb95   :  { %v605_v47 = vpop.permute.xlu0 %604 }
 0xb96   :  { %v607_v48 = vmul.f32 %v605_v47, %v588_v41 }
 0xb98   :  { %609 = vrot.lane.b32.xlu1 %v607_v48, %s2603_s5 }
 0xc0a   :  { %v610_v49 = vpop.permute.xlu1 %609 }
 0xc0b   :  { %2189 = vmatmul.msk.f32.vlgmr.msrb.gmra.mxu3 %vm225_vm2, %v610_v49 }
 0xc8e   :  { %v630_v52 = vpop.f32.mrf.mxu3 }
 0xc8f   :  { %v633_v54 = vadd.f32 %v630_v52, %v283_v51 }
 0xc91   :  { %2332 = vtanh.f32 %v633_v54  ;;  %v2190_v56 = vmul.f32 -1.442695, %v633_v54 }
 0xc93   :  { %2334 = vpow2.f32 %v2190_v56 }
 0xc97   :  { %v2333_v55 = vpop.eup %2332 }
 0xc98   :  { %656 = vrot.lane.b32.xlu2 %v2333_v55, %s2602_s30 }
 0xc99   :  { %v2335_v57 = vpop.eup %2334 }
 0xc9a   :  { %v637_v58 = vadd.f32 1.0, %v2335_v57 }
 0xc9c   :  { %2336 = vrcp.f32 %v637_v58  ;;  %v649_v0 = vand.u32 2147483648, %v637_v58  ;;  %vm643_vm11 = vweird.f32 %v637_v58  ;;  %v647_v1 = vand.u32 2147483647, %v637_v58 }
 0xc9e   :  { %v650_v4 = vor.u32 1.1754944e-38, %v649_v0  ;;  %vm648_vm13 = vcmp.eq.f32.partialorder %v647_v1, 8.507059e+37 }
 0xca2   :  { %v2337_v59 = vpop.eup %2336 }
 0xca3   :  { %v639_v60 = vmul.f32 %v2337_v59, %v637_v58  ;;  %vm644_vm10 = vweird.f32 %v2337_v59 }
 0xca4   :  { %vm645_vm12 = vmor %vm643_vm11, %vm644_vm10 }
 0xca5   :  { %v640_v61 = vsub.f32 1.0, %v639_v60 }
 0xca7   :  { %v641_v62 = vmul.f32 %v2337_v59, %v640_v61 }
 0xca9   :  { %v642_v63 = vadd.f32 %v2337_v59, %v641_v62 }
 0xcab   :  { %v646_v2 = vsel %vm645_vm12, %v2337_v59, %v642_v63 }
 0xcac   :  { %v651_v3 = vsel %vm648_vm13, %v650_v4, %v646_v2  ;;  %v800_v2 = vld [vmem:[#allocation7 + $0x18] sm:$0xff]  ;;  %v799_v4 = vld [vmem:[#allocation7 + $0x10] sm:$0xff] }
 0xcad   :  { %v654_v5 = vmul.f32 %v651_v3, %v601_v45  ;;  %822 = vmatpush.msrb.mxu2 %v800_v2 }
 0xcaf   :  { %823 = vmatpush.msrb.mxu2 %v799_v4  ;;  %v938_v4 = vld [vmem:[#allocation10 + $0x8] sm:$0xff] }
 0xcf2   :  { %v657_v7 = vpop.permute.xlu2 %656 }
 0xcf3   :  { %v659_v9 = vmul.f32 %v657_v7, %v651_v3  ;;  %v798_v7 = vld [vmem:[#allocation7 + $0x8] sm:$0xff] }
 0xcf4   :  { %824 = vmatpush.msrb.mxu2 %v798_v7 }
 0xcf5   :  { %661 = vrot.lane.b32.xlu0 %v659_v9, %s2603_s5 }
 0xd67   :  { %v662_v12 = vpop.permute.xlu0 %661 }
 0xd68   :  { %v664_v6 = vadd.f32 %v662_v12, %v654_v5  ;;  %v2868_v12 = vld [vmem:[%s3390_s10] sm:$0x3] }
 0xd69   :  { %2222 = vmatpush.msk.msra.mxu1 %vm172_vm0, %v2868_v12 }
 0xd6a   :  { %2338 = vtanh.f32 %v664_v6 }
 0xd70   :  { %v2339_v8 = vpop.eup %2338 }
 0xd71   :  { %667 = vrot.lane.b32.xlu1 %v2339_v8, %s2602_s30 }
 0xde3   :  { %v668_v10 = vpop.permute.xlu1 %667 }
 0xde4   :  { %v670_v11 = vmul.f32 %v668_v10, %v651_v3  ;;  %v797_v3 = vld [vmem:[#allocation7] sm:$0xff] }
 0xde5   :  { %825 = vmatpush.msrb.mxu2 %v797_v3  ;;  %v962_v10 = vld [vmem:[%s3395_s15] sm:$0xff] }
 0xde6   :  { %672 = vrot.lane.b32.xlu2 %v670_v11, %s2603_s5  ;;  %v963_v11 = vld [vmem:[%s3395_s15 + $0x8] sm:$0xff] }
 0xe40   :  { %v673_v13 = vpop.permute.xlu2 %672 }
 0xe41   :  { %2191 = vmatmul.msk.f32.vlgmr.msra.gmra.mxu2 %vm225_vm2, %v673_v13  ;;  %v964_v13 = vld [vmem:[%s3395_s15 + $0x10] sm:$0xff] }
 0xe42   :  { %2197 = vmatpush.msk.msra.mxu2 %vm172_vm0, %v2868_v12 }
 0xec4   :  { %v693_v16 = vpop.f32.mrf.mxu2 }
 0xec5   :  { %v696_v17 = vadd.f32 %v693_v16, %v286_v15  ;;  %v2604_v15 = vmov 8.0   ;;  %v966_v16 = vld [vmem:[%s3395_s15 + $0x20] sm:$0xff] }
 0xec7   :  { %2340 = vtanh.f32 %v696_v17  ;;  %v2192_v19 = vmul.f32 -1.442695, %v696_v17 }
 0xec9   :  { %2342 = vpow2.f32 %v2192_v19 }
 0xecd   :  { %v2341_v18 = vpop.eup %2340 }
 0xece   :  { %719 = vrot.lane.b32.xlu0 %v2341_v18, %s2602_s30  ;;  %v2289_v18 = vld [vmem:[%s3387_s7] ss:$0 sm:$0xff] }
 0xecf   :  { %v2343_v20 = vpop.eup %2342 }
 0xed0   :  { %v700_v21 = vadd.f32 1.0, %v2343_v20 }
 0xed2   :  { %2344 = vrcp.f32 %v700_v21  ;;  %v712_v28 = vand.u32 2147483648, %v700_v21  ;;  %vm706_vm15 = vweird.f32 %v700_v21  ;;  %v710_v29 = vand.u32 2147483647, %v700_v21 }
 0xed4   :  { %v713_v31 = vor.u32 1.1754944e-38, %v712_v28  ;;  %vm711_vm4 = vcmp.eq.f32.partialorder %v710_v29, 8.507059e+37 }
 0xed8   :  { %v2345_v22 = vpop.eup %2344 }
 0xed9   :  { %v702_v23 = vmul.f32 %v2345_v22, %v700_v21  ;;  %vm707_vm14 = vweird.f32 %v2345_v22  ;;  %v967_v21 = vld [vmem:[%s3395_s15 + $0x28] sm:$0xff] }
 0xeda   :  { %vm708_vm3 = vmor %vm706_vm15, %vm707_vm14 }
 0xedb   :  { %v703_v24 = vsub.f32 1.0, %v702_v23 }
 0xedd   :  { %v704_v25 = vmul.f32 %v2345_v22, %v703_v24 }
 0xedf   :  { %v705_v27 = vadd.f32 %v2345_v22, %v704_v25 }
 0xee1   :  { %v709_v30 = vsel %vm708_vm3, %v2345_v22, %v705_v27 }
 0xee2   :  { %v714_v33 = vsel %vm711_vm4, %v713_v31, %v709_v30  ;;  %v968_v30 = vld [vmem:[%s3395_s15 + $0x30] sm:$0xff] }
 0xee3   :  { %v717_v35 = vmul.f32 %v714_v33, %v664_v6  ;;  %v970_v6 = vld [vmem:[%s3396_s16] sm:$0x1] }
 0xee4   :  { %2223 = vmatmul.msk.f32.vlgmr.msra.gmra.mxu1 %vm147_vm1, %v970_v6 }
 0xf40   :  { %v720_v32 = vpop.permute.xlu0 %719 }
 0xf41   :  { %v722_v34 = vmul.f32 %v720_v32, %v714_v33 }
 0xf43   :  { %724 = vrot.lane.b32.xlu1 %v722_v34, %s2603_s5 }
 0xfb5   :  { %v725_v36 = vpop.permute.xlu1 %724 }
 0xfb6   :  { %v727_v37 = vadd.f32 %v725_v36, %v717_v35  ;;  %v876_v35 = vld [vmem:[#allocation8 + $0x38] sm:$0xff] }
 0xfb7   :  { %892 = vmatpush.msrb.mxu3 %v876_v35 }
 0xfb8   :  { %2346 = vtanh.f32 %v727_v37 }
 0xfbe   :  { %v2347_v38 = vpop.eup %2346 }
 0xfbf   :  { %730 = vrot.lane.b32.xlu2 %v2347_v38, %s2602_s30 }
0x1019   :  { %v731_v39 = vpop.permute.xlu2 %730 }
0x101a   :  { %v733_v40 = vmul.f32 %v731_v39, %v714_v33  ;;  %v969_v39 = vld [vmem:[%s3395_s15 + $0x38] sm:$0xff] }
0x101c   :  { %735 = vrot.lane.b32.xlu0 %v733_v40, %s2603_s5  ;;  %v874_v40 = vld [vmem:[#allocation8 + $0x28] sm:$0xff] }
0x108e   :  { %v736_v41 = vpop.permute.xlu0 %735 }
0x108f   :  { %2193 = vmatmul.msk.f32.vlgmr.msra.gmra.mxu3 %vm225_vm2, %v736_v41 }
0x1112   :  { %v756_v44 = vpop.f32.mrf.mxu3 }
0x1113   :  { %v759_v45 = vadd.f32 %v756_v44, %v289_v43  ;;  %v872_v44 = vld [vmem:[#allocation8 + $0x18] sm:$0xff] }
0x1115   :  { %2348 = vtanh.f32 %v759_v45  ;;  %v2194_v47 = vmul.f32 -1.442695, %v759_v45 }
0x1117   :  { %2350 = vpow2.f32 %v2194_v47  ;;  %v871_v47 = vld [vmem:[#allocation8 + $0x10] sm:$0xff] }
0x111b   :  { %v2349_v46 = vpop.eup %2348 }
0x111c   :  { %782 = vrot.lane.b32.xlu1 %v2349_v46, %s2602_s30 }
0x111d   :  { %v2351_v48 = vpop.eup %2350 }
0x111e   :  { %v763_v49 = vadd.f32 1.0, %v2351_v48 }
0x1120   :  { %2352 = vrcp.f32 %v763_v49  ;;  %v775_v56 = vand.u32 2147483648, %v763_v49  ;;  %vm769_vm6 = vweird.f32 %v763_v49  ;;  %v773_v26 = vand.u32 2147483647, %v763_v49 }
0x1122   :  { %v776_v58 = vor.u32 1.1754944e-38, %v775_v56  ;;  %vm774_vm8 = vcmp.eq.f32.partialorder %v773_v26, 8.507059e+37  ;;  %v936_v56 = vld [vmem:[%s3391_s11] sm:$0x1]  ;;  %v1181_v26 = vpop.f32.mrf.mxu1 }
0x1126   :  { %v2353_v50 = vpop.eup %2352 }
0x1127   :  { %v765_v51 = vmul.f32 %v2353_v50, %v763_v49  ;;  %vm770_vm5 = vweird.f32 %v2353_v50  ;;  %v870_v49 = vld [vmem:[#allocation8 + $0x8] sm:$0xff] }
0x1128   :  { %vm771_vm7 = vmor %vm769_vm6, %vm770_vm5 }
0x1129   :  { %v766_v52 = vsub.f32 1.0, %v765_v51  ;;  %v869_v51 = vld [vmem:[#allocation8] sm:$0xff] }
0x112b   :  { %v767_v54 = vmul.f32 %v2353_v50, %v766_v52 }
0x112d   :  { %v768_v55 = vadd.f32 %v2353_v50, %v767_v54  ;;  %v943_v54 = vld [vmem:[#allocation10 + $0x30] sm:$0xff] }
0x112e   :  { %1199 = vmatpush.msrb.mxu1 %v943_v54 }
0x112f   :  { %v772_v57 = vsel %vm771_vm7, %v2353_v50, %v768_v55  ;;  %v941_v55 = vld [vmem:[#allocation10 + $0x20] sm:$0xff] }
0x1130   :  { %v777_v60 = vsel %vm774_vm8, %v776_v58, %v772_v57  ;;  %v944_v57 = vld [vmem:[#allocation10 + $0x38] sm:$0xff]  ;;  %1200 = vmatpush.msrb.mxu1 %v941_v55 }
0x1131   :  { %v780_v62 = vmul.f32 %v777_v60, %v727_v37  ;;  %v875_v37 = vld [vmem:[#allocation8 + $0x30] sm:$0xff]  ;;  %1116 = vmatpush.msrb.mxu0 %v944_v57 }
0x1132   :  { %893 = vmatpush.msrb.mxu3 %v875_v37  ;;  %v2970_v37 = vld [vmem:[%s3393_s13 + $0x60] sm:$0xff] }
0x1134   :  { %894 = vmatpush.msrb.mxu3 %v874_v40 }
0x1136   :  { %895 = vmatpush.msrb.mxu3 %v873_v42  ;;  %v2990_v42 = vld [vmem:[%s3393_s13 + $0x58] sm:$0xff] }
0x1138   :  { %896 = vmatpush.msrb.mxu3 %v872_v44  ;;  %v2997_v44 = vld [vmem:[%s3393_s13 + $0x40] sm:$0xff] }
0x113a   :  { %897 = vmatpush.msrb.mxu3 %v871_v47  ;;  %v3009_v47 = vld [vmem:[%s3393_s13 + $0x30] sm:$0xff] }
0x113c   :  { %898 = vmatpush.msrb.mxu3 %v870_v49  ;;  %v2291_v49 = vld [vmem:[%s3391_s11] ss:$0 sm:$0xff] }
0x113e   :  { %899 = vmatpush.msrb.mxu3 %v869_v51 }
0x1140   :  { %1075 = vmatpush.msra.mxu3 %v943_v54 }
0x1142   :  { %1076 = vmatpush.msra.mxu3 %v941_v55 }
0x118e   :  { %v783_v59 = vpop.permute.xlu1 %782 }
0x118f   :  { %v785_v61 = vmul.f32 %v783_v59, %v777_v60  ;;  %v939_v59 = vld [vmem:[#allocation10 + $0x10] sm:$0xff] }
0x1190   :  { %1201 = vmatpush.msrb.mxu1 %v939_v59  ;;  %1077 = vmatpush.msra.mxu3 %v939_v59 }
0x1191   :  { %787 = vrot.lane.b32.xlu2 %v785_v61, %s2603_s5 }
0x11eb   :  { %v788_v63 = vpop.permute.xlu2 %787 }
0x11ec   :  { %v790_v0 = vadd.f32 %v788_v63, %v780_v62  ;;  %v1182_v62 = vadd.f32 %v1181_v26, %v936_v56  ;;  %v937_v63 = vld [vmem:[#allocation10] sm:$0xff]  ;;  %v3030_v56 = vld [vmem:[%s3393_s13 + $0x28] sm:$0xff] }
0x11ed   :  { %1202 = vmatpush.msrb.mxu1 %v937_v63  ;;  %1078 = vmatpush.msra.mxu3 %v937_v63 }
0x11ee   :  { %2354 = vtanh.f32 %v790_v0  ;;  %v940_v0 = vld [vmem:[#allocation10 + $0x18] sm:$0xff]  ;;  %2224 = vmatmul.msk.f32.vlgmr.msrb.gmra.mxu1 %vm225_vm2, %v1182_v62 }
0x11ef   :  { %2356 = vrcp.f32 %v2604_v15  ;;  %1219 = vmatpush.msra.mxu1 %v944_v57 }
0x11f4   :  { %v2355_v1 = vpop.eup %2354 }
0x11f5   :  { %793 = vrot.lane.b32.xlu0 %v2355_v1, %s2602_s30  ;;  %v2357_v17 = vpop.eup %2356 }
0x11f6   :  { %v839_v19 = vmul.f32 8.0, %v2357_v17  ;;  %vm843_vm10 = vweird.f32 %v2357_v17 }
0x11f8   :  { %v840_v23 = vsub.f32 1.0, %v839_v19 }
0x11fa   :  { %v841_v27 = vmul.f32 %v2357_v17, %v840_v23 }
0x11fc   :  { %v842_v31 = vadd.f32 %v2357_v17, %v841_v27 }
0x11fe   :  { %v2911_v34 = vsel %vm843_vm10, %v2357_v17, %v842_v31 }
0x1267   :  { %v794_v9 = vpop.permute.xlu0 %793 }
0x1268   :  { %v796_v5 = vmul.f32 %v794_v9, %v777_v60  ;;  %v942_v60 = vld [vmem:[#allocation10 + $0x28] sm:$0xff] }
0x1269   :  { %1117 = vmatpush.msrb.mxu0 %v942_v60  ;;  %1220 = vmatpush.msra.mxu1 %v942_v60 }
0x126a   :  { %806 = vrot.lane.b32.xlu1 %v796_v5, %s2603_s5 }
0x126b   :  { %1118 = vmatpush.msrb.mxu0 %v940_v0  ;;  %1221 = vmatpush.msra.mxu1 %v940_v0  ;;  %v1204_v27 = vpop.f32.mrf.mxu1 }
0x126d   :  { %1119 = vmatpush.msrb.mxu0 %v938_v4  ;;  %1222 = vmatpush.msra.mxu1 %v938_v4 }
0x126e   :  { %2225 = vmatmul.msk.f32.vlgmr.msra.gmra.mxu1 %vm225_vm2, %v1182_v62  ;;  %v946_v62 = vld [vmem:[%s3393_s13 + $0x8] sm:$0xff] }
0x126f   :  { %2226 = vmatpush.msk.msrb.mxu1 %vm172_vm0, %v2868_v12  ;;  %vm1230_vm0 = vcmask 1040384  }
0x1271   :  { %1277 = vmatpush.msra.mxu1 %v943_v54  ;;  %v3025_v54 = vld [vmem:[%s3393_s13 + $0x20] sm:$0xff] }
0x1273   :  { %1278 = vmatpush.msra.mxu1 %v941_v55 }
0x1275   :  { %1279 = vmatpush.msra.mxu1 %v939_v59 }
0x1276   :  { %2227 = vmatmul.msk.f32.vlgmr.msrb.gmra.mxu1 %vm147_vm1, %v2800_v53 }
0x1277   :  { %1280 = vmatpush.msra.mxu1 %v937_v63 }
0x1279   :  { %1297 = vmatpush.msrb.mxu1 %v944_v57  ;;  %v3037_v57 = vld [vmem:[%s3393_s13 + $0x10] sm:$0xff] }
0x127b   :  { %1298 = vmatpush.msrb.mxu1 %v942_v60 }
0x127d   :  { %1299 = vmatpush.msrb.mxu1 %v940_v0 }
0x127f   :  { %1300 = vmatpush.msrb.mxu1 %v938_v4 }
0x12dc   :  { %v807_v8 = vpop.permute.xlu1 %806 }
0x12dd   :  { %2195 = vmatmul.msk.f32.vlgmr.msrb.gmra.mxu2 %vm225_vm2, %v807_v8 }
0x12e5   :  { %2198 = vmatmul.msk.f32.vlgmr.msra.gmra.mxu2 %vm147_vm1, %v962_v10 }
0x12ed   :  { %2199 = vmatmul.msk.f32.gmra.mxu2 %vm147_vm1, %v963_v11 }
0x12f5   :  { %2200 = vmatmul.msk.f32.gmra.mxu2 %vm147_vm1, %v964_v13 }
0x12fd   :  { %2201 = vmatmul.msk.f32.gmra.mxu2 %vm147_vm1, %v965_v14 }
0x1305   :  { %2202 = vmatmul.msk.f32.gmra.mxu2 %vm147_vm1, %v966_v16  ;;  %v2946_v16 = vld [vmem:[%s3393_s13 + $0x70] sm:$0xff] }
0x1306   :  { %1316 = vmatpush.msrb.mxu2 %v2946_v16 }
0x1308   :  { %1317 = vmatpush.msrb.mxu2 %v2970_v37 }
0x130d   :  { %2203 = vmatmul.msk.f32.gmra.mxu2 %vm147_vm1, %v967_v21  ;;  %v2290_v21 = vld [vmem:[%s3389_s9] ss:$0 sm:$0xff] }
0x1315   :  { %2204 = vmatmul.msk.f32.gmra.mxu2 %vm147_vm1, %v968_v30 }
0x131d   :  { %2205 = vmatmul.msk.f32.gmra.mxu2 %vm147_vm1, %v969_v39 }
0x1360   :  { %v827_v20 = vpop.f32.mrf.mxu2 }
0x1361   :  { %v828_v22 = vadd.f32 %v2289_v18, %v827_v20 }
0x1363   :  { %v831_v24 = vsel %vm830_vm9, %v828_v22, 0.0 }
0x1364   :  { %v832_v25 = vrot.slane %v831_v24, 4 }
0x1366   :  { %v833_v28 = vadd.f32 %v832_v25, %v831_v24 }
0x1368   :  { %v834_v29 = vrot.slane %v833_v28, 2  ;;  %v1015_v2 = vpop.f32.mrf.mxu2 }
0x1369   :  { %2214 = vmatmul.msk.f32.vlgmr.msrb.gmra.mxu0 %vm225_vm2, %v1015_v2 }
0x136a   :  { %v835_v32 = vadd.f32 %v834_v29, %v833_v28 }
0x136c   :  { %v836_v33 = vrot.slane %v835_v32, 1 }
0x136e   :  { %v837_v36 = vadd.f32 %v836_v33, %v835_v32  ;;  %v1224_v32 = vpop.f32.mrf.mxu1  ;;  %v2964_v33 = vld [vmem:[%s3393_s13 + $0x78] sm:$0xff] }
0x136f   :  { %v1229_v35 = vrot.slane %v1224_v32, 7 }
0x1370   :  { %v845_v38 = vmul.f32 %v2911_v34, %v837_v36  ;;  %v1018_v14 = vpop.f32.mrf.mxu2 }
0x1371   :  { %2215 = vmatmul.msk.f32.gmra.mxu0 %vm225_vm2, %v1018_v14  ;;  %v2977_v39 = vsel %vm1230_vm0, %v1204_v27, %v1229_v35 }
0x1372   :  { %v2918_v41 = vsub.f32 %v828_v22, %v845_v38  ;;  %v2975_v38 = vld [vmem:[%s3393_s13 + $0x68] sm:$0xff] }
0x1374   :  { %v847_v43 = vmul.f32 %v2918_v41, %v2918_v41 }
0x1376   :  { %v848_v45 = vsel %vm830_vm9, %v847_v43, 0.0  ;;  %v1254_v51 = vpop.f32.mrf.mxu1 }
0x1377   :  { %v849_v46 = vrot.slane %v848_v45, 4  ;;  %v1255_v55 = vadd.f32 %v2291_v49, %v1254_v51 }
0x1378   :  { %v1021_v53 = vpop.f32.mrf.mxu2 }
0x1379   :  { %v850_v48 = vadd.f32 %v849_v46, %v848_v45  ;;  %2216 = vmatmul.msk.f32.gmra.mxu0 %vm225_vm2, %v1021_v53  ;;  %v3002_v45 = vld [vmem:[%s3393_s13 + $0x48] sm:$0xff]  ;;  %2228 = vmatmul.msk.f32.vlgmr.msra.gmra.mxu1 %vm225_vm2, %v1255_v55 }
0x137b   :  { %v851_v50 = vrot.slane %v850_v48, 2 }
0x137d   :  { %v852_v52 = vadd.f32 %v851_v50, %v850_v48  ;;  %v3014_v48 = vld [vmem:[%s3393_s13 + $0x38] sm:$0xff] }
0x137f   :  { %v853_v58 = vrot.slane %v852_v52, 1 }
0x1380   :  { %v1024_v15 = vpop.f32.mrf.mxu2 }
0x1381   :  { %v854_v61 = vadd.f32 %v853_v58, %v852_v52  ;;  %2217 = vmatmul.msk.f32.gmra.mxu0 %vm225_vm2, %v1024_v15  ;;  %v3043_v58 = vld [vmem:[%s3393_s13 + $0x18] sm:$0xff]  ;;  %2229 = vmatmul.msk.f32.vlgmr.msrb.gmra.mxu1 %vm225_vm2, %v1255_v55 }
0x1383   :  { %v855_v1 = vmul.f32 %v854_v61, %v2911_v34  ;;  %v945_v61 = vld [vmem:[%s3393_s13] sm:$0xff] }
0x1385   :  { %v856_v7 = vadd.f32 1e-05, %v855_v1 }
0x1387   :  { %2358 = vrsqrt.f32 %v856_v7  ;;  %vm863_vm12 = vweird.f32 %v856_v7 }
0x1388   :  { %v1027_v17 = vpop.f32.mrf.mxu2 }
0x1389   :  { %2218 = vmatmul.msk.f32.gmra.mxu0 %vm225_vm2, %v1027_v17 }
0x138d   :  { %v2359_v3 = vpop.eup %2358 }
0x138e   :  { %v858_v9 = vmul.f32 %v2359_v3, %v856_v7  ;;  %vm864_vm11 = vweird.f32 %v2359_v3 }
0x138f   :  { %vm865_vm13 = vmor %vm863_vm12, %vm864_vm11 }
0x1390   :  { %v859_v5 = vmul.f32 %v2359_v3, %v858_v9  ;;  %v1030_v18 = vpop.f32.mrf.mxu2 }
0x1391   :  { %2219 = vmatmul.msk.f32.gmra.mxu0 %vm225_vm2, %v1030_v18 }
0x1392   :  { %v860_v6 = vmul.f32 0.5, %v859_v5 }
0x1394   :  { %v861_v8 = vsub.f32 1.5, %v860_v6 }
0x1396   :  { %v862_v10 = vmul.f32 %v2359_v3, %v861_v8 }
0x1398   :  { %v866_v11 = vsel %vm865_vm13, %v2359_v3, %v862_v10  ;;  %v1033_v19 = vpop.f32.mrf.mxu2 }
0x1399   :  { %v867_v13 = vmul.f32 %v866_v11, %v2918_v41  ;;  %2220 = vmatmul.msk.f32.gmra.mxu0 %vm225_vm2, %v1033_v19  ;;  %v2985_v41 = vld [vmem:[%s3393_s13 + $0x50] sm:$0xff] }
0x139a   :  { %1318 = vmatpush.msrb.mxu2 %v2985_v41 }
0x139b   :  { %v868_v12 = vmax.f32 %v867_v13, 0.0 }
0x139c   :  { %1319 = vmatpush.msrb.mxu2 %v2997_v44 }
0x139d   :  { %2196 = vmatmul.msk.f32.vlgmr.msrb.gmra.mxu3 %vm830_vm9, %v868_v12 }
0x139e   :  { %1336 = vmatpush.msrb.mxu3 %v2964_v33  ;;  %1320 = vmatpush.msrb.mxu2 %v3009_v47 }
0x13a0   :  { %v1036_v20 = vpop.f32.mrf.mxu2  ;;  %1337 = vmatpush.msrb.mxu3 %v2975_v38  ;;  %1321 = vmatpush.msrb.mxu2 %v3025_v54 }
0x13a1   :  { %2221 = vmatmul.msk.f32.gmra.mxu0 %vm225_vm2, %v1036_v20 }
0x13a2   :  { %1338 = vmatpush.msrb.mxu3 %v2990_v42  ;;  %1322 = vmatpush.msrb.mxu2 %v3037_v57 }
0x13a4   :  { %1339 = vmatpush.msrb.mxu3 %v3002_v45  ;;  %1323 = vmatpush.msrb.mxu2 %v945_v61 }
0x13a5   :  { %2206 = vmatmul.msk.f32.vlgmr.msra.gmra.mxu3 %vm225_vm2, %v1015_v2 }
0x13a6   :  { %1340 = vmatpush.msrb.mxu3 %v3014_v48 }
0x13a8   :  { %1341 = vmatpush.msrb.mxu3 %v3030_v56 }
0x13aa   :  { %1342 = vmatpush.msrb.mxu3 %v3043_v58 }
0x13ac   :  { %1343 = vmatpush.msrb.mxu3 %v946_v62 }
0x13ad   :  { %2207 = vmatmul.msk.f32.gmra.mxu3 %vm225_vm2, %v1018_v14 }
0x13b5   :  { %2208 = vmatmul.msk.f32.gmra.mxu3 %vm225_vm2, %v1021_v53 }
0x13bd   :  { %2209 = vmatmul.msk.f32.gmra.mxu3 %vm225_vm2, %v1024_v15 }
0x13c5   :  { %2210 = vmatmul.msk.f32.gmra.mxu3 %vm225_vm2, %v1027_v17 }
0x13cd   :  { %2211 = vmatmul.msk.f32.gmra.mxu3 %vm225_vm2, %v1030_v18 }
0x13d5   :  { %2212 = vmatmul.msk.f32.gmra.mxu3 %vm225_vm2, %v1033_v19 }
0x13dd   :  { %2213 = vmatmul.msk.f32.gmra.mxu3 %vm225_vm2, %v1036_v20 }
0x13e6   :  { %v1121_v59 = vpop.f32.mrf.mxu0 }
0x13e7   :  { %v3053_v63 = vadd.f32 %v1121_v59, %v946_v62 }
0x13ee   :  { %v1124_v3 = vpop.f32.mrf.mxu0 }
0x13f6   :  { %v1127_v8 = vpop.f32.mrf.mxu0 }
0x13fe   :  { %v1130_v53 = vpop.f32.mrf.mxu0 }
0x1420   :  { %v901_v22 = vpop.f32.mrf.mxu3 }
0x1421   :  { %v902_v23 = vadd.f32 %v2290_v21, %v901_v22 }
0x1423   :  { %v904_v24 = vsel %vm830_vm9, %v902_v23, 0.0 }
0x1424   :  { %v905_v25 = vrot.slane %v904_v24, 4 }
0x1426   :  { %v906_v28 = vadd.f32 %v905_v25, %v904_v24 }
0x1428   :  { %v907_v29 = vrot.slane %v906_v28, 2  ;;  %v1080_v1 = vpop.f32.mrf.mxu3 }
0x1429   :  { %v3055_v2 = vadd.f32 %v1080_v1, %v945_v61 }
0x142a   :  { %v908_v30 = vadd.f32 %v907_v29, %v906_v28 }
0x142c   :  { %v909_v31 = vrot.slane %v908_v30, 1 }
0x142e   :  { %v910_v36 = vadd.f32 %v909_v31, %v908_v30 }
0x1430   :  { %v911_v40 = vmul.f32 %v910_v36, %v2911_v34  ;;  %v3059_v6 = vpop.f32.mrf.mxu3  ;;  %v3080_v36 = vadd.f32 %v1130_v53, %v3014_v48 }
0x1432   :  { %v912_v43 = vsub.f32 %v902_v23, %v911_v40  ;;  %v3091_v40 = vadd.f32 %v1127_v8, %v3030_v56 }
0x1434   :  { %v913_v46 = vmul.f32 %v912_v43, %v912_v43 }
0x1436   :  { %v914_v50 = vsel %vm830_vm9, %v913_v46, 0.0 }
0x1437   :  { %v915_v52 = vrot.slane %v914_v50, 4 }
0x1438   :  { %v1086_v12 = vpop.f32.mrf.mxu3 }
0x1439   :  { %v916_v26 = vadd.f32 %v915_v52, %v914_v50 }
0x143b   :  { %v917_v60 = vrot.slane %v916_v26, 2 }
0x143d   :  { %v918_v0 = vadd.f32 %v917_v60, %v916_v26 }
0x143f   :  { %v919_v4 = vrot.slane %v918_v0, 1 }
0x1440   :  { %v1089_v19 = vpop.f32.mrf.mxu3 }
0x1441   :  { %v920_v7 = vadd.f32 %v919_v4, %v918_v0 }
0x1443   :  { %v921_v9 = vmul.f32 %v920_v7, %v2911_v34  ;;  %v1133_v34 = vpop.f32.mrf.mxu0 }
0x1444   :  { %v3075_v32 = vadd.f32 %v1133_v34, %v3002_v45  ;;  %v3173_v45 = vld [vmem:[%s3394_s14] sm:$0x3] }
0x1445   :  { %v922_v5 = vadd.f32 1e-05, %v921_v9  ;;  %v1258_v46 = vperm.slane %v3173_v45, 0 }
0x1447   :  { %2360 = vrsqrt.f32 %v922_v5  ;;  %vm929_vm15 = vweird.f32 %v922_v5 }
0x1448   :  { %v1092_v22 = vpop.f32.mrf.mxu3 }
0x144b   :  { %v1136_v23 = vpop.f32.mrf.mxu0 }
0x144c   :  { %v3070_v31 = vadd.f32 %v1136_v23, %v2990_v42 }
0x144d   :  { %v2361_v10 = vpop.eup %2360 }
0x144e   :  { %v924_v11 = vmul.f32 %v2361_v10, %v922_v5  ;;  %vm930_vm14 = vweird.f32 %v2361_v10 }
0x144f   :  { %vm931_vm3 = vmor %vm929_vm15, %vm930_vm14 }
0x1450   :  { %v925_v13 = vmul.f32 %v2361_v10, %v924_v11  ;;  %v1095_v24 = vpop.f32.mrf.mxu3 }
0x1451   :  { %v3094_v42 = vadd.f32 %v1095_v24, %v2985_v41  ;;  %v3111_v41 = vadd.f32 %v1089_v19, %v3009_v47  ;;  %v1282_v47 = vpop.f32.mrf.mxu1 }
0x1452   :  { %v926_v14 = vmul.f32 0.5, %v925_v13  ;;  %v1283_v48 = vadd.f32 %v1282_v47, %v1258_v46 }
0x1453   :  { %v1139_v25 = vpop.f32.mrf.mxu0 }
0x1454   :  { %v927_v15 = vsub.f32 1.5, %v926_v14  ;;  %v3064_v29 = vadd.f32 %v1139_v25, %v2975_v38 }
0x1456   :  { %v928_v17 = vmul.f32 %v2361_v10, %v927_v15 }
0x1458   :  { %v932_v18 = vsel %vm931_vm3, %v2361_v10, %v928_v17  ;;  %v1098_v27 = vpop.f32.mrf.mxu3 }
0x1459   :  { %v933_v20 = vmul.f32 %v932_v18, %v912_v43  ;;  %v3120_v43 = vadd.f32 %v1086_v12, %v3025_v54  ;;  %v1259_v54 = vperm.slane %v3173_v45, 1  ;;  %v1302_v56 = vpop.f32.mrf.mxu1 }
0x145b   :  { %v934_v21 = vmax.f32 %v933_v20, 0.0  ;;  %v1142_v28 = vpop.f32.mrf.mxu0  ;;  %v1303_v26 = vadd.f32 %v1302_v56, %v1259_v54 }
0x145c   :  { %v3067_v30 = vadd.f32 %v1142_v28, %v2964_v33  ;;  %v3083_v33 = vadd.f32 %v1098_v27, %v2970_v37  ;;  %v3104_v37 = vadd.f32 %v1092_v22, %v2997_v44  ;;  %v3128_v44 = vadd.f32 %v3059_v6, %v3037_v57 }
0x145d   :  { %2230 = vmatmul.msk.f32.vlgmr.msrb.gmra.mxu2 %vm830_vm9, %v934_v21  ;;  %2231 = vmatmul.msk.f32.vlgmr.msrb.gmra.mxu3 %vm830_vm9, %v934_v21  ;;  %v1233_v28 = vadd.f32 %v2977_v39, %v3173_v45 }
0x145e   :  { %1438 = vmatpush.msra.mxu2 %v3067_v30  ;;  %1533 = vmatpush.msra.mxu3 %v3067_v30 }
0x1460   :  { %1439 = vmatpush.msra.mxu2 %v3064_v29  ;;  %1534 = vmatpush.msra.mxu3 %v3064_v29  ;;  %v1101_v35 = vpop.f32.mrf.mxu3 }
0x1461   :  { %v3086_v38 = vadd.f32 %v1101_v35, %v2946_v16  ;;  %v3101_v16 = vadd.f32 %v1124_v3, %v3043_v58  ;;  %v3203_v35 = vperm.slane %v1233_v28, 0 }
0x1462   :  { %1440 = vmatpush.msra.mxu2 %v3070_v31  ;;  %1535 = vmatpush.msra.mxu3 %v3070_v31 }
0x1463   :  { %1418 = vmatpush.msra.mxu1 %v3086_v38  ;;  %1513 = vmatpush.msra.mxu0 %v3086_v38 }
0x1464   :  { %1441 = vmatpush.msra.mxu2 %v3075_v32  ;;  %1536 = vmatpush.msra.mxu3 %v3075_v32 }
0x1465   :  { %1419 = vmatpush.msra.mxu1 %v3083_v33  ;;  %1514 = vmatpush.msra.mxu0 %v3083_v33 }
0x1466   :  { %1442 = vmatpush.msra.mxu2 %v3080_v36  ;;  %1537 = vmatpush.msra.mxu3 %v3080_v36 }
0x1467   :  { %1420 = vmatpush.msra.mxu1 %v3094_v42  ;;  %1515 = vmatpush.msra.mxu0 %v3094_v42 }
0x1468   :  { %1443 = vmatpush.msra.mxu2 %v3091_v40  ;;  %1538 = vmatpush.msra.mxu3 %v3091_v40 }
0x1469   :  { %1421 = vmatpush.msra.mxu1 %v3104_v37  ;;  %1516 = vmatpush.msra.mxu0 %v3104_v37 }
0x146a   :  { %1444 = vmatpush.msra.mxu2 %v3101_v16  ;;  %1539 = vmatpush.msra.mxu3 %v3101_v16 }
0x146b   :  { %1422 = vmatpush.msra.mxu1 %v3111_v41  ;;  %1517 = vmatpush.msra.mxu0 %v3111_v41 }
0x146c   :  { %1445 = vmatpush.msra.mxu2 %v3053_v63  ;;  %1540 = vmatpush.msra.mxu3 %v3053_v63 }
0x146d   :  { %1423 = vmatpush.msra.mxu1 %v3120_v43  ;;  %1518 = vmatpush.msra.mxu0 %v3120_v43 }
0x146e   :  { %1628 = vmatpush.msrb.mxu2 %v3067_v30  ;;  %1723 = vmatpush.msrb.mxu3 %v3067_v30 }
0x146f   :  { %1424 = vmatpush.msra.mxu1 %v3128_v44  ;;  %1519 = vmatpush.msra.mxu0 %v3128_v44 }
0x1470   :  { %1629 = vmatpush.msrb.mxu2 %v3064_v29  ;;  %1724 = vmatpush.msrb.mxu3 %v3064_v29 }
0x1471   :  { %1425 = vmatpush.msra.mxu1 %v3055_v2  ;;  %1520 = vmatpush.msra.mxu0 %v3055_v2 }
0x1472   :  { %1630 = vmatpush.msrb.mxu2 %v3070_v31  ;;  %1725 = vmatpush.msrb.mxu3 %v3070_v31 }
0x1473   :  { %1608 = vmatpush.msrb.mxu1 %v3086_v38  ;;  %1703 = vmatpush.msrb.mxu0 %v3086_v38 }
0x1474   :  { %1631 = vmatpush.msrb.mxu2 %v3075_v32  ;;  %1726 = vmatpush.msrb.mxu3 %v3075_v32 }
0x1475   :  { %1609 = vmatpush.msrb.mxu1 %v3083_v33  ;;  %1704 = vmatpush.msrb.mxu0 %v3083_v33 }
0x1476   :  { %1632 = vmatpush.msrb.mxu2 %v3080_v36  ;;  %1727 = vmatpush.msrb.mxu3 %v3080_v36 }
0x1477   :  { %1610 = vmatpush.msrb.mxu1 %v3094_v42  ;;  %1705 = vmatpush.msrb.mxu0 %v3094_v42 }
0x1478   :  { %1633 = vmatpush.msrb.mxu2 %v3091_v40  ;;  %1728 = vmatpush.msrb.mxu3 %v3091_v40 }
0x1479   :  { %1611 = vmatpush.msrb.mxu1 %v3104_v37  ;;  %1706 = vmatpush.msrb.mxu0 %v3104_v37 }
0x147a   :  { %1634 = vmatpush.msrb.mxu2 %v3101_v16  ;;  %1729 = vmatpush.msrb.mxu3 %v3101_v16 }
0x147b   :  { %1612 = vmatpush.msrb.mxu1 %v3111_v41  ;;  %1707 = vmatpush.msrb.mxu0 %v3111_v41 }
0x147c   :  { %1635 = vmatpush.msrb.mxu2 %v3053_v63  ;;  %1730 = vmatpush.msrb.mxu3 %v3053_v63 }
0x147d   :  { %1613 = vmatpush.msrb.mxu1 %v3120_v43  ;;  %1708 = vmatpush.msrb.mxu0 %v3120_v43 }
0x147f   :  { %1614 = vmatpush.msrb.mxu1 %v3128_v44  ;;  %1709 = vmatpush.msrb.mxu0 %v3128_v44 }
0x1481   :  { %1615 = vmatpush.msrb.mxu1 %v3055_v2  ;;  %1710 = vmatpush.msrb.mxu0 %v3055_v2 }
0x14e0   :  { %v1325_v49 = vpop.f32.mrf.mxu2  ;;  %v1345_v57 = vpop.f32.mrf.mxu3 }
0x14e1   :  { %v1348_v50 = vadd.f32 %v1325_v49, %v1283_v48  ;;  %v1349_v59 = vadd.f32 %v1345_v57, %v1303_v26 }
0x14e3   :  { %v2232_v51 = vmul.f32 -1.442695, %v1348_v50  ;;  %v2233_v8 = vmul.f32 -1.442695, %v1349_v59 }
0x14e5   :  { %2362 = vpow2.f32 %v2232_v51 }
0x14eb   :  { %v2363_v52 = vpop.eup %2362 }
0x14ec   :  { %v1353_v55 = vadd.f32 1.0, %v2363_v52  ;;  %v3206_v52 = vperm.slane %v1233_v28, 1 }
0x14ee   :  { %2364 = vrcp.f32 %v1353_v55  ;;  %v1365_v62 = vand.u32 2147483648, %v1353_v55  ;;  %v1363_v1 = vand.u32 2147483647, %v1353_v55  ;;  %vm1359_vm4 = vweird.f32 %v1353_v55 }
0x14ef   :  { %2366 = vtanh.f32 %v1349_v59 }
0x14f0   :  { %v1366_v7 = vor.u32 1.1754944e-38, %v1365_v62  ;;  %vm1364_vm6 = vcmp.eq.f32.partialorder %v1363_v1, 8.507059e+37  ;;  %2368 = vpow2.f32 %v2233_v8 }
0x14f4   :  { %v2365_v58 = vpop.eup %2364 }
0x14f5   :  { %v1355_v60 = vmul.f32 %v2365_v58, %v1353_v55  ;;  %vm1360_vm2 = vweird.f32 %v2365_v58  ;;  %v2367_v9 = vpop.eup %2366 }
0x14f6   :  { %vm1361_vm5 = vmor %vm1359_vm4, %vm1360_vm2  ;;  %v2369_v10 = vpop.eup %2368 }
0x14f7   :  { %v1356_v61 = vsub.f32 1.0, %v1355_v60  ;;  %v1373_v11 = vadd.f32 1.0, %v2369_v10 }
0x14f9   :  { %v1357_v0 = vmul.f32 %v2365_v58, %v1356_v61  ;;  %2370 = vrcp.f32 %v1373_v11  ;;  %v1385_v20 = vand.u32 2147483648, %v1373_v11  ;;  %vm1379_vm8 = vweird.f32 %v1373_v11 }
0x14fa   :  { %v1383_v34 = vand.u32 2147483647, %v1373_v11 }
0x14fb   :  { %v1358_v4 = vadd.f32 %v2365_v58, %v1357_v0  ;;  %v1386_v22 = vor.u32 1.1754944e-38, %v1385_v20 }
0x14fc   :  { %vm1384_vm11 = vcmp.eq.f32.partialorder %v1383_v34, 8.507059e+37 }
0x14fd   :  { %v1362_v3 = vsel %vm1361_vm5, %v2365_v58, %v1358_v4 }
0x14fe   :  { %v1367_v5 = vsel %vm1364_vm6, %v1366_v7, %v1362_v3 }
0x14ff   :  { %v1390_v6 = vmul.f32 %v2367_v9, %v1367_v5  ;;  %v2371_v13 = vpop.eup %2370  ;;  %v1389_v15 = vmul.f32 0.0, %v1367_v5 }
0x1500   :  { %v1375_v12 = vmul.f32 %v2371_v13, %v1373_v11  ;;  %vm1380_vm7 = vweird.f32 %v2371_v13 }
0x1501   :  { %1392 = vrot.lane.b32.xlu2 %v1390_v6, %s2602_s30  ;;  %vm1381_vm10 = vmor %vm1379_vm8, %vm1380_vm7 }
0x1502   :  { %v1376_v14 = vsub.f32 1.0, %v1375_v12 }
0x1504   :  { %v1377_v53 = vmul.f32 %v2371_v13, %v1376_v14 }
0x1506   :  { %v1378_v19 = vadd.f32 %v2371_v13, %v1377_v53 }
0x1508   :  { %v1382_v21 = vsel %vm1381_vm10, %v2371_v13, %v1378_v19 }
0x1509   :  { %v1387_v24 = vsel %vm1384_vm11, %v1386_v22, %v1382_v21 }
0x155b   :  { %v1393_v17 = vpop.permute.xlu2 %1392 }
0x155c   :  { %v3178_v18 = vadd.f32 %v1393_v17, %v1389_v15 }
0x155e   :  { %2372 = vtanh.f32 %v3178_v18 }
0x1564   :  { %v2373_v23 = vpop.eup %2372 }
0x1565   :  { %v1397_v25 = vmul.f32 %v2373_v23, %v1387_v24 }
0x1567   :  { %1399 = vrot.lane.b32.xlu0 %v1397_v25, %s2602_s30 }
0x15d9   :  { %v1400_v27 = vpop.permute.xlu0 %1399 }
0x15da   :  { %1402 = vst.msk [vmem:[#allocation2] sm:$0xff] %vm830_vm9, %v1400_v27  ;;  %2234 = vmatmul.msk.f32.vlgmr.msra.gmra.mxu1 %vm830_vm9, %v1400_v27  ;;  %2235 = vmatmul.msk.f32.vlgmr.msra.gmra.mxu2 %vm830_vm9, %v1400_v27 }
0x15db   :  { %1798 = vmatpush.msra.mxu1 %v3086_v38  ;;  %1818 = vmatpush.msra.mxu2 %v3067_v30 }
0x15dd   :  { %1799 = vmatpush.msra.mxu1 %v3083_v33  ;;  %1819 = vmatpush.msra.mxu2 %v3064_v29 }
0x15df   :  { %1800 = vmatpush.msra.mxu1 %v3094_v42  ;;  %1820 = vmatpush.msra.mxu2 %v3070_v31 }
0x15e1   :  { %1801 = vmatpush.msra.mxu1 %v3104_v37  ;;  %1821 = vmatpush.msra.mxu2 %v3075_v32 }
0x15e3   :  { %1802 = vmatpush.msra.mxu1 %v3111_v41  ;;  %1822 = vmatpush.msra.mxu2 %v3080_v36 }
0x15e5   :  { %1803 = vmatpush.msra.mxu1 %v3120_v43  ;;  %1823 = vmatpush.msra.mxu2 %v3091_v40 }
0x15e7   :  { %1804 = vmatpush.msra.mxu1 %v3128_v44  ;;  %1824 = vmatpush.msra.mxu2 %v3101_v16 }
0x15e9   :  { %1805 = vmatpush.msra.mxu1 %v3055_v2  ;;  %1825 = vmatpush.msra.mxu2 %v3053_v63 }
0x1657   :  { %v1427_v46 = vpop.f32.mrf.mxu1 }
0x1658   :  { %v1428_v47 = vadd.f32 %v1427_v46, %v3203_v35 }
0x165a   :  { %v2236_v48 = vmul.f32 -1.442695, %v1428_v47 }
0x165c   :  { %2374 = vpow2.f32 %v2236_v48 }
0x165d   :  { %v1447_v51 = vpop.f32.mrf.mxu2 }
0x165e   :  { %v1448_v55 = vadd.f32 %v1447_v51, %v3206_v52 }
0x1660   :  { %v2237_v1 = vmul.f32 -1.442695, %v1448_v55 }
0x1662   :  { %v2375_v49 = vpop.eup %2374 }
0x1663   :  { %v1453_v50 = vadd.f32 1.0, %v2375_v49 }
0x1665   :  { %2376 = vrcp.f32 %v1453_v50  ;;  %v1465_v39 = vand.u32 2147483648, %v1453_v50  ;;  %v1463_v57 = vand.u32 2147483647, %v1453_v50  ;;  %vm1459_vm13 = vweird.f32 %v1453_v50 }
0x1666   :  { %2378 = vtanh.f32 %v1448_v55 }
0x1667   :  { %v1466_v59 = vor.u32 1.1754944e-38, %v1465_v39  ;;  %vm1464_vm14 = vcmp.eq.f32.partialorder %v1463_v57, 8.507059e+37  ;;  %2380 = vpow2.f32 %v2237_v1 }
0x166b   :  { %v2377_v54 = vpop.eup %2376 }
0x166c   :  { %v1455_v56 = vmul.f32 %v2377_v54, %v1453_v50  ;;  %vm1460_vm12 = vweird.f32 %v2377_v54  ;;  %v2379_v61 = vpop.eup %2378 }
0x166d   :  { %vm1461_vm0 = vmor %vm1459_vm13, %vm1460_vm12  ;;  %v2381_v4 = vpop.eup %2380 }
0x166e   :  { %v1456_v26 = vsub.f32 1.0, %v1455_v56  ;;  %v1473_v7 = vadd.f32 1.0, %v2381_v4 }
0x1670   :  { %v1457_v45 = vmul.f32 %v2377_v54, %v1456_v26  ;;  %2382 = vrcp.f32 %v1473_v7  ;;  %v1485_v12 = vand.u32 2147483648, %v1473_v7  ;;  %vm1479_vm3 = vweird.f32 %v1473_v7 }
0x1671   :  { %v1483_v14 = vand.u32 2147483647, %v1473_v7 }
0x1672   :  { %v1458_v58 = vadd.f32 %v2377_v54, %v1457_v45  ;;  %v1486_v15 = vor.u32 1.1754944e-38, %v1485_v12 }
0x1673   :  { %vm1484_vm4 = vcmp.eq.f32.partialorder %v1483_v14, 8.507059e+37 }
0x1674   :  { %v1462_v60 = vsel %vm1461_vm0, %v2377_v54, %v1458_v58 }
0x1675   :  { %v1467_v62 = vsel %vm1464_vm14, %v1466_v59, %v1462_v60 }
0x1676   :  { %v1490_v0 = vmul.f32 %v2379_v61, %v1467_v62  ;;  %v2383_v3 = vpop.eup %2382  ;;  %v1489_v8 = vmul.f32 %v1467_v62, %v3178_v18 }
0x1677   :  { %v1475_v9 = vmul.f32 %v2383_v3, %v1473_v7  ;;  %vm1480_vm15 = vweird.f32 %v2383_v3 }
0x1678   :  { %1492 = vrot.lane.b32.xlu1 %v1490_v0, %s2602_s30  ;;  %vm1481_vm2 = vmor %vm1479_vm3, %vm1480_vm15 }
0x1679   :  { %v1476_v5 = vsub.f32 1.0, %v1475_v9 }
0x167b   :  { %v1477_v6 = vmul.f32 %v2383_v3, %v1476_v5 }
0x167d   :  { %v1478_v13 = vadd.f32 %v2383_v3, %v1477_v6 }
0x167f   :  { %v1482_v53 = vsel %vm1481_vm2, %v2383_v3, %v1478_v13 }
0x1680   :  { %v1487_v19 = vsel %vm1484_vm4, %v1486_v15, %v1482_v53 }
0x16ea   :  { %v1493_v10 = vpop.permute.xlu1 %1492 }
0x16eb   :  { %v3211_v11 = vadd.f32 %v1493_v10, %v1489_v8 }
0x16ed   :  { %2384 = vtanh.f32 %v3211_v11 }
0x16f3   :  { %v2385_v17 = vpop.eup %2384 }
0x16f4   :  { %v1497_v20 = vmul.f32 %v2385_v17, %v1487_v19 }
0x16f6   :  { %1499 = vrot.lane.b32.xlu2 %v1497_v20, %s2602_s30 }
0x1750   :  { %v1500_v18 = vpop.permute.xlu2 %1499 }
0x1751   :  { %1502 = vst.msk [vmem:[#allocation2 + $0x8] sm:$0xff] %vm830_vm9, %v1500_v18  ;;  %2238 = vmatmul.msk.f32.vlgmr.msra.gmra.mxu0 %vm830_vm9, %v1500_v18  ;;  %2239 = vmatmul.msk.f32.vlgmr.msra.gmra.mxu3 %vm830_vm9, %v1500_v18 }
0x1752   :  { %1893 = vmatpush.msra.mxu0 %v3086_v38  ;;  %1913 = vmatpush.msra.mxu3 %v3067_v30 }
0x1754   :  { %1894 = vmatpush.msra.mxu0 %v3083_v33  ;;  %1914 = vmatpush.msra.mxu3 %v3064_v29 }
0x1756   :  { %1895 = vmatpush.msra.mxu0 %v3094_v42  ;;  %1915 = vmatpush.msra.mxu3 %v3070_v31 }
0x1758   :  { %1896 = vmatpush.msra.mxu0 %v3104_v37  ;;  %1916 = vmatpush.msra.mxu3 %v3075_v32 }
0x175a   :  { %1897 = vmatpush.msra.mxu0 %v3111_v41  ;;  %1917 = vmatpush.msra.mxu3 %v3080_v36 }
0x175c   :  { %1898 = vmatpush.msra.mxu0 %v3120_v43  ;;  %1918 = vmatpush.msra.mxu3 %v3091_v40 }
0x175e   :  { %1899 = vmatpush.msra.mxu0 %v3128_v44  ;;  %1919 = vmatpush.msra.mxu3 %v3101_v16 }
0x1760   :  { %1900 = vmatpush.msra.mxu0 %v3055_v2  ;;  %1920 = vmatpush.msra.mxu3 %v3053_v63 }
0x17ce   :  { %v1522_v34 = vpop.f32.mrf.mxu0 }
0x17cf   :  { %v1523_v21 = vadd.f32 %v1522_v34, %v3203_v35 }
0x17d1   :  { %v2240_v22 = vmul.f32 -1.442695, %v1523_v21 }
0x17d3   :  { %2386 = vpow2.f32 %v2240_v22 }
0x17d4   :  { %v1542_v25 = vpop.f32.mrf.mxu3 }
0x17d5   :  { %v1543_v28 = vadd.f32 %v1542_v25, %v3206_v52 }
0x17d7   :  { %v2241_v45 = vmul.f32 -1.442695, %v1543_v28 }
0x17d9   :  { %v2387_v23 = vpop.eup %2386 }
0x17da   :  { %v1548_v24 = vadd.f32 1.0, %v2387_v23 }
0x17dc   :  { %2388 = vrcp.f32 %v1548_v24  ;;  %v1560_v48 = vand.u32 2147483648, %v1548_v24  ;;  %v1558_v50 = vand.u32 2147483647, %v1548_v24  ;;  %vm1554_vm6 = vweird.f32 %v1548_v24 }
0x17dd   :  { %2390 = vtanh.f32 %v1543_v28 }
0x17de   :  { %v1561_v54 = vor.u32 1.1754944e-38, %v1560_v48  ;;  %vm1559_vm8 = vcmp.eq.f32.partialorder %v1558_v50, 8.507059e+37  ;;  %2392 = vpow2.f32 %v2241_v45  ;;  %v2463_v45 = vld [vmem:[%s3395_s15 + $0x10] sm:$0xff] }
0x17e2   :  { %v2389_v27 = vpop.eup %2388 }
0x17e3   :  { %v1550_v46 = vmul.f32 %v2389_v27, %v1548_v24  ;;  %vm1555_vm5 = vweird.f32 %v2389_v27  ;;  %v2391_v56 = vpop.eup %2390 }
0x17e4   :  { %vm1556_vm7 = vmor %vm1554_vm6, %vm1555_vm5  ;;  %v2393_v57 = vpop.eup %2392 }
0x17e5   :  { %v1551_v47 = vsub.f32 1.0, %v1550_v46  ;;  %v1568_v58 = vadd.f32 1.0, %v2393_v57  ;;  %v2464_v57 = vld [vmem:[%s3395_s15 + $0x8] sm:$0xff] }
0x17e7   :  { %v1552_v49 = vmul.f32 %v2389_v27, %v1551_v47  ;;  %2394 = vrcp.f32 %v1568_v58  ;;  %v1580_v3 = vand.u32 2147483648, %v1568_v58  ;;  %vm1574_vm11 = vweird.f32 %v1568_v58 }
0x17e8   :  { %v1578_v9 = vand.u32 2147483647, %v1568_v58 }
0x17e9   :  { %v1553_v51 = vadd.f32 %v2389_v27, %v1552_v49  ;;  %v1581_v6 = vor.u32 1.1754944e-38, %v1580_v3 }
0x17ea   :  { %vm1579_vm13 = vcmp.eq.f32.partialorder %v1578_v9, 8.507059e+37 }
0x17eb   :  { %v1557_v55 = vsel %vm1556_vm7, %v2389_v27, %v1553_v51 }
0x17ec   :  { %v1562_v26 = vsel %vm1559_vm8, %v1561_v54, %v1557_v55  ;;  %v2458_v54 = vld [vmem:[%s3395_s15 + $0x38] sm:$0xff]  ;;  %v2459_v55 = vld [vmem:[%s3395_s15 + $0x30] sm:$0xff] }
0x17ed   :  { %v1585_v39 = vmul.f32 %v2391_v56, %v1562_v26  ;;  %v2395_v59 = vpop.eup %2394  ;;  %v1584_v0 = vmul.f32 %v1562_v26, %v3211_v11  ;;  %v2460_v56 = vld [vmem:[%s3395_s15 + $0x28] sm:$0xff]  ;;  %v2461_v26 = vld [vmem:[%s3395_s15 + $0x20] sm:$0xff] }
0x17ee   :  { %v1570_v60 = vmul.f32 %v2395_v59, %v1568_v58  ;;  %vm1575_vm10 = vweird.f32 %v2395_v59  ;;  %v2465_v58 = vld [vmem:[%s3395_s15] sm:$0xff] }
0x17ef   :  { %1587 = vrot.lane.b32.xlu0 %v1585_v39, %s2602_s30  ;;  %vm1576_vm12 = vmor %vm1574_vm11, %vm1575_vm10  ;;  %v2462_v39 = vld [vmem:[%s3395_s15 + $0x18] sm:$0xff] }
0x17f0   :  { %v1571_v61 = vsub.f32 1.0, %v1570_v60 }
0x17f2   :  { %v1572_v62 = vmul.f32 %v2395_v59, %v1571_v61 }
0x17f4   :  { %v1573_v7 = vadd.f32 %v2395_v59, %v1572_v62 }
0x17f6   :  { %v1577_v5 = vsel %vm1576_vm12, %v2395_v59, %v1573_v7 }
0x17f7   :  { %v1582_v10 = vsel %vm1579_vm13, %v1581_v6, %v1577_v5 }
0x1861   :  { %v1588_v1 = vpop.permute.xlu0 %1587 }
0x1862   :  { %v3238_v4 = vadd.f32 %v1588_v1, %v1584_v0 }
0x1864   :  { %2396 = vtanh.f32 %v3238_v4 }
0x186a   :  { %v2397_v8 = vpop.eup %2396 }
0x186b   :  { %v1592_v13 = vmul.f32 %v2397_v8, %v1582_v10 }
0x186d   :  { %1594 = vrot.lane.b32.xlu1 %v1592_v13, %s2602_s30 }
0x18df   :  { %v1595_v11 = vpop.permute.xlu1 %1594 }
0x18e0   :  { %1597 = vst.msk [vmem:[#allocation2 + $0x10] sm:$0xff] %vm830_vm9, %v1595_v11  ;;  %2242 = vmatmul.msk.f32.vlgmr.msrb.gmra.mxu1 %vm830_vm9, %v1595_v11  ;;  %2243 = vmatmul.msk.f32.vlgmr.msrb.gmra.mxu2 %vm830_vm9, %v1595_v11 }
0x18e1   :  { %1988 = vmatpush.msrb.mxu1 %v3086_v38  ;;  %2008 = vmatpush.msrb.mxu2 %v3067_v30 }
0x18e3   :  { %1989 = vmatpush.msrb.mxu1 %v3083_v33  ;;  %2009 = vmatpush.msrb.mxu2 %v3064_v29 }
0x18e5   :  { %1990 = vmatpush.msrb.mxu1 %v3094_v42  ;;  %2010 = vmatpush.msrb.mxu2 %v3070_v31 }
0x18e7   :  { %1991 = vmatpush.msrb.mxu1 %v3104_v37  ;;  %2011 = vmatpush.msrb.mxu2 %v3075_v32 }
0x18e9   :  { %1992 = vmatpush.msrb.mxu1 %v3111_v41  ;;  %2012 = vmatpush.msrb.mxu2 %v3080_v36 }
0x18eb   :  { %1993 = vmatpush.msrb.mxu1 %v3120_v43  ;;  %2013 = vmatpush.msrb.mxu2 %v3091_v40 }
0x18ed   :  { %1994 = vmatpush.msrb.mxu1 %v3128_v44  ;;  %2014 = vmatpush.msrb.mxu2 %v3101_v16 }
0x18ef   :  { %1995 = vmatpush.msrb.mxu1 %v3055_v2  ;;  %2015 = vmatpush.msrb.mxu2 %v3053_v63 }
0x195d   :  { %v1617_v29 = vpop.f32.mrf.mxu1 }
0x195e   :  { %v1618_v30 = vadd.f32 %v1617_v29, %v3203_v35 }
0x1960   :  { %v2244_v31 = vmul.f32 -1.442695, %v1618_v30 }
0x1962   :  { %2398 = vpow2.f32 %v2244_v31 }
0x1963   :  { %v1637_v36 = vpop.f32.mrf.mxu2 }
0x1964   :  { %v1638_v40 = vadd.f32 %v1637_v36, %v3206_v52 }
0x1966   :  { %v2245_v15 = vmul.f32 -1.442695, %v1638_v40 }
0x1968   :  { %v2399_v32 = vpop.eup %2398 }
0x1969   :  { %v1643_v33 = vadd.f32 1.0, %v2399_v32 }
0x196b   :  { %2400 = vrcp.f32 %v1643_v33  ;;  %v1655_v16 = vand.u32 2147483648, %v1643_v33  ;;  %v1653_v2 = vand.u32 2147483647, %v1643_v33  ;;  %vm1649_vm14 = vweird.f32 %v1643_v33 }
0x196c   :  { %2402 = vtanh.f32 %v1638_v40 }
0x196d   :  { %v1656_v43 = vor.u32 1.1754944e-38, %v1655_v16  ;;  %vm1654_vm3 = vcmp.eq.f32.partialorder %v1653_v2, 8.507059e+37  ;;  %2404 = vpow2.f32 %v2245_v15 }
0x1971   :  { %v2401_v38 = vpop.eup %2400 }
0x1972   :  { %v1645_v42 = vmul.f32 %v2401_v38, %v1643_v33  ;;  %vm1650_vm0 = vweird.f32 %v2401_v38  ;;  %v2403_v12 = vpop.eup %2402 }
0x1973   :  { %vm1651_vm15 = vmor %vm1649_vm14, %vm1650_vm0  ;;  %v2405_v17 = vpop.eup %2404 }
0x1974   :  { %v1646_v37 = vsub.f32 1.0, %v1645_v42  ;;  %v1663_v19 = vadd.f32 1.0, %v2405_v17 }
0x1976   :  { %v1647_v41 = vmul.f32 %v2401_v38, %v1646_v37  ;;  %2406 = vrcp.f32 %v1663_v19  ;;  %v1675_v27 = vand.u32 2147483648, %v1663_v19  ;;  %vm1669_vm4 = vweird.f32 %v1663_v19 }
0x1977   :  { %v1673_v28 = vand.u32 2147483647, %v1663_v19 }
0x1978   :  { %v1648_v63 = vadd.f32 %v2401_v38, %v1647_v41  ;;  %v1676_v47 = vor.u32 1.1754944e-38, %v1675_v27 }
0x1979   :  { %vm1674_vm6 = vcmp.eq.f32.partialorder %v1673_v28, 8.507059e+37 }
0x197a   :  { %v1652_v44 = vsel %vm1651_vm15, %v2401_v38, %v1648_v63 }
0x197b   :  { %v1657_v14 = vsel %vm1654_vm3, %v1656_v43, %v1652_v44 }
0x197c   :  { %v1680_v53 = vmul.f32 %v2403_v12, %v1657_v14  ;;  %v2407_v20 = vpop.eup %2406  ;;  %v1679_v22 = vmul.f32 %v1657_v14, %v3238_v4 }
0x197d   :  { %v1665_v18 = vmul.f32 %v2407_v20, %v1663_v19  ;;  %vm1670_vm2 = vweird.f32 %v2407_v20 }
0x197e   :  { %1682 = vrot.lane.b32.xlu2 %v1680_v53, %s2602_s30  ;;  %vm1671_vm5 = vmor %vm1669_vm4, %vm1670_vm2 }
0x197f   :  { %v1666_v34 = vsub.f32 1.0, %v1665_v18 }
0x1981   :  { %v1667_v21 = vmul.f32 %v2407_v20, %v1666_v34 }
0x1983   :  { %v1668_v25 = vadd.f32 %v2407_v20, %v1667_v21 }
0x1985   :  { %v1672_v46 = vsel %vm1671_vm5, %v2407_v20, %v1668_v25 }
0x1986   :  { %v1677_v49 = vsel %vm1674_vm6, %v1676_v47, %v1672_v46 }
0x19d8   :  { %v1683_v23 = vpop.permute.xlu2 %1682 }
0x19d9   :  { %v3265_v24 = vadd.f32 %v1683_v23, %v1679_v22 }
0x19db   :  { %2408 = vtanh.f32 %v3265_v24 }
0x19e1   :  { %v2409_v48 = vpop.eup %2408 }
0x19e2   :  { %v1687_v50 = vmul.f32 %v2409_v48, %v1677_v49 }
0x19e4   :  { %1689 = vrot.lane.b32.xlu0 %v1687_v50, %s2602_s30 }
0x1a56   :  { %v1690_v51 = vpop.permute.xlu0 %1689 }
0x1a57   :  { %1692 = vst.msk [vmem:[#allocation2 + $0x18] sm:$0xff] %vm830_vm9, %v1690_v51  ;;  %2246 = vmatmul.msk.f32.vlgmr.msrb.gmra.mxu0 %vm830_vm9, %v1690_v51  ;;  %2247 = vmatmul.msk.f32.vlgmr.msrb.gmra.mxu3 %vm830_vm9, %v1690_v51 }
0x1a58   :  { %2115 = vmatpush.msrb.mxu0 %v2458_v54 }
0x1a5a   :  { %2116 = vmatpush.msrb.mxu0 %v2459_v55 }
0x1a5c   :  { %2117 = vmatpush.msrb.mxu0 %v2460_v56 }
0x1a5e   :  { %2118 = vmatpush.msrb.mxu0 %v2461_v26 }
0x1a60   :  { %2119 = vmatpush.msrb.mxu0 %v2462_v39 }
0x1a62   :  { %2120 = vmatpush.msrb.mxu0 %v2463_v45 }
0x1a64   :  { %2121 = vmatpush.msrb.mxu0 %v2464_v57 }
0x1a66   :  { %2122 = vmatpush.msrb.mxu0 %v2465_v58 }
0x1ad4   :  { %v1712_v59 = vpop.f32.mrf.mxu0 }
0x1ad5   :  { %v1713_v60 = vadd.f32 %v1712_v59, %v3203_v35 }
0x1ad7   :  { %v2248_v61 = vmul.f32 -1.442695, %v1713_v60 }
0x1ad9   :  { %2410 = vpow2.f32 %v2248_v61 }
0x1ada   :  { %v1732_v1 = vpop.f32.mrf.mxu3 }
0x1adb   :  { %v1733_v7 = vadd.f32 %v1732_v1, %v3206_v52 }
0x1add   :  { %v2249_v32 = vmul.f32 -1.442695, %v1733_v7 }
0x1adf   :  { %v2411_v62 = vpop.eup %2410 }
0x1ae0   :  { %v1738_v0 = vadd.f32 1.0, %v2411_v62 }
0x1ae2   :  { %2412 = vrcp.f32 %v1738_v0  ;;  %v1750_v5 = vand.u32 2147483648, %v1738_v0  ;;  %v1748_v8 = vand.u32 2147483647, %v1738_v0  ;;  %vm1744_vm8 = vweird.f32 %v1738_v0 }
0x1ae3   :  { %2414 = vtanh.f32 %v1733_v7 }
0x1ae4   :  { %v1751_v13 = vor.u32 1.1754944e-38, %v1750_v5  ;;  %vm1749_vm11 = vcmp.eq.f32.partialorder %v1748_v8, 8.507059e+37  ;;  %2416 = vpow2.f32 %v2249_v32 }
0x1ae8   :  { %v2413_v4 = vpop.eup %2412 }
0x1ae9   :  { %v1740_v3 = vmul.f32 %v2413_v4, %v1738_v0  ;;  %vm1745_vm7 = vweird.f32 %v2413_v4  ;;  %v2415_v29 = vpop.eup %2414 }
0x1aea   :  { %vm1746_vm10 = vmor %vm1744_vm8, %vm1745_vm7  ;;  %v2417_v33 = vpop.eup %2416 }
0x1aeb   :  { %v1741_v9 = vsub.f32 1.0, %v1740_v3  ;;  %v1758_v36 = vadd.f32 1.0, %v2417_v33 }
0x1aed   :  { %v1742_v6 = vmul.f32 %v2413_v4, %v1741_v9  ;;  %2418 = vrcp.f32 %v1758_v36  ;;  %v1770_v43 = vand.u32 2147483648, %v1758_v36  ;;  %vm1764_vm13 = vweird.f32 %v1758_v36 }
0x1aee   :  { %v1768_v44 = vand.u32 2147483647, %v1758_v36 }
0x1aef   :  { %v1743_v10 = vadd.f32 %v2413_v4, %v1742_v6  ;;  %v1771_v14 = vor.u32 1.1754944e-38, %v1770_v43 }
0x1af0   :  { %vm1769_vm14 = vcmp.eq.f32.partialorder %v1768_v44, 8.507059e+37 }
0x1af1   :  { %v1747_v11 = vsel %vm1746_vm10, %v2413_v4, %v1743_v10 }
0x1af2   :  { %v1752_v30 = vsel %vm1749_vm11, %v1751_v13, %v1747_v11  ;;  %v2073_v13 = vld [vmem:[#allocation2] sm:$0xff]  ;;  %v2074_v11 = vld [vmem:[#allocation2 + $0x8] sm:$0xff] }
0x1af3   :  { %v1775_v31 = vmul.f32 %v2415_v29, %v1752_v30  ;;  %v2419_v38 = vpop.eup %2418  ;;  %v1774_v16 = vmul.f32 %v1752_v30, %v3265_v24  ;;  %v2075_v29 = vld [vmem:[#allocation2 + $0x10] sm:$0xff]  ;;  %v2076_v30 = vld [vmem:[#allocation2 + $0x18] sm:$0xff] }
0x1af4   :  { %v1760_v40 = vmul.f32 %v2419_v38, %v1758_v36  ;;  %vm1765_vm12 = vweird.f32 %v2419_v38 }
0x1af5   :  { %1777 = vrot.lane.b32.xlu1 %v1775_v31, %s2602_s30  ;;  %vm1766_vm0 = vmor %vm1764_vm13, %vm1765_vm12 }
0x1af6   :  { %v1761_v42 = vsub.f32 1.0, %v1760_v40  ;;  %v3324_v40 = vld [vmem:[%s3396_s16] ss:$0 sm:$0xff] }
0x1af8   :  { %v1762_v37 = vmul.f32 %v2419_v38, %v1761_v42 }
0x1afa   :  { %v1763_v63 = vadd.f32 %v2419_v38, %v1762_v37 }
0x1afc   :  { %v1767_v12 = vsel %vm1766_vm0, %v2419_v38, %v1763_v63 }
0x1afd   :  { %v1772_v15 = vsel %vm1769_vm14, %v1771_v14, %v1767_v12 }
0x1b67   :  { %v1778_v41 = vpop.permute.xlu1 %1777 }
0x1b68   :  { %v1780_v2 = vadd.f32 %v1778_v41, %v1774_v16 }
0x1b6a   :  { %2420 = vtanh.f32 %v1780_v2 }
0x1b70   :  { %v2421_v53 = vpop.eup %2420 }
0x1b71   :  { %v1782_v17 = vmul.f32 %v2421_v53, %v1772_v15 }
0x1b73   :  { %1784 = vrot.lane.b32.xlu2 %v1782_v17, %s2602_s30 }
0x1bcd   :  { %v1785_v19 = vpop.permute.xlu2 %1784 }
0x1bce   :  { %1787 = vst.msk [vmem:[#allocation2 + $0x20] sm:$0xff] %vm830_vm9, %v1785_v19  ;;  %2250 = vmatmul.msk.f32.vlgmr.msra.gmra.mxu1 %vm830_vm9, %v1785_v19  ;;  %2251 = vmatmul.msk.f32.vlgmr.msra.gmra.mxu2 %vm830_vm9, %v1785_v19 }
0x1bd5   :  { %v2077_v31 = vld [vmem:[#allocation2 + $0x20] sm:$0xff] }
0x1c4b   :  { %v1807_v20 = vpop.f32.mrf.mxu1 }
0x1c4c   :  { %v1808_v18 = vadd.f32 %v1807_v20, %v3203_v35 }
0x1c4e   :  { %v2252_v34 = vmul.f32 -1.442695, %v1808_v18 }
0x1c50   :  { %2422 = vpow2.f32 %v2252_v34 }
0x1c51   :  { %v1827_v23 = vpop.f32.mrf.mxu2 }
0x1c52   :  { %v1828_v25 = vadd.f32 %v1827_v23, %v3206_v52 }
0x1c54   :  { %v2253_v26 = vmul.f32 -1.442695, %v1828_v25 }
0x1c56   :  { %v2423_v21 = vpop.eup %2422 }
0x1c57   :  { %v1833_v22 = vadd.f32 1.0, %v2423_v21 }
0x1c59   :  { %2424 = vrcp.f32 %v1833_v22  ;;  %v1845_v46 = vand.u32 2147483648, %v1833_v22  ;;  %v1843_v48 = vand.u32 2147483647, %v1833_v22  ;;  %vm1839_vm3 = vweird.f32 %v1833_v22 }
0x1c5a   :  { %2426 = vtanh.f32 %v1828_v25 }
0x1c5b   :  { %v1846_v50 = vor.u32 1.1754944e-38, %v1845_v46  ;;  %vm1844_vm4 = vcmp.eq.f32.partialorder %v1843_v48, 8.507059e+37  ;;  %2428 = vpow2.f32 %v2253_v26 }
0x1c5f   :  { %v2425_v24 = vpop.eup %2424 }
0x1c60   :  { %v1835_v27 = vmul.f32 %v2425_v24, %v1833_v22  ;;  %vm1840_vm15 = vweird.f32 %v2425_v24  ;;  %v2427_v54 = vpop.eup %2426 }
0x1c61   :  { %vm1841_vm2 = vmor %vm1839_vm3, %vm1840_vm15  ;;  %v2429_v39 = vpop.eup %2428 }
0x1c62   :  { %v1836_v28 = vsub.f32 1.0, %v1835_v27  ;;  %v1853_v45 = vadd.f32 1.0, %v2429_v39 }
0x1c64   :  { %v1837_v47 = vmul.f32 %v2425_v24, %v1836_v28  ;;  %2430 = vrcp.f32 %v1853_v45  ;;  %v1865_v4 = vand.u32 2147483648, %v1853_v45  ;;  %vm1859_vm6 = vweird.f32 %v1853_v45 }
0x1c65   :  { %v1863_v7 = vand.u32 2147483647, %v1853_v45 }
0x1c66   :  { %v1838_v49 = vadd.f32 %v2425_v24, %v1837_v47  ;;  %v1866_v9 = vor.u32 1.1754944e-38, %v1865_v4 }
0x1c67   :  { %vm1864_vm8 = vcmp.eq.f32.partialorder %v1863_v7, 8.507059e+37 }
0x1c68   :  { %v1842_v51 = vsel %vm1841_vm2, %v2425_v24, %v1838_v49 }
0x1c69   :  { %v1847_v55 = vsel %vm1844_vm4, %v1846_v50, %v1842_v51 }
0x1c6a   :  { %v1870_v56 = vmul.f32 %v2427_v54, %v1847_v55  ;;  %v2431_v57 = vpop.eup %2430  ;;  %v1869_v61 = vmul.f32 %v1847_v55, %v1780_v2 }
0x1c6b   :  { %v1855_v58 = vmul.f32 %v2431_v57, %v1853_v45  ;;  %vm1860_vm5 = vweird.f32 %v2431_v57 }
0x1c6c   :  { %1872 = vrot.lane.b32.xlu0 %v1870_v56, %s2602_s30  ;;  %vm1861_vm7 = vmor %vm1859_vm6, %vm1860_vm5 }
0x1c6d   :  { %v1856_v59 = vsub.f32 1.0, %v1855_v58 }
0x1c6f   :  { %v1857_v60 = vmul.f32 %v2431_v57, %v1856_v59 }
0x1c71   :  { %v1858_v1 = vadd.f32 %v2431_v57, %v1857_v60 }
0x1c73   :  { %v1862_v3 = vsel %vm1861_vm7, %v2431_v57, %v1858_v1 }
0x1c74   :  { %v1867_v6 = vsel %vm1864_vm8, %v1866_v9, %v1862_v3 }
0x1cde   :  { %v1873_v62 = vpop.permute.xlu0 %1872 }
0x1cdf   :  { %v3307_v0 = vadd.f32 %v1873_v62, %v1869_v61 }
0x1ce1   :  { %2432 = vtanh.f32 %v3307_v0 }
0x1ce7   :  { %v2433_v5 = vpop.eup %2432 }
0x1ce8   :  { %v1877_v8 = vmul.f32 %v2433_v5, %v1867_v6 }
0x1cea   :  { %1879 = vrot.lane.b32.xlu1 %v1877_v8, %s2602_s30 }
0x1d5c   :  { %v1880_v10 = vpop.permute.xlu1 %1879 }
0x1d5d   :  { %1882 = vst.msk [vmem:[#allocation2 + $0x28] sm:$0xff] %vm830_vm9, %v1880_v10  ;;  %2254 = vmatmul.msk.f32.vlgmr.msra.gmra.mxu0 %vm830_vm9, %v1880_v10  ;;  %2255 = vmatmul.msk.f32.vlgmr.msra.gmra.mxu3 %vm830_vm9, %v1880_v10 }
0x1d64   :  { %v2078_v32 = vld [vmem:[#allocation2 + $0x28] sm:$0xff] }
0x1d65   :  { %2262 = vmatmul.msk.f32.vlgmr.msrb.gmra.mxu0 %vm830_vm9, %v2073_v13 }
0x1d6d   :  { %2263 = vmatmul.msk.f32.gmra.mxu0 %vm830_vm9, %v2074_v11 }
0x1d75   :  { %2264 = vmatmul.msk.f32.gmra.mxu0 %vm830_vm9, %v2075_v29 }
0x1d7d   :  { %2265 = vmatmul.msk.f32.gmra.mxu0 %vm830_vm9, %v2076_v30 }
0x1d85   :  { %2266 = vmatmul.msk.f32.gmra.mxu0 %vm830_vm9, %v2077_v31 }
0x1d8d   :  { %2267 = vmatmul.msk.f32.gmra.mxu0 %vm830_vm9, %v2078_v32 }
0x1dda   :  { %v1902_v33 = vpop.f32.mrf.mxu0 }
0x1ddb   :  { %v1903_v36 = vadd.f32 %v1902_v33, %v3203_v35 }
0x1ddd   :  { %v2256_v38 = vmul.f32 -1.442695, %v1903_v36 }
0x1ddf   :  { %2434 = vpow2.f32 %v2256_v38 }
0x1de0   :  { %v1922_v63 = vpop.f32.mrf.mxu3 }
0x1de1   :  { %v1923_v12 = vadd.f32 %v1922_v63, %v3206_v52 }
0x1de2   :  { %v2124_v42 = vpop.f32.mrf.mxu0 }
0x1de3   :  { %v2125_v37 = vadd.f32 %v3324_v40, %v2124_v42  ;;  %v2257_v50 = vmul.f32 -1.442695, %v1923_v12 }
0x1de5   :  { %v2435_v16 = vpop.eup %2434  ;;  %2148 = vst.msk [vmem:[%s3397_s17] sm:$0xff] %vm147_vm1, %v2125_v37 }
0x1de6   :  { %v1928_v41 = vadd.f32 1.0, %v2435_v16 }
0x1de8   :  { %2436 = vrcp.f32 %v1928_v41  ;;  %v1940_v17 = vand.u32 2147483648, %v1928_v41  ;;  %v1938_v18 = vand.u32 2147483647, %v1928_v41  ;;  %vm1934_vm11 = vweird.f32 %v1928_v41 }
0x1de9   :  { %2438 = vtanh.f32 %v1923_v12 }
0x1dea   :  { %v2127_v2 = vpop.f32.mrf.mxu0  ;;  %v1941_v21 = vor.u32 1.1754944e-38, %v1940_v17  ;;  %vm1939_vm13 = vcmp.eq.f32.partialorder %v1938_v18, 8.507059e+37  ;;  %2440 = vpow2.f32 %v2257_v50 }
0x1deb   :  { %v2128_v43 = vadd.f32 %v3324_v40, %v2127_v2 }
0x1ded   :  { %2149 = vst.msk [vmem:[%s3397_s17 + $0x8] sm:$0xff] %vm147_vm1, %v2128_v43 }
0x1dee   :  { %v2437_v44 = vpop.eup %2436 }
0x1def   :  { %v1930_v14 = vmul.f32 %v2437_v44, %v1928_v41  ;;  %vm1935_vm10 = vweird.f32 %v2437_v44  ;;  %v2439_v23 = vpop.eup %2438 }
0x1df0   :  { %vm1936_vm12 = vmor %vm1934_vm11, %vm1935_vm10  ;;  %v2441_v51 = vpop.eup %2440 }
0x1df1   :  { %v1931_v53 = vsub.f32 1.0, %v1930_v14  ;;  %v1948_v54 = vadd.f32 1.0, %v2441_v51 }
0x1df2   :  { %v2130_v15 = vpop.f32.mrf.mxu0 }
0x1df3   :  { %v2131_v19 = vadd.f32 %v3324_v40, %v2130_v15  ;;  %v1932_v20 = vmul.f32 %v2437_v44, %v1931_v53  ;;  %2442 = vrcp.f32 %v1948_v54  ;;  %v1960_v60 = vand.u32 2147483648, %v1948_v54 }
0x1df4   :  { %vm1954_vm14 = vweird.f32 %v1948_v54  ;;  %v1958_v61 = vand.u32 2147483647, %v1948_v54 }
0x1df5   :  { %2150 = vst.msk [vmem:[%s3397_s17 + $0x10] sm:$0xff] %vm147_vm1, %v2131_v19  ;;  %v1933_v34 = vadd.f32 %v2437_v44, %v1932_v20  ;;  %v1961_v1 = vor.u32 1.1754944e-38, %v1960_v60 }
0x1df6   :  { %vm1959_vm3 = vcmp.eq.f32.partialorder %v1958_v61, 8.507059e+37 }
0x1df7   :  { %v1937_v22 = vsel %vm1936_vm12, %v2437_v44, %v1933_v34 }
0x1df8   :  { %v1942_v24 = vsel %vm1939_vm13, %v1941_v21, %v1937_v22 }
0x1df9   :  { %v1965_v25 = vmul.f32 %v2439_v23, %v1942_v24  ;;  %v2443_v55 = vpop.eup %2442  ;;  %v1964_v45 = vmul.f32 %v1942_v24, %v3307_v0 }
0x1dfa   :  { %v2133_v27 = vpop.f32.mrf.mxu0  ;;  %v1950_v56 = vmul.f32 %v2443_v55, %v1948_v54  ;;  %vm1955_vm0 = vweird.f32 %v2443_v55 }
0x1dfb   :  { %v2134_v28 = vadd.f32 %v3324_v40, %v2133_v27  ;;  %1967 = vrot.lane.b32.xlu2 %v1965_v25, %s2602_s30  ;;  %vm1956_vm15 = vmor %vm1954_vm14, %vm1955_vm0 }
0x1dfc   :  { %v1951_v26 = vsub.f32 1.0, %v1950_v56 }
0x1dfd   :  { %2151 = vst.msk [vmem:[%s3397_s17 + $0x18] sm:$0xff] %vm147_vm1, %v2134_v28 }
0x1dfe   :  { %v1952_v39 = vmul.f32 %v2443_v55, %v1951_v26 }
0x1e00   :  { %v1953_v59 = vadd.f32 %v2443_v55, %v1952_v39 }
0x1e02   :  { %v2136_v46 = vpop.f32.mrf.mxu0  ;;  %v1957_v62 = vsel %vm1956_vm15, %v2443_v55, %v1953_v59 }
0x1e03   :  { %v2137_v47 = vadd.f32 %v3324_v40, %v2136_v46  ;;  %v1962_v7 = vsel %vm1959_vm3, %v1961_v1, %v1957_v62 }
0x1e05   :  { %2152 = vst.msk [vmem:[%s3397_s17 + $0x20] sm:$0xff] %vm147_vm1, %v2137_v47 }
0x1e0a   :  { %v2139_v48 = vpop.f32.mrf.mxu0 }
0x1e0b   :  { %v2140_v49 = vadd.f32 %v3324_v40, %v2139_v48 }
0x1e0d   :  { %2153 = vst.msk [vmem:[%s3397_s17 + $0x28] sm:$0xff] %vm147_vm1, %v2140_v49 }
0x1e55   :  { %v1968_v57 = vpop.permute.xlu2 %1967 }
0x1e56   :  { %v1970_v58 = vadd.f32 %v1968_v57, %v1964_v45 }
0x1e58   :  { %2444 = vtanh.f32 %v1970_v58 }
0x1e5e   :  { %v2445_v4 = vpop.eup %2444 }
0x1e5f   :  { %v1972_v3 = vmul.f32 %v2445_v4, %v1962_v7 }
0x1e61   :  { %1974 = vrot.lane.b32.xlu0 %v1972_v3, %s2602_s30 }
0x1ed3   :  { %v1975_v9 = vpop.permute.xlu0 %1974 }
0x1ed4   :  { %1977 = vst.msk [vmem:[#allocation2 + $0x30] sm:$0xff] %vm830_vm9, %v1975_v9  ;;  %2258 = vmatmul.msk.f32.vlgmr.msrb.gmra.mxu1 %vm830_vm9, %v1975_v9  ;;  %2259 = vmatmul.msk.f32.vlgmr.msrb.gmra.mxu2 %vm830_vm9, %v1975_v9 }
0x1edb   :  { %v2079_v0 = vld [vmem:[#allocation2 + $0x30] sm:$0xff] }
0x1edc   :  { %2268 = vmatmul.msk.f32.gmra.mxu0 %vm830_vm9, %v2079_v0 }
0x1f51   :  { %v1997_v5 = vpop.f32.mrf.mxu1 }
0x1f52   :  { %v1998_v6 = vadd.f32 %v1997_v5, %v3203_v35 }
0x1f54   :  { %v2260_v8 = vmul.f32 -1.442695, %v1998_v6 }
0x1f56   :  { %2446 = vpow2.f32 %v2260_v8 }
0x1f57   :  { %v2017_v30 = vpop.f32.mrf.mxu2 }
0x1f58   :  { %v2018_v32 = vadd.f32 %v2017_v30, %v3206_v52 }
0x1f59   :  { %v2142_v10 = vpop.f32.mrf.mxu0 }
0x1f5a   :  { %v2143_v13 = vadd.f32 %v3324_v40, %v2142_v10  ;;  %v2261_v44 = vmul.f32 -1.442695, %v2018_v32 }
0x1f5c   :  { %v2447_v11 = vpop.eup %2446  ;;  %2154 = vst.msk [vmem:[%s3397_s17 + $0x30] sm:$0xff] %vm147_vm1, %v2143_v13 }
0x1f5d   :  { %v2023_v29 = vadd.f32 1.0, %v2447_v11 }
0x1f5f   :  { %2448 = vrcp.f32 %v2023_v29  ;;  %v2035_v35 = vand.u32 2147483648, %v2023_v29  ;;  %v2033_v42 = vand.u32 2147483647, %v2023_v29  ;;  %vm2029_vm4 = vweird.f32 %v2023_v29 }
0x1f60   :  { %2450 = vtanh.f32 %v2018_v32 }
0x1f61   :  { %v2036_v16 = vor.u32 1.1754944e-38, %v2035_v35  ;;  %vm2034_vm6 = vcmp.eq.f32.partialorder %v2033_v42, 8.507059e+37  ;;  %2452 = vpow2.f32 %v2261_v44 }
0x1f65   :  { %v2449_v31 = vpop.eup %2448 }
0x1f66   :  { %v2025_v33 = vmul.f32 %v2449_v31, %v2023_v29  ;;  %vm2030_vm2 = vweird.f32 %v2449_v31  ;;  %v2451_v2 = vpop.eup %2450 }
0x1f67   :  { %vm2031_vm5 = vmor %vm2029_vm4, %vm2030_vm2  ;;  %v2453_v52 = vpop.eup %2452 }
0x1f68   :  { %v2026_v36 = vsub.f32 1.0, %v2025_v33  ;;  %v2043_v12 = vadd.f32 1.0, %v2453_v52 }
0x1f6a   :  { %v2027_v38 = vmul.f32 %v2449_v31, %v2026_v36  ;;  %2454 = vrcp.f32 %v2043_v12  ;;  %v2055_v21 = vand.u32 2147483648, %v2043_v12  ;;  %vm2049_vm8 = vweird.f32 %v2043_v12 }
0x1f6b   :  { %v2053_v22 = vand.u32 2147483647, %v2043_v12 }
0x1f6c   :  { %v2028_v37 = vadd.f32 %v2449_v31, %v2027_v38  ;;  %v2056_v24 = vor.u32 1.1754944e-38, %v2055_v21 }
0x1f6d   :  { %vm2054_vm11 = vcmp.eq.f32.partialorder %v2053_v22, 8.507059e+37 }
0x1f6e   :  { %v2032_v41 = vsel %vm2031_vm5, %v2449_v31, %v2028_v37 }
0x1f6f   :  { %v2037_v63 = vsel %vm2034_vm6, %v2036_v16, %v2032_v41 }
0x1f70   :  { %v2060_v43 = vmul.f32 %v2451_v2, %v2037_v63  ;;  %v2455_v14 = vpop.eup %2454  ;;  %v2059_v19 = vmul.f32 %v2037_v63, %v1970_v58 }
0x1f71   :  { %v2045_v53 = vmul.f32 %v2455_v14, %v2043_v12  ;;  %vm2050_vm7 = vweird.f32 %v2455_v14 }
0x1f72   :  { %2062 = vrot.lane.b32.xlu1 %v2060_v43, %s2602_s30  ;;  %vm2051_vm10 = vmor %vm2049_vm8, %vm2050_vm7 }
0x1f73   :  { %v2046_v15 = vsub.f32 1.0, %v2045_v53 }
0x1f75   :  { %v2047_v17 = vmul.f32 %v2455_v14, %v2046_v15 }
0x1f77   :  { %v2048_v34 = vadd.f32 %v2455_v14, %v2047_v17 }
0x1f79   :  { %v2052_v23 = vsel %vm2051_vm10, %v2455_v14, %v2048_v34 }
0x1f7a   :  { %v2057_v27 = vsel %vm2054_vm11, %v2056_v24, %v2052_v23 }
0x1fe4   :  { %v2063_v20 = vpop.permute.xlu1 %2062 }
0x1fe5   :  { %v2065_v18 = vadd.f32 %v2063_v20, %v2059_v19 }
0x1fe7   :  { %2456 = vtanh.f32 %v2065_v18 }
0x1fed   :  { %v2457_v25 = vpop.eup %2456 }
0x1fee   :  { %v2067_v28 = vmul.f32 %v2457_v25, %v2057_v27 }
0x1ff0   :  { %2069 = vrot.lane.b32.xlu2 %v2067_v28, %s2602_s30 }
0x204a   :  { %v2070_v46 = vpop.permute.xlu2 %2069 }
0x204b   :  { %2072 = vst.msk [vmem:[#allocation2 + $0x38] sm:$0xff] %vm830_vm9, %v2070_v46 }
0x2052   :  { %v2080_v47 = vld [vmem:[#allocation2 + $0x38] sm:$0xff] }
0x2053   :  { %2269 = vmatmul.msk.f32.gmra.mxu0 %vm830_vm9, %v2080_v47 }
0x20d0   :  { %v2145_v48 = vpop.f32.mrf.mxu0 }
0x20d1   :  { %v2146_v49 = vadd.f32 %v3324_v40, %v2145_v48 }
0x20d3   :  { %2155 = vst.msk [vmem:[%s3397_s17 + $0x38] sm:$0xff] %vm147_vm1, %v2146_v49 }
0x20d4   :  { %2160 = vsyncpa [#allocation4], 1 }
0x20d5   :  { %2161 = vsyncpa [#allocation6], 1 }
0x20d6   :  { %2162 = vsyncpa [#allocation9], 1 }

</bundles_post_ra>
